<compile_context>
chip_gen: v7x
topology: tpu7x:2x2x1
jax: 0.10.0
libtpu: 0.0.40
codegen_flags: <defaults>
</compile_context>

<pallas_src>
import functools

import numpy as np

import jax
import jax.numpy as jnp
from jax.experimental import pallas as pl
from jax.experimental.pallas import tpu as pltpu


# ----------------------------------------------------------------------------
# Static channel-padding / packing plan (all sublane counts 8-aligned).
# ----------------------------------------------------------------------------
_IMG_C, _IMG_CP = 12, 16            # concatenated input channels (12 -> 16)
_HEAD_HP = 8                        # linear hidden 3 -> 8

# (cin_pad, cout_pad) per conv layer, in execution order.
_CONV_PLAN = (
    (16, 40),   # 0: fused fconv3[0] (out rows 0..15) + fconv4[0] (rows 16..39)
    (16, 16),   # 1: fconv3[2]   10 -> 10
    (24, 24),   # 2: fconv4[2]   20 -> 20
    (24, 16),   # 3: fconv4[4]   20 -> 12
    (32, 32),   # 4: fconv2[0]   24 -> 30   (concat img ++ img_vis4)
    (32, 24),   # 5: fconv2[2]   30 -> 20
    (24, 8),    # 6: fconv2[4]   20 -> 1
)
_W_OFFS, _B_OFFS = [], []
_wo = _bo = 0
for _cin_p, _cout_p in _CONV_PLAN:
    _W_OFFS.append(_wo)
    _B_OFFS.append(_bo)
    _wo += 3 * _cout_p
    _bo += _cout_p
_W_ROWS, _B_ROWS = _wo, _bo                      # 480, 160
_W_COLS = max(3 * c for c, _ in _CONV_PLAN)      # 96


def _flat_sizes(H, W):
    Hp, Wp = H + 2, W + 2
    n_pad = Hp * Wp                               # padded-image flat length
    n_f = ((n_pad + 127) // 128) * 128            # lane-aligned buffer length
    return Hp, Wp, n_pad, n_f


# ----------------------------------------------------------------------------
# Fused Pallas kernel: whole forward for one batch element per grid step.
# ----------------------------------------------------------------------------
def _fused_kernel(img_ref, mask_ref, wc_ref, bc_ref, hd_ref,
                  vis_ref, pred_ref, *, H, W, Wp, n_f):
    inv_hw = 1.0 / float(H * W)
    mask = mask_ref[...]                          # (1, n_f): 1.0 on interior px

    def conv3x3(x, layer, act, apply_mask=True):
        # x: (cin_pad, n_f) f32 activation in the flat zero-padded-image
        #    layout (ring + tail are zero).  One conv = 3 bf16 MXU matmuls;
        #    the kh/kw halo shifts are pltpu.roll lane rotations whose
        #    wrap-around only touches ring/tail lanes (re-zeroed by `mask`).
        cin_p, cout_p = _CONV_PLAN[layer]
        woff, boff = _W_OFFS[layer], _B_OFFS[layer]
        k = 3 * cin_p

        up = pltpu.roll(x, Wp, axis=1)            # x[p - Wp]  -> kh = -1 taps
        dn = pltpu.roll(x, n_f - Wp, axis=1)      # x[p + Wp]  -> kh = +1 taps
        p3f = jnp.concatenate([up, x, dn], axis=0)          # (3*cin_p, n_f)
        p3 = p3f.astype(jnp.bfloat16)                        # kw = 0 (centre)
        pL = pltpu.roll(p3f, 1, axis=1).astype(jnp.bfloat16)        # kw = -1
        pR = pltpu.roll(p3f, n_f - 1, axis=1).astype(jnp.bfloat16)  # kw = +1

        def w(j):                                 # kw block j of this layer
            return wc_ref[woff + j * cout_p: woff + (j + 1) * cout_p,
                          0:k].astype(jnp.bfloat16)

        y = (jnp.dot(w(1), p3, preferred_element_type=jnp.float32)
             + jnp.dot(w(0), pL, preferred_element_type=jnp.float32)
             + jnp.dot(w(2), pR, preferred_element_type=jnp.float32))
        y = y + bc_ref[boff:boff + cout_p, 0:1]
        if act == "relu":
            y = jnp.maximum(y, 0.0)
        elif act == "sigmoid":
            y = jax.nn.sigmoid(y)
        if apply_mask:
            y = y * mask                          # keep zero ring / zero tail
        return y

    img = img_ref[0]                              # (16, n_f) f32

    # Fused first layer: fconv3[0] -> rows 0..15, fconv4[0] -> rows 16..39.
    y0 = conv3x3(img, 0, "relu")                  # (40, n_f)

    # fconv3 branch -> global average pool (fused epilogue).
    a = conv3x3(y0[0:16], 1, "relu")              # (16, n_f)
    gf = jnp.sum(a, axis=1, keepdims=True) * inv_hw          # (16, 1)

    # fconv4 branch.
    v = conv3x3(y0[16:40], 2, "relu")             # (24, n_f)
    v = conv3x3(v, 3, "none")                     # img_vis4, (16, n_f)

    # fconv2 on concat([img, img_vis4]) along channels.
    c = jnp.concatenate([img, v], axis=0)         # (32, n_f)
    c = conv3x3(c, 4, "relu")
    c = conv3x3(c, 5, "relu")
    c = conv3x3(c, 6, "sigmoid", apply_mask=False)  # (8, n_f), only row 0 valid
    vis_ref[...] = c[0:1, :].reshape(1, 1, n_f)

    # Linear head: Linear(10->3) + ReLU + Linear(3->1) + Sigmoid (tiny, f32).
    w1t = hd_ref[0:_HEAD_HP, 0:16]                # (8, 16)
    b1 = hd_ref[0:_HEAD_HP, 16:17]                # (8, 1)
    w2l = hd_ref[0:_HEAD_HP, 17:18]               # (8, 1)
    b2 = hd_ref[0:1, 18:19]                       # (1, 1)
    gf_b = jnp.broadcast_to(gf, (16, 128))
    h = jnp.maximum(
        jnp.dot(w1t, gf_b, preferred_element_type=jnp.float32) + b1, 0.0)
    z = jnp.sum(h * w2l, axis=0, keepdims=True) + b2          # (1, 128)
    pred_ref[...] = jax.nn.sigmoid(z).reshape(1, 1, 128)


# ----------------------------------------------------------------------------
# One-time host-side weight packing (review: no packing ops under jit).
# ----------------------------------------------------------------------------
def _place_conv(w_hwio, b, cin_p, cout_p):
    """HWIO (3,3,cin,cout) -> (3*cout_p, _W_COLS): kw=0,1,2 blocks stacked."""
    w_hwio = np.asarray(w_hwio, np.float32)
    b = np.asarray(b, np.float32)
    cin, cout = w_hwio.shape[2], w_hwio.shape[3]
    wblk = np.zeros((3 * cout_p, _W_COLS), np.float32)
    for kw in range(3):
        for kh in range(3):
            wblk[kw * cout_p: kw * cout_p + cout,
                 kh * cin_p: kh * cin_p + cin] = w_hwio[kh, kw].T
    bblk = np.zeros((cout_p, 1), np.float32)
    bblk[:cout, 0] = b
    return wblk, bblk


def pack_params(params, H, W):
    """Pack all weights into 3 kernel operands + the interior-pixel mask."""
    p = {k: np.asarray(v, np.float32) for k, v in params.items()}
    Hp, Wp, n_pad, n_f = _flat_sizes(H, W)

    # Fused first layer: stack fconv3[0] (out 0..9) and fconv4[0] (out 16..35).
    w_l0 = np.zeros((3, 3, _IMG_C, 40), np.float32)
    w_l0[..., 0:10] = p["f3_w1"]
    w_l0[..., 16:36] = p["f4_w1"]
    b_l0 = np.zeros((40,), np.float32)
    b_l0[0:10] = p["f3_b1"]
    b_l0[16:36] = p["f4_b1"]

    # fconv2[0] sees concat([img(16-pad), img_vis4(16-pad)]) = 32 padded ch:
    # logical in-ch 0..11 -> rows 0..11, in-ch 12..23 -> rows 16..27.
    w_l4 = np.zeros((3, 3, 32, 30), np.float32)
    w_l4[:, :, 0:12, :] = p["f2_w1"][:, :, 0:12, :]
    w_l4[:, :, 16:28, :] = p["f2_w1"][:, :, 12:24, :]

    layers = [
        (w_l0, b_l0),
        (p["f3_w2"], p["f3_b2"]),
        (p["f4_w2"], p["f4_b2"]),
        (p["f4_w3"], p["f4_b3"]),
        (w_l4, p["f2_b1"]),
        (p["f2_w2"], p["f2_b2"]),
        (p["f2_w3"], p["f2_b3"]),
    ]
    wconv = np.zeros((_W_ROWS, _W_COLS), np.float32)
    bconv = np.zeros((_B_ROWS, 1), np.float32)
    for li, (w, b) in enumerate(layers):
        cin_p, cout_p = _CONV_PLAN[li]
        wblk, bblk = _place_conv(w, b, cin_p, cout_p)
        wconv[_W_OFFS[li]:_W_OFFS[li] + 3 * cout_p] = wblk
        bconv[_B_OFFS[li]:_B_OFFS[li] + cout_p] = bblk

    # Linear head packed into one small (8, 32) f32 tile.
    head = np.zeros((_HEAD_HP, 32), np.float32)
    head[0:3, 0:10] = p["l_w1"].T
    head[0:3, 16] = p["l_b1"]
    head[0:3, 17] = p["l_w2"][:, 0]
    head[0, 18] = p["l_b2"][0]

    # Interior-pixel mask in the flat padded layout (also zeroes the lane tail).
    idx = np.arange(n_f)
    hh, ww = idx // Wp, idx % Wp
    mask = (((idx < n_pad) & (hh >= 1) & (hh <= H) & (ww >= 1) & (ww <= W))
            .astype(np.float32).reshape(1, n_f))

    return {"wconv": jnp.asarray(wconv), "bconv": jnp.asarray(bconv),
            "head": jnp.asarray(head), "mask": jnp.asarray(mask)}


# ----------------------------------------------------------------------------
# Parameter init (deterministic, PyTorch-like uniform(-1/sqrt(fan_in), ...)).
# ----------------------------------------------------------------------------
def _conv_init(key, cin, cout):
    k1, k2 = jax.random.split(key)
    bound = 1.0 / jnp.sqrt(float(cin * 9))
    w = jax.random.uniform(k1, (3, 3, cin, cout), jnp.float32, -bound, bound)
    b = jax.random.uniform(k2, (cout,), jnp.float32, -bound, bound)
    return w, b


def _lin_init(key, cin, cout):
    k1, k2 = jax.random.split(key)
    bound = 1.0 / jnp.sqrt(float(cin))
    w = jax.random.uniform(k1, (cin, cout), jnp.float32, -bound, bound)
    b = jax.random.uniform(k2, (cout,), jnp.float32, -bound, bound)
    return w, b


def init_params(key):
    keys = jax.random.split(key, 10)
    p = {}
    p["f3_w1"], p["f3_b1"] = _conv_init(keys[0], 12, 10)
    p["f3_w2"], p["f3_b2"] = _conv_init(keys[1], 10, 10)
    p["f4_w1"], p["f4_b1"] = _conv_init(keys[2], 12, 20)
    p["f4_w2"], p["f4_b2"] = _conv_init(keys[3], 20, 20)
    p["f4_w3"], p["f4_b3"] = _conv_init(keys[4], 20, 12)
    p["f2_w1"], p["f2_b1"] = _conv_init(keys[5], 24, 30)
    p["f2_w2"], p["f2_b2"] = _conv_init(keys[6], 30, 20)
    p["f2_w3"], p["f2_b3"] = _conv_init(keys[7], 20, 1)
    p["l_w1"], p["l_b1"] = _lin_init(keys[8], 10, 3)
    p["l_w2"], p["l_b2"] = _lin_init(keys[9], 3, 1)
    return p


# ----------------------------------------------------------------------------
# Forward pass: one fused pallas_call for the whole network.
# ----------------------------------------------------------------------------
def discriminator_vis_forward(packed, input_img, input_densepose,
                              tar_densepose, pred):
    B, _, H, W = input_img.shape
    Hp, Wp, n_pad, n_f = _flat_sizes(H, W)
    assert packed["mask"].shape[-1] == n_f, "packed params built for other H/W"

    # Channel concat + flat zero-padded (ring + lane tail) layout: (B, 16, n_f).
    img = jnp.concatenate([input_img, input_densepose, tar_densepose, pred],
                          axis=1).astype(jnp.float32)          # (B, 12, H, W)
    img_buf = jnp.pad(img, ((0, 0), (0, _IMG_CP - _IMG_C), (1, 1), (1, 1)))
    img_buf = img_buf.reshape(B, _IMG_CP, n_pad)
    img_buf = jnp.pad(img_buf, ((0, 0), (0, 0), (0, n_f - n_pad)))

    kernel = functools.partial(_fused_kernel, H=H, W=W, Wp=Wp, n_f=n_f)

    def _rep(a):                      # whole-array operand, same block each step
        nd = a.ndim
        return pl.BlockSpec(a.shape, lambda b: (0,) * nd)

    vis_out, pred_out = pl.pallas_call(
        kernel,
        out_shape=(jax.ShapeDtypeStruct((B, 1, n_f), jnp.float32),
                   jax.ShapeDtypeStruct((B, 1, 128), jnp.float32)),
        grid_spec=pltpu.PrefetchScalarGridSpec(
            num_scalar_prefetch=0,
            grid=(B,),
            in_specs=[pl.BlockSpec((1, _IMG_CP, n_f), lambda b: (b, 0, 0)),
                      _rep(packed["mask"]),
                      _rep(packed["wconv"]),
                      _rep(packed["bconv"]),
                      _rep(packed["head"])],
            out_specs=(pl.BlockSpec((1, 1, n_f), lambda b: (b, 0, 0)),
                       pl.BlockSpec((1, 1, 128), lambda b: (b, 0, 0)))),
        compiler_params=pltpu.CompilerParams(
            dimension_semantics=("parallel",)),
    )(img_buf, packed["mask"], packed["wconv"], packed["bconv"],
      packed["head"])

    gan_pred = pred_out[:, 0, 0:1]                                   # (B, 1)
    img_vis = (vis_out[:, 0, :n_pad].reshape(B, Hp, Wp)
               [:, 1:H + 1, 1:W + 1].reshape(B, 1, H, W))            # NCHW
    return gan_pred, img_vis


# ----------------------------------------------------------------------------
# Pure-JAX reference (correctness sanity check).
# ----------------------------------------------------------------------------
def _ref_conv(x, w, b, act):
    y = jax.lax.conv_general_dilated(
        x, w, window_strides=(1, 1), padding="SAME",
        dimension_numbers=("NHWC", "HWIO", "NHWC")) + b
    if act == "relu":
        y = jnp.maximum(y, 0.0)
    elif act == "sigmoid":
        y = jax.nn.sigmoid(y)
    return y


def reference_forward(params, input_img, input_densepose, tar_densepose, pred):
    def to_nhwc(x):
        return jnp.transpose(x, (0, 2, 3, 1)).astype(jnp.float32)

    img = jnp.concatenate(
        [to_nhwc(input_img), to_nhwc(input_densepose),
         to_nhwc(tar_densepose), to_nhwc(pred)], axis=-1)
    h = _ref_conv(img, params["f3_w1"], params["f3_b1"], "relu")
    h = _ref_conv(h, params["f3_w2"], params["f3_b2"], "relu")
    gf_img = jnp.mean(h, axis=(1, 2))
    v = _ref_conv(img, params["f4_w1"], params["f4_b1"], "relu")
    v = _ref_conv(v, params["f4_w2"], params["f4_b2"], "relu")
    img_vis4 = _ref_conv(v, params["f4_w3"], params["f4_b3"], "none")
    img_cat = jnp.concatenate([img, img_vis4], axis=-1)
    c = _ref_conv(img_cat, params["f2_w1"], params["f2_b1"], "relu")
    c = _ref_conv(c, params["f2_w2"], params["f2_b2"], "relu")
    img_vis = _ref_conv(c, params["f2_w3"], params["f2_b3"], "sigmoid")
    hdn = jnp.maximum(gf_img @ params["l_w1"] + params["l_b1"], 0.0)
    gan_pred = jax.nn.sigmoid(hdn @ params["l_w2"] + params["l_b2"])
    return gan_pred, jnp.transpose(img_vis, (0, 3, 1, 2))


# ----------------------------------------------------------------------------
if __name__ == "__main__":
    key = jax.random.PRNGKey(0)
    pkey, k1, k2, k3, k4 = jax.random.split(key, 5)
    params = init_params(pkey)

    B, H, W = 2, 16, 16
    # Each of the four NCHW inputs contributes 3 channels -> 12 total.
    input_img = jax.random.normal(k1, (B, 3, H, W), jnp.float32)
    input_densepose = jax.random.normal(k2, (B, 3, H, W), jnp.float32)
    tar_densepose = jax.random.normal(k3, (B, 3, H, W), jnp.float32)
    pred = jax.random.normal(k4, (B, 3, H, W), jnp.float32)

    packed = pack_params(params, H, W)        # host-side, once (hoisted)

    fwd = jax.jit(discriminator_vis_forward)
    gan_pred, img_vis = fwd(packed, input_img, input_densepose,
                            tar_densepose, pred)
    jax.block_until_ready((gan_pred, img_vis))

    # Sanity check vs. pure-JAX f32 reference (bf16 MXU inputs -> loose tol).
    ref_pred, ref_vis = jax.jit(reference_forward)(
        params, input_img, input_densepose, tar_densepose, pred)
    assert gan_pred.shape == (B, 1) and img_vis.shape == (B, 1, H, W)
    assert jnp.allclose(gan_pred, ref_pred, atol=3e-2, rtol=3e-2)
    assert jnp.allclose(img_vis, ref_vis, atol=3e-2, rtol=3e-2)

    print("KERNEL_OK")
</pallas_src>

<mosaic_0001>
module attributes {stable_mosaic.version = 11 : i64} {
  func.func @_fused_kernel(%arg0: i32, %arg1: memref<1x16x384xf32, #tpu.memory_space<vmem>>, %arg2: memref<1x384xf32, #tpu.memory_space<vmem>>, %arg3: memref<480x96xf32, #tpu.memory_space<vmem>>, %arg4: memref<160x1xf32, #tpu.memory_space<vmem>>, %arg5: memref<8x32xf32, #tpu.memory_space<vmem>>, %arg6: memref<1x1x384xf32, #tpu.memory_space<vmem>>, %arg7: memref<1x1x128xf32, #tpu.memory_space<vmem>>) attributes {dimension_semantics = [#tpu.dimension_semantics<parallel>], iteration_bounds = array<i64: 2>, scalar_prefetch = 0 : i64, scratch_operands = 0 : i64, tpu.core_type = #tpu.core_type<tc>, window_params = [{transform_indices = @transform_0, window_bounds = array<i64: 1, 16, 384>}, {pipeline_mode = #tpu.pipeline_mode<synchronous>, transform_indices = @transform_1, window_bounds = array<i64: 1, 384>}, {pipeline_mode = #tpu.pipeline_mode<synchronous>, transform_indices = @transform_2, window_bounds = array<i64: 480, 96>}, {pipeline_mode = #tpu.pipeline_mode<synchronous>, transform_indices = @transform_3, window_bounds = array<i64: 160, 1>}, {pipeline_mode = #tpu.pipeline_mode<synchronous>, transform_indices = @transform_4, window_bounds = array<i64: 8, 32>}, {transform_indices = @transform_5, window_bounds = array<i64: 1, 1, 384>}, {transform_indices = @transform_6, window_bounds = array<i64: 1, 1, 128>}]} {
    %c0 = arith.constant 0 : index
    %c0_0 = arith.constant 0 : index
    %0 = vector.load %arg2[%c0, %c0_0] : memref<1x384xf32, #tpu.memory_space<vmem>>, vector<1x384xf32>
    %c0_1 = arith.constant 0 : index
    %c0_2 = arith.constant 0 : index
    %c0_3 = arith.constant 0 : index
    %1 = vector.load %arg1[%c0_1, %c0_2, %c0_3] : memref<1x16x384xf32, #tpu.memory_space<vmem>>, vector<1x16x384xf32>
    %2 = vector.shape_cast %1 : vector<1x16x384xf32> to vector<16x384xf32>
    %c18_i32 = arith.constant 18 : i32
    %3 = tpu.dynamic_rotate %2 by %c18_i32 dim 1 : vector<16x384xf32>, i32 -> vector<16x384xf32>
    %c366_i32 = arith.constant 366 : i32
    %4 = tpu.dynamic_rotate %2 by %c366_i32 dim 1 : vector<16x384xf32>, i32 -> vector<16x384xf32>
    %5 = tpu.concatenate %3, %2, %4 in 0 : vector<16x384xf32>, vector<16x384xf32>, vector<16x384xf32> -> vector<48x384xf32>
    %6 = arith.truncf %5 : vector<48x384xf32> to vector<48x384xbf16>
    %c1_i32 = arith.constant 1 : i32
    %7 = tpu.dynamic_rotate %5 by %c1_i32 dim 1 : vector<48x384xf32>, i32 -> vector<48x384xf32>
    %8 = arith.truncf %7 : vector<48x384xf32> to vector<48x384xbf16>
    %c383_i32 = arith.constant 383 : i32
    %9 = tpu.dynamic_rotate %5 by %c383_i32 dim 1 : vector<48x384xf32>, i32 -> vector<48x384xf32>
    %10 = arith.truncf %9 : vector<48x384xf32> to vector<48x384xbf16>
    %c40 = arith.constant 40 : index
    %c0_4 = arith.constant 0 : index
    %11 = vector.load %arg3[%c40, %c0_4] : memref<480x96xf32, #tpu.memory_space<vmem>>, vector<40x48xf32>
    %12 = arith.truncf %11 : vector<40x48xf32> to vector<40x48xbf16>
    %cst = arith.constant dense<0.000000e+00> : vector<40x384xf32>
    %13 = tpu.matmul %12, %6, %cst {dimension_numbers = #tpu.dot_dimension_numbers<[1], [0], [0], [1], [0, 0, 1, 1], [], []>} : vector<40x48xbf16>, vector<48x384xbf16>, vector<40x384xf32> -> vector<40x384xf32>
    %c0_5 = arith.constant 0 : index
    %c0_6 = arith.constant 0 : index
    %14 = vector.load %arg3[%c0_5, %c0_6] : memref<480x96xf32, #tpu.memory_space<vmem>>, vector<40x48xf32>
    %15 = arith.truncf %14 : vector<40x48xf32> to vector<40x48xbf16>
    %cst_7 = arith.constant dense<0.000000e+00> : vector<40x384xf32>
    %16 = tpu.matmul %15, %8, %cst_7 {dimension_numbers = #tpu.dot_dimension_numbers<[1], [0], [0], [1], [0, 0, 1, 1], [], []>} : vector<40x48xbf16>, vector<48x384xbf16>, vector<40x384xf32> -> vector<40x384xf32>
    %17 = arith.addf %13, %16 : vector<40x384xf32>
    %c80 = arith.constant 80 : index
    %c0_8 = arith.constant 0 : index
    %18 = vector.load %arg3[%c80, %c0_8] : memref<480x96xf32, #tpu.memory_space<vmem>>, vector<40x48xf32>
    %19 = arith.truncf %18 : vector<40x48xf32> to vector<40x48xbf16>
    %cst_9 = arith.constant dense<0.000000e+00> : vector<40x384xf32>
    %20 = tpu.matmul %19, %10, %cst_9 {dimension_numbers = #tpu.dot_dimension_numbers<[1], [0], [0], [1], [0, 0, 1, 1], [], []>} : vector<40x48xbf16>, vector<48x384xbf16>, vector<40x384xf32> -> vector<40x384xf32>
    %21 = arith.addf %17, %20 : vector<40x384xf32>
    %c0_10 = arith.constant 0 : index
    %c0_11 = arith.constant 0 : index
    %22 = vector.load %arg4[%c0_10, %c0_11] : memref<160x1xf32, #tpu.memory_space<vmem>>, vector<40x1xf32>
    %23 = vector.broadcast %22 : vector<40x1xf32> to vector<40x384xf32>
    %24 = arith.addf %21, %23 : vector<40x384xf32>
    %cst_12 = arith.constant 0.000000e+00 : f32
    %25 = vector.broadcast %cst_12 : f32 to vector<40x384xf32>
    %26 = arith.maximumf %24, %25 : vector<40x384xf32>
    %27 = vector.broadcast %0 : vector<1x384xf32> to vector<40x384xf32>
    %28 = arith.mulf %26, %27 : vector<40x384xf32>
    %29 = vector.extract_strided_slice %28 {offsets = [0, 0], sizes = [16, 384], strides = [1, 1]} : vector<40x384xf32> to vector<16x384xf32>
    %c18_i32_13 = arith.constant 18 : i32
    %30 = tpu.dynamic_rotate %29 by %c18_i32_13 dim 1 : vector<16x384xf32>, i32 -> vector<16x384xf32>
    %c366_i32_14 = arith.constant 366 : i32
    %31 = tpu.dynamic_rotate %29 by %c366_i32_14 dim 1 : vector<16x384xf32>, i32 -> vector<16x384xf32>
    %32 = tpu.concatenate %30, %29, %31 in 0 : vector<16x384xf32>, vector<16x384xf32>, vector<16x384xf32> -> vector<48x384xf32>
    %33 = arith.truncf %32 : vector<48x384xf32> to vector<48x384xbf16>
    %c1_i32_15 = arith.constant 1 : i32
    %34 = tpu.dynamic_rotate %32 by %c1_i32_15 dim 1 : vector<48x384xf32>, i32 -> vector<48x384xf32>
    %35 = arith.truncf %34 : vector<48x384xf32> to vector<48x384xbf16>
    %c383_i32_16 = arith.constant 383 : i32
    %36 = tpu.dynamic_rotate %32 by %c383_i32_16 dim 1 : vector<48x384xf32>, i32 -> vector<48x384xf32>
    %37 = arith.truncf %36 : vector<48x384xf32> to vector<48x384xbf16>
    %c136 = arith.constant 136 : index
    %c0_17 = arith.constant 0 : index
    %38 = vector.load %arg3[%c136, %c0_17] : memref<480x96xf32, #tpu.memory_space<vmem>>, vector<16x48xf32>
    %39 = arith.truncf %38 : vector<16x48xf32> to vector<16x48xbf16>
    %cst_18 = arith.constant dense<0.000000e+00> : vector<16x384xf32>
    %40 = tpu.matmul %39, %33, %cst_18 {dimension_numbers = #tpu.dot_dimension_numbers<[1], [0], [0], [1], [0, 0, 1, 1], [], []>} : vector<16x48xbf16>, vector<48x384xbf16>, vector<16x384xf32> -> vector<16x384xf32>
    %c120 = arith.constant 120 : index
    %c0_19 = arith.constant 0 : index
    %41 = vector.load %arg3[%c120, %c0_19] : memref<480x96xf32, #tpu.memory_space<vmem>>, vector<16x48xf32>
    %42 = arith.truncf %41 : vector<16x48xf32> to vector<16x48xbf16>
    %cst_20 = arith.constant dense<0.000000e+00> : vector<16x384xf32>
    %43 = tpu.matmul %42, %35, %cst_20 {dimension_numbers = #tpu.dot_dimension_numbers<[1], [0], [0], [1], [0, 0, 1, 1], [], []>} : vector<16x48xbf16>, vector<48x384xbf16>, vector<16x384xf32> -> vector<16x384xf32>
    %44 = arith.addf %40, %43 : vector<16x384xf32>
    %c152 = arith.constant 152 : index
    %c0_21 = arith.constant 0 : index
    %45 = vector.load %arg3[%c152, %c0_21] : memref<480x96xf32, #tpu.memory_space<vmem>>, vector<16x48xf32>
    %46 = arith.truncf %45 : vector<16x48xf32> to vector<16x48xbf16>
    %cst_22 = arith.constant dense<0.000000e+00> : vector<16x384xf32>
    %47 = tpu.matmul %46, %37, %cst_22 {dimension_numbers = #tpu.dot_dimension_numbers<[1], [0], [0], [1], [0, 0, 1, 1], [], []>} : vector<16x48xbf16>, vector<48x384xbf16>, vector<16x384xf32> -> vector<16x384xf32>
    %48 = arith.addf %44, %47 : vector<16x384xf32>
    %c40_23 = arith.constant 40 : index
    %c0_24 = arith.constant 0 : index
    %49 = vector.load %arg4[%c40_23, %c0_24] : memref<160x1xf32, #tpu.memory_space<vmem>>, vector<16x1xf32>
    %50 = vector.broadcast %49 : vector<16x1xf32> to vector<16x384xf32>
    %51 = arith.addf %48, %50 : vector<16x384xf32>
    %cst_25 = arith.constant 0.000000e+00 : f32
    %52 = vector.broadcast %cst_25 : f32 to vector<16x384xf32>
    %53 = arith.maximumf %51, %52 : vector<16x384xf32>
    %54 = vector.broadcast %0 : vector<1x384xf32> to vector<16x384xf32>
    %55 = arith.mulf %53, %54 : vector<16x384xf32>
    %cst_26 = arith.constant dense<0.000000e+00> : vector<16xf32>
    %56 = vector.multi_reduction <add>, %55, %cst_26 [1] : vector<16x384xf32> to vector<16xf32>
    %57 = vector.shape_cast %56 : vector<16xf32> to vector<16x1xf32>
    %cst_27 = arith.constant 3.906250e-03 : f32
    %58 = vector.broadcast %cst_27 : f32 to vector<16x1xf32>
    %59 = arith.mulf %57, %58 : vector<16x1xf32>
    %60 = vector.extract_strided_slice %28 {offsets = [16, 0], sizes = [24, 384], strides = [1, 1]} : vector<40x384xf32> to vector<24x384xf32>
    %c18_i32_28 = arith.constant 18 : i32
    %61 = tpu.dynamic_rotate %60 by %c18_i32_28 dim 1 : vector<24x384xf32>, i32 -> vector<24x384xf32>
    %c366_i32_29 = arith.constant 366 : i32
    %62 = tpu.dynamic_rotate %60 by %c366_i32_29 dim 1 : vector<24x384xf32>, i32 -> vector<24x384xf32>
    %63 = tpu.concatenate %61, %60, %62 in 0 : vector<24x384xf32>, vector<24x384xf32>, vector<24x384xf32> -> vector<72x384xf32>
    %64 = arith.truncf %63 : vector<72x384xf32> to vector<72x384xbf16>
    %c1_i32_30 = arith.constant 1 : i32
    %65 = tpu.dynamic_rotate %63 by %c1_i32_30 dim 1 : vector<72x384xf32>, i32 -> vector<72x384xf32>
    %66 = arith.truncf %65 : vector<72x384xf32> to vector<72x384xbf16>
    %c383_i32_31 = arith.constant 383 : i32
    %67 = tpu.dynamic_rotate %63 by %c383_i32_31 dim 1 : vector<72x384xf32>, i32 -> vector<72x384xf32>
    %68 = arith.truncf %67 : vector<72x384xf32> to vector<72x384xbf16>
    %c192 = arith.constant 192 : index
    %c0_32 = arith.constant 0 : index
    %69 = vector.load %arg3[%c192, %c0_32] : memref<480x96xf32, #tpu.memory_space<vmem>>, vector<24x72xf32>
    %70 = arith.truncf %69 : vector<24x72xf32> to vector<24x72xbf16>
    %cst_33 = arith.constant dense<0.000000e+00> : vector<24x384xf32>
    %71 = tpu.matmul %70, %64, %cst_33 {dimension_numbers = #tpu.dot_dimension_numbers<[1], [0], [0], [1], [0, 0, 1, 1], [], []>} : vector<24x72xbf16>, vector<72x384xbf16>, vector<24x384xf32> -> vector<24x384xf32>
    %c168 = arith.constant 168 : index
    %c0_34 = arith.constant 0 : index
    %72 = vector.load %arg3[%c168, %c0_34] : memref<480x96xf32, #tpu.memory_space<vmem>>, vector<24x72xf32>
    %73 = arith.truncf %72 : vector<24x72xf32> to vector<24x72xbf16>
    %cst_35 = arith.constant dense<0.000000e+00> : vector<24x384xf32>
    %74 = tpu.matmul %73, %66, %cst_35 {dimension_numbers = #tpu.dot_dimension_numbers<[1], [0], [0], [1], [0, 0, 1, 1], [], []>} : vector<24x72xbf16>, vector<72x384xbf16>, vector<24x384xf32> -> vector<24x384xf32>
    %75 = arith.addf %71, %74 : vector<24x384xf32>
    %c216 = arith.constant 216 : index
    %c0_36 = arith.constant 0 : index
    %76 = vector.load %arg3[%c216, %c0_36] : memref<480x96xf32, #tpu.memory_space<vmem>>, vector<24x72xf32>
    %77 = arith.truncf %76 : vector<24x72xf32> to vector<24x72xbf16>
    %cst_37 = arith.constant dense<0.000000e+00> : vector<24x384xf32>
    %78 = tpu.matmul %77, %68, %cst_37 {dimension_numbers = #tpu.dot_dimension_numbers<[1], [0], [0], [1], [0, 0, 1, 1], [], []>} : vector<24x72xbf16>, vector<72x384xbf16>, vector<24x384xf32> -> vector<24x384xf32>
    %79 = arith.addf %75, %78 : vector<24x384xf32>
    %c56 = arith.constant 56 : index
    %c0_38 = arith.constant 0 : index
    %80 = vector.load %arg4[%c56, %c0_38] : memref<160x1xf32, #tpu.memory_space<vmem>>, vector<24x1xf32>
    %81 = vector.broadcast %80 : vector<24x1xf32> to vector<24x384xf32>
    %82 = arith.addf %79, %81 : vector<24x384xf32>
    %cst_39 = arith.constant 0.000000e+00 : f32
    %83 = vector.broadcast %cst_39 : f32 to vector<24x384xf32>
    %84 = arith.maximumf %82, %83 : vector<24x384xf32>
    %85 = vector.broadcast %0 : vector<1x384xf32> to vector<24x384xf32>
    %86 = arith.mulf %84, %85 : vector<24x384xf32>
    %c18_i32_40 = arith.constant 18 : i32
    %87 = tpu.dynamic_rotate %86 by %c18_i32_40 dim 1 : vector<24x384xf32>, i32 -> vector<24x384xf32>
    %c366_i32_41 = arith.constant 366 : i32
    %88 = tpu.dynamic_rotate %86 by %c366_i32_41 dim 1 : vector<24x384xf32>, i32 -> vector<24x384xf32>
    %89 = tpu.concatenate %87, %86, %88 in 0 : vector<24x384xf32>, vector<24x384xf32>, vector<24x384xf32> -> vector<72x384xf32>
    %90 = arith.truncf %89 : vector<72x384xf32> to vector<72x384xbf16>
    %c1_i32_42 = arith.constant 1 : i32
    %91 = tpu.dynamic_rotate %89 by %c1_i32_42 dim 1 : vector<72x384xf32>, i32 -> vector<72x384xf32>
    %92 = arith.truncf %91 : vector<72x384xf32> to vector<72x384xbf16>
    %c383_i32_43 = arith.constant 383 : i32
    %93 = tpu.dynamic_rotate %89 by %c383_i32_43 dim 1 : vector<72x384xf32>, i32 -> vector<72x384xf32>
    %94 = arith.truncf %93 : vector<72x384xf32> to vector<72x384xbf16>
    %c256 = arith.constant 256 : index
    %c0_44 = arith.constant 0 : index
    %95 = vector.load %arg3[%c256, %c0_44] : memref<480x96xf32, #tpu.memory_space<vmem>>, vector<16x72xf32>
    %96 = arith.truncf %95 : vector<16x72xf32> to vector<16x72xbf16>
    %cst_45 = arith.constant dense<0.000000e+00> : vector<16x384xf32>
    %97 = tpu.matmul %96, %90, %cst_45 {dimension_numbers = #tpu.dot_dimension_numbers<[1], [0], [0], [1], [0, 0, 1, 1], [], []>} : vector<16x72xbf16>, vector<72x384xbf16>, vector<16x384xf32> -> vector<16x384xf32>
    %c240 = arith.constant 240 : index
    %c0_46 = arith.constant 0 : index
    %98 = vector.load %arg3[%c240, %c0_46] : memref<480x96xf32, #tpu.memory_space<vmem>>, vector<16x72xf32>
    %99 = arith.truncf %98 : vector<16x72xf32> to vector<16x72xbf16>
    %cst_47 = arith.constant dense<0.000000e+00> : vector<16x384xf32>
    %100 = tpu.matmul %99, %92, %cst_47 {dimension_numbers = #tpu.dot_dimension_numbers<[1], [0], [0], [1], [0, 0, 1, 1], [], []>} : vector<16x72xbf16>, vector<72x384xbf16>, vector<16x384xf32> -> vector<16x384xf32>
    %101 = arith.addf %97, %100 : vector<16x384xf32>
    %c272 = arith.constant 272 : index
    %c0_48 = arith.constant 0 : index
    %102 = vector.load %arg3[%c272, %c0_48] : memref<480x96xf32, #tpu.memory_space<vmem>>, vector<16x72xf32>
    %103 = arith.truncf %102 : vector<16x72xf32> to vector<16x72xbf16>
    %cst_49 = arith.constant dense<0.000000e+00> : vector<16x384xf32>
    %104 = tpu.matmul %103, %94, %cst_49 {dimension_numbers = #tpu.dot_dimension_numbers<[1], [0], [0], [1], [0, 0, 1, 1], [], []>} : vector<16x72xbf16>, vector<72x384xbf16>, vector<16x384xf32> -> vector<16x384xf32>
    %105 = arith.addf %101, %104 : vector<16x384xf32>
    %c80_50 = arith.constant 80 : index
    %c0_51 = arith.constant 0 : index
    %106 = vector.load %arg4[%c80_50, %c0_51] : memref<160x1xf32, #tpu.memory_space<vmem>>, vector<16x1xf32>
    %107 = vector.broadcast %106 : vector<16x1xf32> to vector<16x384xf32>
    %108 = arith.addf %105, %107 : vector<16x384xf32>
    %109 = vector.broadcast %0 : vector<1x384xf32> to vector<16x384xf32>
    %110 = arith.mulf %108, %109 : vector<16x384xf32>
    %111 = tpu.concatenate %2, %110 in 0 : vector<16x384xf32>, vector<16x384xf32> -> vector<32x384xf32>
    %c18_i32_52 = arith.constant 18 : i32
    %112 = tpu.dynamic_rotate %111 by %c18_i32_52 dim 1 : vector<32x384xf32>, i32 -> vector<32x384xf32>
    %c366_i32_53 = arith.constant 366 : i32
    %113 = tpu.dynamic_rotate %111 by %c366_i32_53 dim 1 : vector<32x384xf32>, i32 -> vector<32x384xf32>
    %114 = tpu.concatenate %112, %111, %113 in 0 : vector<32x384xf32>, vector<32x384xf32>, vector<32x384xf32> -> vector<96x384xf32>
    %115 = arith.truncf %114 : vector<96x384xf32> to vector<96x384xbf16>
    %c1_i32_54 = arith.constant 1 : i32
    %116 = tpu.dynamic_rotate %114 by %c1_i32_54 dim 1 : vector<96x384xf32>, i32 -> vector<96x384xf32>
    %117 = arith.truncf %116 : vector<96x384xf32> to vector<96x384xbf16>
    %c383_i32_55 = arith.constant 383 : i32
    %118 = tpu.dynamic_rotate %114 by %c383_i32_55 dim 1 : vector<96x384xf32>, i32 -> vector<96x384xf32>
    %119 = arith.truncf %118 : vector<96x384xf32> to vector<96x384xbf16>
    %c320 = arith.constant 320 : index
    %c0_56 = arith.constant 0 : index
    %120 = vector.load %arg3[%c320, %c0_56] : memref<480x96xf32, #tpu.memory_space<vmem>>, vector<32x96xf32>
    %121 = arith.truncf %120 : vector<32x96xf32> to vector<32x96xbf16>
    %cst_57 = arith.constant dense<0.000000e+00> : vector<32x384xf32>
    %122 = tpu.matmul %121, %115, %cst_57 {dimension_numbers = #tpu.dot_dimension_numbers<[1], [0], [0], [1], [0, 0, 1, 1], [], []>} : vector<32x96xbf16>, vector<96x384xbf16>, vector<32x384xf32> -> vector<32x384xf32>
    %c288 = arith.constant 288 : index
    %c0_58 = arith.constant 0 : index
    %123 = vector.load %arg3[%c288, %c0_58] : memref<480x96xf32, #tpu.memory_space<vmem>>, vector<32x96xf32>
    %124 = arith.truncf %123 : vector<32x96xf32> to vector<32x96xbf16>
    %cst_59 = arith.constant dense<0.000000e+00> : vector<32x384xf32>
    %125 = tpu.matmul %124, %117, %cst_59 {dimension_numbers = #tpu.dot_dimension_numbers<[1], [0], [0], [1], [0, 0, 1, 1], [], []>} : vector<32x96xbf16>, vector<96x384xbf16>, vector<32x384xf32> -> vector<32x384xf32>
    %126 = arith.addf %122, %125 : vector<32x384xf32>
    %c352 = arith.constant 352 : index
    %c0_60 = arith.constant 0 : index
    %127 = vector.load %arg3[%c352, %c0_60] : memref<480x96xf32, #tpu.memory_space<vmem>>, vector<32x96xf32>
    %128 = arith.truncf %127 : vector<32x96xf32> to vector<32x96xbf16>
    %cst_61 = arith.constant dense<0.000000e+00> : vector<32x384xf32>
    %129 = tpu.matmul %128, %119, %cst_61 {dimension_numbers = #tpu.dot_dimension_numbers<[1], [0], [0], [1], [0, 0, 1, 1], [], []>} : vector<32x96xbf16>, vector<96x384xbf16>, vector<32x384xf32> -> vector<32x384xf32>
    %130 = arith.addf %126, %129 : vector<32x384xf32>
    %c96 = arith.constant 96 : index
    %c0_62 = arith.constant 0 : index
    %131 = vector.load %arg4[%c96, %c0_62] : memref<160x1xf32, #tpu.memory_space<vmem>>, vector<32x1xf32>
    %132 = vector.broadcast %131 : vector<32x1xf32> to vector<32x384xf32>
    %133 = arith.addf %130, %132 : vector<32x384xf32>
    %cst_63 = arith.constant 0.000000e+00 : f32
    %134 = vector.broadcast %cst_63 : f32 to vector<32x384xf32>
    %135 = arith.maximumf %133, %134 : vector<32x384xf32>
    %136 = vector.broadcast %0 : vector<1x384xf32> to vector<32x384xf32>
    %137 = arith.mulf %135, %136 : vector<32x384xf32>
    %c18_i32_64 = arith.constant 18 : i32
    %138 = tpu.dynamic_rotate %137 by %c18_i32_64 dim 1 : vector<32x384xf32>, i32 -> vector<32x384xf32>
    %c366_i32_65 = arith.constant 366 : i32
    %139 = tpu.dynamic_rotate %137 by %c366_i32_65 dim 1 : vector<32x384xf32>, i32 -> vector<32x384xf32>
    %140 = tpu.concatenate %138, %137, %139 in 0 : vector<32x384xf32>, vector<32x384xf32>, vector<32x384xf32> -> vector<96x384xf32>
    %141 = arith.truncf %140 : vector<96x384xf32> to vector<96x384xbf16>
    %c1_i32_66 = arith.constant 1 : i32
    %142 = tpu.dynamic_rotate %140 by %c1_i32_66 dim 1 : vector<96x384xf32>, i32 -> vector<96x384xf32>
    %143 = arith.truncf %142 : vector<96x384xf32> to vector<96x384xbf16>
    %c383_i32_67 = arith.constant 383 : i32
    %144 = tpu.dynamic_rotate %140 by %c383_i32_67 dim 1 : vector<96x384xf32>, i32 -> vector<96x384xf32>
    %145 = arith.truncf %144 : vector<96x384xf32> to vector<96x384xbf16>
    %c408 = arith.constant 408 : index
    %c0_68 = arith.constant 0 : index
    %146 = vector.load %arg3[%c408, %c0_68] : memref<480x96xf32, #tpu.memory_space<vmem>>, vector<24x96xf32>
    %147 = arith.truncf %146 : vector<24x96xf32> to vector<24x96xbf16>
    %cst_69 = arith.constant dense<0.000000e+00> : vector<24x384xf32>
    %148 = tpu.matmul %147, %141, %cst_69 {dimension_numbers = #tpu.dot_dimension_numbers<[1], [0], [0], [1], [0, 0, 1, 1], [], []>} : vector<24x96xbf16>, vector<96x384xbf16>, vector<24x384xf32> -> vector<24x384xf32>
    %c384 = arith.constant 384 : index
    %c0_70 = arith.constant 0 : index
    %149 = vector.load %arg3[%c384, %c0_70] : memref<480x96xf32, #tpu.memory_space<vmem>>, vector<24x96xf32>
    %150 = arith.truncf %149 : vector<24x96xf32> to vector<24x96xbf16>
    %cst_71 = arith.constant dense<0.000000e+00> : vector<24x384xf32>
    %151 = tpu.matmul %150, %143, %cst_71 {dimension_numbers = #tpu.dot_dimension_numbers<[1], [0], [0], [1], [0, 0, 1, 1], [], []>} : vector<24x96xbf16>, vector<96x384xbf16>, vector<24x384xf32> -> vector<24x384xf32>
    %152 = arith.addf %148, %151 : vector<24x384xf32>
    %c432 = arith.constant 432 : index
    %c0_72 = arith.constant 0 : index
    %153 = vector.load %arg3[%c432, %c0_72] : memref<480x96xf32, #tpu.memory_space<vmem>>, vector<24x96xf32>
    %154 = arith.truncf %153 : vector<24x96xf32> to vector<24x96xbf16>
    %cst_73 = arith.constant dense<0.000000e+00> : vector<24x384xf32>
    %155 = tpu.matmul %154, %145, %cst_73 {dimension_numbers = #tpu.dot_dimension_numbers<[1], [0], [0], [1], [0, 0, 1, 1], [], []>} : vector<24x96xbf16>, vector<96x384xbf16>, vector<24x384xf32> -> vector<24x384xf32>
    %156 = arith.addf %152, %155 : vector<24x384xf32>
    %c128 = arith.constant 128 : index
    %c0_74 = arith.constant 0 : index
    %157 = vector.load %arg4[%c128, %c0_74] : memref<160x1xf32, #tpu.memory_space<vmem>>, vector<24x1xf32>
    %158 = vector.broadcast %157 : vector<24x1xf32> to vector<24x384xf32>
    %159 = arith.addf %156, %158 : vector<24x384xf32>
    %cst_75 = arith.constant 0.000000e+00 : f32
    %160 = vector.broadcast %cst_75 : f32 to vector<24x384xf32>
    %161 = arith.maximumf %159, %160 : vector<24x384xf32>
    %162 = vector.broadcast %0 : vector<1x384xf32> to vector<24x384xf32>
    %163 = arith.mulf %161, %162 : vector<24x384xf32>
    %c18_i32_76 = arith.constant 18 : i32
    %164 = tpu.dynamic_rotate %163 by %c18_i32_76 dim 1 : vector<24x384xf32>, i32 -> vector<24x384xf32>
    %c366_i32_77 = arith.constant 366 : i32
    %165 = tpu.dynamic_rotate %163 by %c366_i32_77 dim 1 : vector<24x384xf32>, i32 -> vector<24x384xf32>
    %166 = tpu.concatenate %164, %163, %165 in 0 : vector<24x384xf32>, vector<24x384xf32>, vector<24x384xf32> -> vector<72x384xf32>
    %167 = arith.truncf %166 : vector<72x384xf32> to vector<72x384xbf16>
    %c1_i32_78 = arith.constant 1 : i32
    %168 = tpu.dynamic_rotate %166 by %c1_i32_78 dim 1 : vector<72x384xf32>, i32 -> vector<72x384xf32>
    %169 = arith.truncf %168 : vector<72x384xf32> to vector<72x384xbf16>
    %c383_i32_79 = arith.constant 383 : i32
    %170 = tpu.dynamic_rotate %166 by %c383_i32_79 dim 1 : vector<72x384xf32>, i32 -> vector<72x384xf32>
    %171 = arith.truncf %170 : vector<72x384xf32> to vector<72x384xbf16>
    %c464 = arith.constant 464 : index
    %c0_80 = arith.constant 0 : index
    %172 = vector.load %arg3[%c464, %c0_80] : memref<480x96xf32, #tpu.memory_space<vmem>>, vector<8x72xf32>
    %173 = arith.truncf %172 : vector<8x72xf32> to vector<8x72xbf16>
    %cst_81 = arith.constant dense<0.000000e+00> : vector<8x384xf32>
    %174 = tpu.matmul %173, %167, %cst_81 {dimension_numbers = #tpu.dot_dimension_numbers<[1], [0], [0], [1], [0, 0, 1, 1], [], []>} : vector<8x72xbf16>, vector<72x384xbf16>, vector<8x384xf32> -> vector<8x384xf32>
    %c456 = arith.constant 456 : index
    %c0_82 = arith.constant 0 : index
    %175 = vector.load %arg3[%c456, %c0_82] : memref<480x96xf32, #tpu.memory_space<vmem>>, vector<8x72xf32>
    %176 = arith.truncf %175 : vector<8x72xf32> to vector<8x72xbf16>
    %cst_83 = arith.constant dense<0.000000e+00> : vector<8x384xf32>
    %177 = tpu.matmul %176, %169, %cst_83 {dimension_numbers = #tpu.dot_dimension_numbers<[1], [0], [0], [1], [0, 0, 1, 1], [], []>} : vector<8x72xbf16>, vector<72x384xbf16>, vector<8x384xf32> -> vector<8x384xf32>
    %178 = arith.addf %174, %177 : vector<8x384xf32>
    %c472 = arith.constant 472 : index
    %c0_84 = arith.constant 0 : index
    %179 = vector.load %arg3[%c472, %c0_84] : memref<480x96xf32, #tpu.memory_space<vmem>>, vector<8x72xf32>
    %180 = arith.truncf %179 : vector<8x72xf32> to vector<8x72xbf16>
    %cst_85 = arith.constant dense<0.000000e+00> : vector<8x384xf32>
    %181 = tpu.matmul %180, %171, %cst_85 {dimension_numbers = #tpu.dot_dimension_numbers<[1], [0], [0], [1], [0, 0, 1, 1], [], []>} : vector<8x72xbf16>, vector<72x384xbf16>, vector<8x384xf32> -> vector<8x384xf32>
    %182 = arith.addf %178, %181 : vector<8x384xf32>
    %c152_86 = arith.constant 152 : index
    %c0_87 = arith.constant 0 : index
    %183 = vector.load %arg4[%c152_86, %c0_87] : memref<160x1xf32, #tpu.memory_space<vmem>>, vector<8x1xf32>
    %184 = vector.broadcast %183 : vector<8x1xf32> to vector<8x384xf32>
    %185 = arith.addf %182, %184 : vector<8x384xf32>
    %186 = arith.negf %185 : vector<8x384xf32>
    %187 = math.exp %186 : vector<8x384xf32>
    %cst_88 = arith.constant 1.000000e+00 : f32
    %188 = vector.broadcast %cst_88 : f32 to vector<8x384xf32>
    %189 = arith.addf %188, %187 : vector<8x384xf32>
    %190 = arith.divf %188, %189 : vector<8x384xf32>
    %191 = vector.extract_strided_slice %190 {offsets = [0, 0], sizes = [1, 384], strides = [1, 1]} : vector<8x384xf32> to vector<1x384xf32>
    %192 = vector.shape_cast %191 : vector<1x384xf32> to vector<1x1x384xf32>
    %c0_89 = arith.constant 0 : index
    %c0_90 = arith.constant 0 : index
    %c0_91 = arith.constant 0 : index
    %193 = vector.load %arg6[%c0_89, %c0_90, %c0_91] : memref<1x1x384xf32, #tpu.memory_space<vmem>>, vector<1x1x384xf32>
    tpu.vector_store %arg6[%c0_89, %c0_90, %c0_91], %192 {strides = array<i32>} : memref<1x1x384xf32, #tpu.memory_space<vmem>>, vector<1x1x384xf32>,
    %c0_92 = arith.constant 0 : index
    %c0_93 = arith.constant 0 : index
    %194 = vector.load %arg5[%c0_92, %c0_93] : memref<8x32xf32, #tpu.memory_space<vmem>>, vector<8x16xf32>
    %c0_94 = arith.constant 0 : index
    %c16 = arith.constant 16 : index
    %195 = vector.load %arg5[%c0_94, %c16] : memref<8x32xf32, #tpu.memory_space<vmem>>, vector<8x1xf32>
    %c0_95 = arith.constant 0 : index
    %c17 = arith.constant 17 : index
    %196 = vector.load %arg5[%c0_95, %c17] : memref<8x32xf32, #tpu.memory_space<vmem>>, vector<8x1xf32>
    %c0_96 = arith.constant 0 : index
    %c18 = arith.constant 18 : index
    %197 = vector.load %arg5[%c0_96, %c18] : memref<8x32xf32, #tpu.memory_space<vmem>>, vector<1x1xf32>
    %198 = vector.shape_cast %59 : vector<16x1xf32> to vector<16x1xf32>
    %199 = vector.broadcast %198 : vector<16x1xf32> to vector<16x128xf32>
    %cst_97 = arith.constant dense<0.000000e+00> : vector<8x128xf32>
    %200 = tpu.matmul %194, %199, %cst_97 {dimension_numbers = #tpu.dot_dimension_numbers<[1], [0], [0], [1], [0, 0, 1, 1], [], []>} : vector<8x16xf32>, vector<16x128xf32>, vector<8x128xf32> -> vector<8x128xf32>
    %201 = vector.broadcast %195 : vector<8x1xf32> to vector<8x128xf32>
    %202 = arith.addf %200, %201 : vector<8x128xf32>
    %cst_98 = arith.constant 0.000000e+00 : f32
    %203 = vector.broadcast %cst_98 : f32 to vector<8x128xf32>
    %204 = arith.maximumf %202, %203 : vector<8x128xf32>
    %205 = vector.broadcast %196 : vector<8x1xf32> to vector<8x128xf32>
    %206 = arith.mulf %204, %205 : vector<8x128xf32>
    %cst_99 = arith.constant dense<0.000000e+00> : vector<128xf32>
    %207 = vector.multi_reduction <add>, %206, %cst_99 [0] : vector<8x128xf32> to vector<128xf32>
    %208 = vector.shape_cast %207 : vector<128xf32> to vector<1x128xf32>
    %209 = vector.broadcast %197 : vector<1x1xf32> to vector<1x128xf32>
    %210 = arith.addf %208, %209 : vector<1x128xf32>
    %211 = arith.negf %210 : vector<1x128xf32>
    %212 = math.exp %211 : vector<1x128xf32>
    %cst_100 = arith.constant 1.000000e+00 : f32
    %213 = vector.broadcast %cst_100 : f32 to vector<1x128xf32>
    %214 = arith.addf %213, %212 : vector<1x128xf32>
    %215 = arith.divf %213, %214 : vector<1x128xf32>
    %216 = vector.shape_cast %215 : vector<1x128xf32> to vector<1x1x128xf32>
    %c0_101 = arith.constant 0 : index
    %c0_102 = arith.constant 0 : index
    %c0_103 = arith.constant 0 : index
    %217 = vector.load %arg7[%c0_101, %c0_102, %c0_103] : memref<1x1x128xf32, #tpu.memory_space<vmem>>, vector<1x1x128xf32>
    tpu.vector_store %arg7[%c0_101, %c0_102, %c0_103], %216 {strides = array<i32>} : memref<1x1x128xf32, #tpu.memory_space<vmem>>, vector<1x1x128xf32>,
    return
  }
  func.func @transform_0(%arg0: i32) -> (i32, i32, i32) {
    %c0_i32 = arith.constant 0 : i32
    %c0_i32_0 = arith.constant 0 : i32
    %c0_i32_1 = arith.constant 0 : i32
    return %arg0, %c0_i32, %c0_i32_0 : i32, i32, i32
  }
  func.func @transform_1(%arg0: i32) -> (i32, i32) {
    %c0_i32 = arith.constant 0 : i32
    %c0_i32_0 = arith.constant 0 : i32
    %c0_i32_1 = arith.constant 0 : i32
    return %c0_i32, %c0_i32_0 : i32, i32
  }
  func.func @transform_2(%arg0: i32) -> (i32, i32) {
    %c0_i32 = arith.constant 0 : i32
    %c0_i32_0 = arith.constant 0 : i32
    %c0_i32_1 = arith.constant 0 : i32
    return %c0_i32, %c0_i32_0 : i32, i32
  }
  func.func @transform_3(%arg0: i32) -> (i32, i32) {
    %c0_i32 = arith.constant 0 : i32
    %c0_i32_0 = arith.constant 0 : i32
    %c0_i32_1 = arith.constant 0 : i32
    return %c0_i32, %c0_i32_0 : i32, i32
  }
  func.func @transform_4(%arg0: i32) -> (i32, i32) {
    %c0_i32 = arith.constant 0 : i32
    %c0_i32_0 = arith.constant 0 : i32
    %c0_i32_1 = arith.constant 0 : i32
    return %c0_i32, %c0_i32_0 : i32, i32
  }
  func.func @transform_5(%arg0: i32) -> (i32, i32, i32) {
    %c0_i32 = arith.constant 0 : i32
    %c0_i32_0 = arith.constant 0 : i32
    %c0_i32_1 = arith.constant 0 : i32
    return %arg0, %c0_i32, %c0_i32_0 : i32, i32, i32
  }
  func.func @transform_6(%arg0: i32) -> (i32, i32, i32) {
    %c0_i32 = arith.constant 0 : i32
    %c0_i32_0 = arith.constant 0 : i32
    %c0_i32_1 = arith.constant 0 : i32
    return %arg0, %c0_i32, %c0_i32_0 : i32, i32, i32
  }
}

</mosaic_0001>

<bundles_post_ra>
// kernel: squeeze.3
= control target key start
LH: loop header
LB: loop body
LE: loop exit
PB: predicated region body
PF: predicated region fallthrough
CT: control target
= control target key end

     0   :  { %s127_s12 = smov 3  ;;  %s19_s13 = smov 3  ;;  %vm16_vm0 = vcmask 146432   ;;  %vm132_vm1 = vcmask 1014784   ;;  %vm145_vm2 = vcmask 1031168   ;;  %vm136_vm3 = vcmask 31744   ;;  %s306_s0 = inlined_call_operand.vmem [shape: f32[2,324], index: 0, kind: input, shape index: {}]   ;;  %s307_s1 = inlined_call_operand.vmem [shape: f32[2,18,18], index: 1, kind: output, shape index: {}]  }
   0x1   :  { %v13_v0 = vld [vmem:[%s306_s0] sm:$0x3]  ;;  %v156_v1 = vld [vmem:[%s306_s0 + $0x4] sm:$0x3]  ;;  %v157_v2 = vld [vmem:[%s306_s0 + $0x2] sm:$0x3] }
   0x2   :  { %14 = vst [vmem:[#allocation0] sm:$0x3] %v13_v0  ;;  %8 = vst [vmem:[#allocation0 + $0x10] sm:$0x3] %v156_v1  ;;  %s130_s0 = smov 3  ;;  %s27_s14 = smov 3 }
   0x3   :  { %12 = vst [vmem:[#allocation0 + $0x8] sm:$0x3] %v157_v2  ;;  %s194_s15 = smov 110   ;;  %s195_s18 = smov 114   ;;  %vm139_vm4 = vcmask 146464   ;;  %vm149_vm5 = vcmask 15360  }
   0x4   :  { %s41_s19 = smov 3  ;;  %s196_s20 = smov 4   ;;  %vm152_vm6 = vcmask 146448  }
   0x5   :  { %s197_s21 = smov 112   ;;  %s49_s22 = smov 3 }
   0x6   :  { %s198_s23 = smov 2   ;;  %s199_s24 = smov 96  }
   0x7   :  { %s63_s25 = smov 3  ;;  %s71_s26 = smov 3 }
   0x8   :  { %s200_s27 = smov 94   ;;  %s201_s28 = smov 92  }
   0x9   :  { %v34_v3 = vld [vmem:[#allocation0] sm:$0x3]   ;;  %v131_v5 = vld [vmem:[#allocation0 + $0x11] ss:$-1 sm:%s130_s0]   ;;  %s85_s29 = smov 3  ;;  %s202_s30 = smov 78  }
   0xa   :  { %v15_v4 = vld [vmem:[#allocation0] sm:$0x3]   ;;  %35 = vrot.lane.b32.xlu0 %v34_v3, %s194_s15  ;;  %v128_v6 = vld [vmem:[#allocation0 + $0x9] ss:$-1 sm:%s127_s12]   ;;  %v20_v7 = vld [vmem:[#allocation0 + $0x11] ss:$-1 sm:%s19_s13]  }
   0xb   :  { %17 = vst.msk [vmem:[%s307_s1] ss:$24 sm:$0x3] %vm16_vm0, %v15_v4   ;;  %v133_v8 = vsel %vm132_vm1, %v131_v5, %v128_v6  ;;  %21 = vrot.lane.b32.xlu1 %v20_v7, %s195_s18  ;;  %v142_v9 = vld [vmem:[#allocation0] sm:$0x3]   ;;  %s203_s2 = smov 76  }
   0xc   :  { %v144_v10 = vld [vmem:[#allocation0 + $0x8] sm:$0x3]   ;;  %v42_v13 = vld [vmem:[#allocation0 + $0x11] ss:$-1 sm:%s41_s19]   ;;  %v56_v15 = vld [vmem:[#allocation0] sm:$0x3]  }
   0xd   :  { %v28_v11 = vld [vmem:[#allocation0 + $0x9] ss:$-1 sm:%s27_s14]   ;;  %v146_v12 = vsel %vm145_vm2, %v144_v10, %v142_v9  ;;  %v64_v16 = vld [vmem:[#allocation0 + $0x11] ss:$-1 sm:%s63_s25]   ;;  %v78_v18 = vld [vmem:[#allocation0] sm:$0x3]  }
   0xe   :  { %134 = vrot.lane.b32.xlu0 %v133_v8, %s196_s20  ;;  %v50_v14 = vld [vmem:[#allocation0 + $0x9] ss:$-1 sm:%s49_s22]   ;;  %s99_s3 = smov 3  ;;  %s204_s4 = smov 74   ;;  %v92_v20 = vld [vmem:[#allocation0] sm:$0x3]  }
   0xf   :  { %29 = vrot.lane.b32.xlu1 %v28_v11, %s197_s21  ;;  %v72_v17 = vld [vmem:[#allocation0 + $0x9] ss:$-1 sm:%s71_s26]   ;;  %s205_s5 = smov 58   ;;  %s113_s6 = smov 3  ;;  %v106_v22 = vld [vmem:[#allocation0] sm:$0x3]  }
  0x10   :  { %v86_v19 = vld [vmem:[#allocation0 + $0x9] ss:$-1 sm:%s85_s29]   ;;  %s206_s7 = smov 56   ;;  %s207_s8 = smov 40   ;;  %v120_v24 = vld [vmem:[#allocation0] sm:$0x3]  }
  0x11   :  { %v100_v21 = vld [vmem:[#allocation0 + $0x9] ss:$-1 sm:%s99_s3]   ;;  %s208_s9 = smov 38   ;;  %s209_s10 = smov 22  }
  0x12   :  { %147 = vrot.lane.b32.xlu0 %v146_v12, %s198_s23  ;;  %v114_v23 = vld [vmem:[#allocation0 + $0x9] ss:$-1 sm:%s113_s6]   ;;  %s210_s11 = smov 20  }
  0x13   :  { %43 = vrot.lane.b32.xlu1 %v42_v13, %s199_s24 }
  0x16   :  { %51 = vrot.lane.b32.xlu0 %v50_v14, %s200_s27 }
  0x17   :  { %57 = vrot.lane.b32.xlu1 %v56_v15, %s201_s28 }
  0x1a   :  { %65 = vrot.lane.b32.xlu0 %v64_v16, %s202_s30 }
  0x1b   :  { %73 = vrot.lane.b32.xlu1 %v72_v17, %s203_s2 }
  0x1e   :  { %79 = vrot.lane.b32.xlu0 %v78_v18, %s204_s4 }
  0x1f   :  { %87 = vrot.lane.b32.xlu1 %v86_v19, %s205_s5 }
  0x22   :  { %93 = vrot.lane.b32.xlu0 %v92_v20, %s206_s7 }
  0x23   :  { %101 = vrot.lane.b32.xlu1 %v100_v21, %s207_s8 }
  0x26   :  { %107 = vrot.lane.b32.xlu0 %v106_v22, %s208_s9 }
  0x27   :  { %115 = vrot.lane.b32.xlu1 %v114_v23, %s209_s10 }
  0x2a   :  { %121 = vrot.lane.b32.xlu0 %v120_v24, %s210_s11 }
  0x7c   :  { %v36_v25 = vpop.permute.xlu0 %35  }
  0x7d   :  { %160 = vst.msk [vmem:[%s307_s1 + $0x1] ss:$24 sm:$0x3] %vm16_vm0, %v36_v25   ;;  %v22_v26 = vpop.permute.xlu1 %21  }
  0x7e   :  { %158 = vst.msk [vmem:[%s307_s1 + $0x27] ss:$-24 sm:$0x3] %vm16_vm0, %v22_v26  }
  0x80   :  { %v135_v27 = vpop.permute.xlu0 %134  }
  0x81   :  { %173 = vst.msk [vmem:[%s307_s1 + $0x26] ss:$-24 sm:$0x3] %vm136_vm3, %v135_v27   ;;  %v30_v28 = vpop.permute.xlu1 %29  }
  0x82   :  { %174 = vst.msk [vmem:[%s307_s1 + $0x26] ss:$-24 sm:$0x3] %vm139_vm4, %v135_v27  }
  0x83   :  { %159 = vst.msk [vmem:[%s307_s1 + $0x20] ss:$-24 sm:$0x3] %vm16_vm0, %v30_v28  }
  0x84   :  { %v148_v29 = vpop.permute.xlu0 %147  }
  0x85   :  { %175 = vst.msk [vmem:[%s307_s1 + $0x7] ss:$24 sm:$0x3] %vm149_vm5, %v148_v29   ;;  %v44_v30 = vpop.permute.xlu1 %43  }
  0x86   :  { %176 = vst.msk [vmem:[%s307_s1 + $0x7] ss:$24 sm:$0x3] %vm152_vm6, %v148_v29  }
  0x87   :  { %161 = vst.msk [vmem:[%s307_s1 + $0x28] ss:$-24 sm:$0x3] %vm16_vm0, %v44_v30  }
  0x88   :  { %v52_v31 = vpop.permute.xlu0 %51  }
  0x89   :  { %162 = vst.msk [vmem:[%s307_s1 + $0x21] ss:$-24 sm:$0x3] %vm16_vm0, %v52_v31   ;;  %v58_v32 = vpop.permute.xlu1 %57  }
  0x8a   :  { %163 = vst.msk [vmem:[%s307_s1 + $0x2] ss:$24 sm:$0x3] %vm16_vm0, %v58_v32  }
  0x8c   :  { %v66_v33 = vpop.permute.xlu0 %65  }
  0x8d   :  { %164 = vst.msk [vmem:[%s307_s1 + $0x29] ss:$-24 sm:$0x3] %vm16_vm0, %v66_v33   ;;  %v74_v34 = vpop.permute.xlu1 %73  }
  0x8e   :  { %165 = vst.msk [vmem:[%s307_s1 + $0x22] ss:$-24 sm:$0x3] %vm16_vm0, %v74_v34  }
  0x90   :  { %v80_v35 = vpop.permute.xlu0 %79  }
  0x91   :  { %166 = vst.msk [vmem:[%s307_s1 + $0x3] ss:$24 sm:$0x3] %vm16_vm0, %v80_v35   ;;  %v88_v36 = vpop.permute.xlu1 %87  }
  0x92   :  { %167 = vst.msk [vmem:[%s307_s1 + $0x23] ss:$-24 sm:$0x3] %vm16_vm0, %v88_v36  }
  0x94   :  { %v94_v37 = vpop.permute.xlu0 %93  }
  0x95   :  { %168 = vst.msk [vmem:[%s307_s1 + $0x4] ss:$24 sm:$0x3] %vm16_vm0, %v94_v37   ;;  %v102_v38 = vpop.permute.xlu1 %101  }
  0x96   :  { %169 = vst.msk [vmem:[%s307_s1 + $0x24] ss:$-24 sm:$0x3] %vm16_vm0, %v102_v38  }
  0x98   :  { %v108_v39 = vpop.permute.xlu0 %107  }
  0x99   :  { %170 = vst.msk [vmem:[%s307_s1 + $0x5] ss:$24 sm:$0x3] %vm16_vm0, %v108_v39   ;;  %v116_v40 = vpop.permute.xlu1 %115  }
  0x9a   :  { %171 = vst.msk [vmem:[%s307_s1 + $0x25] ss:$-24 sm:$0x3] %vm16_vm0, %v116_v40  }
  0x9c   :  { %v122_v41 = vpop.permute.xlu0 %121  }
  0x9d   :  { %172 = vst.msk [vmem:[%s307_s1 + $0x6] ss:$24 sm:$0x3] %vm16_vm0, %v122_v41  }

// kernel: discriminator_vis_forward.1
= control target key start
LH: loop header
LB: loop body
LE: loop exit
PB: predicated region body
PF: predicated region fallthrough
CT: control target
= control target key end

     0   :  { %s6637_s21 = smov 0   ;;  %s9727_s0 = inlined_call_operand.vmem [shape: f32[2,16,384], index: 0, kind: input, shape index: {}]   ;;  %s9728_s1 = inlined_call_operand.vmem [shape: f32[1,384], index: 1, kind: input, shape index: {}]   ;;  %s9729_s2 = inlined_call_operand.vmem [shape: f32[480,96], index: 2, kind: input, shape index: {}]   ;;  %s9730_s3 = inlined_call_operand.vmem [shape: f32[160,1], index: 3, kind: input, shape index: {}]   ;;  %s9731_s4 = inlined_call_operand.vmem [shape: f32[8,32], index: 4, kind: input, shape index: {}]   ;;  %s9732_s5 = inlined_call_operand.vmem [shape: f32[2,1,384], index: 5, kind: output, shape index: {0}]   ;;  %s9733_s6 = inlined_call_operand.vmem [shape: f32[2,1,128], index: 6, kind: output, shape index: {1}]  }
   0x1 LB: > { %s4805_s22 = sadd.s32 4294967295, %s6588_s21   ;;  %p4809_p0 = scmp.ge.s32.totalorder %s6588_s21, 1  ;;  %s6588_s21 = sphi %s6637_s21, %s17_s21  }
   0x2   : > { %p215_p1 = scmp.lt.s32.totalorder %s6588_s21, 3 }
   0x4   : > { %p216_p2 = pnand %p4809_p0, %p215_p1 }
   0x6   : > { %219 = sbr.rel (%p216_p2) target bundleno = 3361 (0xd21), region = 40 }
   0xd   : > { %p247_p3 = scmp.lt.s32.totalorder %s4805_s22, 1  ;;  %s6590_s27 = smov 18   ;;  %v9734_v9 = vlaneseq  ;;  %v9737_v17 = vmov 0.0   ;;  %vm6594_vm2 = vmmov 0   ;;  %v9735_v48 = vmov 0   ;;  %v863_v55 = vld [vmem:[%s9730_s3 + $0x8] sm:$0xff] }
   0xe   : > { %s6591_s28 = smov 110   ;;  %s6592_s29 = smov 1   ;;  %5037 = vmatprep.subr.bf16.mxu1 %v9737_v17  ;;  %5043 = vmatprep.mubr.msk.bf16.mxu1 %vm6594_vm2, %v9737_v17  ;;  %v862_v56 = vld [vmem:[%s9730_s3] sm:$0xff]  ;;  %v864_v57 = vld [vmem:[%s9730_s3 + $0x10] sm:$0xff]  ;;  %v865_v58 = vld [vmem:[%s9730_s3 + $0x18] sm:$0xff]  ;;  %vm460_vm4 = vcmask 392192  }
   0xf   : > { %s9959_s22 = smov (!%p247_p3, %s4805_s22), 1  ;;  %v6692_v10 = vand.u32 127, %v9734_v9  ;;  %502 = vmatprep.mubr.bf16.mxu0 %v9735_v48  ;;  %5571 = vset.pattern.permute.xlu1 %v9735_v48  ;;  %s6596_s30 = smov 127   ;;  %v866_v59 = vld [vmem:[%s9730_s3 + $0x20] sm:$0xff]  ;;  %vm1711_vm6 = vcmask 588800   ;;  %vm1718_vm7 = vcmask 1043456  }
  0x10   : > { %s5428_s23 = smul.u32 48, %s9959_s22  ;;  %5570 = vset.pattern.permute.xlu0 %v9735_v48  ;;  %vm2885_vm8 = vcmask 785408   ;;  %vm4629_vm9 = vcmask 130048   ;;  %s258_s13 = scalar_lea.vmem %s9733_s6, %s9959_s22 }
  0x11   : > { %vm281_vm0 = vcmp.lt.s32.totalorder %v6692_v10, 18  ;;  %vm300_vm1 = vcmp.lt.s32.totalorder %v6692_v10, 110  ;;  %vm352_vm3 = vcmp.lt.s32.totalorder %v6692_v10, 1  ;;  %vm416_vm5 = vcmp.lt.s32.totalorder %v6692_v10, 127  ;;  %s5429_s7 = smul.u32 3, %s9959_s22 }
  0x12   : > { %s251_s26 = scalar_lea.vmem %s9727_s0, %s5428_s23 }
  0x13   : > { %v6651_v0 = vld [vmem:[%s251_s26 + $0x10] sm:$0xff]  ;;  %v6653_v1 = vld [vmem:[%s251_s26 + $0x28] sm:$0xff]  ;;  %v6655_v2 = vld [vmem:[%s251_s26] sm:$0xff]  ;;  %s255_s10 = scalar_lea.vmem %s9732_s5, %s5429_s7 }
  0x14   : > { %v6659_v3 = vpack.i.bf16 %v6653_v1, %v6651_v0  ;;  %v6661_v4 = vld [vmem:[%s251_s26 + $0x18] sm:$0xff]  ;;  %v6663_v5 = vld [vmem:[%s251_s26 + $0x8] sm:$0xff]  ;;  %v6665_v6 = vld [vmem:[%s251_s26 + $0x20] sm:$0xff] }
  0x15   : > { %v6669_v7 = vpack.i.bf16 %v6661_v4, %v6655_v2  ;;  %v6677_v8 = vpack.i.bf16 %v6665_v6, %v6663_v5 }
  0x16   : > { %5461 = vrot.lane.b32.xlu1 %v6659_v3, %s6590_s27 }
  0x17   : > { %5451 = vrot.lane.b32.xlu0 %v6669_v7, %s6590_s27 }
  0x1a   : > { %5466 = vrot.lane.b32.xlu1 %v6669_v7, %s6591_s28 }
  0x1b   : > { %5456 = vrot.lane.b32.xlu0 %v6677_v8, %s6590_s27 }
  0x1e   : > { %5476 = vrot.lane.b32.xlu1 %v6659_v3, %s6591_s28 }
  0x1f   : > { %5471 = vrot.lane.b32.xlu0 %v6677_v8, %s6591_s28 }
  0x22   : > { %5481 = vrot.lane.b32.xlu1 %v6669_v7, %s6592_s29 }
  0x23   : > { %5486 = vrot.lane.b32.xlu0 %v6677_v8, %s6592_s29 }
  0x88   : > { %v5462_v11 = vpop.permute.xlu1 %5461 }
  0x89   : > { %v5464_v12 = vunpack.i.h.bf16 %v5462_v11  ;;  %v5463_v13 = vunpack.i.l.bf16 %v5462_v11  ;;  %v5452_v14 = vpop.permute.xlu0 %5451 }
  0x8a   : > { %v5454_v15 = vunpack.i.h.bf16 %v5452_v14  ;;  %v5453_v16 = vunpack.i.l.bf16 %v5452_v14 }
  0x8c   : > { %v5467_v18 = vpop.permute.xlu1 %5466  ;;  %v286_v19 = vsel %vm281_vm0, %v5463_v13, %v5453_v16  ;;  %v287_v20 = vsel %vm281_vm0, %v5464_v12, %v5454_v15 }
  0x8d   : > { %v5457_v21 = vpop.permute.xlu0 %5456  ;;  %v5490_v22 = vpack.i.bf16 %v287_v20, %v286_v19  ;;  %v6700_v25 = vpack.c.bf16 %v287_v20, %v286_v19  ;;  %v5469_v26 = vunpack.i.h.bf16 %v5467_v18  ;;  %v5468_v27 = vunpack.i.l.bf16 %v5467_v18 }
  0x8e   : > { %v5459_v23 = vunpack.i.h.bf16 %v5457_v21  ;;  %v5458_v24 = vunpack.i.l.bf16 %v5457_v21 }
  0x8f   : > { %9803 = vst [vmem:[#allocation2_spill] sm:$0xff] %v6700_v25  ;;  %5491 = vrot.lane.b32.xlu0 %v5490_v22, %s6592_s29 }
  0x90   : > { %v5477_v28 = vpop.permute.xlu1 %5476  ;;  %v282_v29 = vsel %vm281_vm0, %v5458_v24, %v5463_v13  ;;  %v283_v30 = vsel %vm281_vm0, %v5459_v23, %v5464_v12  ;;  %v284_v31 = vsel %vm281_vm0, %v5453_v16, %v5458_v24  ;;  %v285_v32 = vsel %vm281_vm0, %v5454_v15, %v5459_v23 }
  0x91   : > { %v5479_v33 = vunpack.i.h.bf16 %v5477_v28  ;;  %v5478_v34 = vunpack.i.l.bf16 %v5477_v28  ;;  %v5472_v35 = vpop.permute.xlu0 %5471  ;;  %v5505_v36 = vpack.i.bf16 %v283_v30, %v282_v29  ;;  %v5495_v37 = vpack.i.bf16 %v285_v32, %v284_v31 }
  0x92   : > { %v5474_v38 = vunpack.i.h.bf16 %v5472_v35  ;;  %v5473_v39 = vunpack.i.l.bf16 %v5472_v35  ;;  %v6714_v40 = vpack.c.bf16 %v285_v32, %v284_v31  ;;  %v6734_v49 = vpack.c.bf16 %v283_v30, %v282_v29 }
  0x93   : > { %5506 = vrot.lane.b32.xlu0 %v5505_v36, %s6592_s29  ;;  %5496 = vrot.lane.b32.xlu1 %v5495_v37, %s6592_s29  ;;  %v305_v46 = vsel %vm300_vm1, %v5478_v34, %v5468_v27  ;;  %v306_v47 = vsel %vm300_vm1, %v5479_v33, %v5469_v26 }
  0x94   : > { %9804 = vst [vmem:[#allocation3_spill] sm:$0xff] %v6714_v40  ;;  %v303_v41 = vsel %vm300_vm1, %v5468_v27, %v5473_v39  ;;  %v304_v42 = vsel %vm300_vm1, %v5469_v26, %v5474_v38  ;;  %v301_v44 = vsel %vm300_vm1, %v5473_v39, %v5478_v34  ;;  %v302_v45 = vsel %vm300_vm1, %v5474_v38, %v5479_v33  ;;  %v5482_v61 = vpop.permute.xlu1 %5481 }
  0x95   : > { %v5510_v43 = vpack.i.bf16 %v304_v42, %v303_v41  ;;  %9805 = vst [vmem:[#allocation4_spill] sm:$0xff] %v6734_v49  ;;  %v6736_v50 = vpack.c.bf16 %v302_v45, %v301_v44  ;;  %v5520_v51 = vpack.i.bf16 %v306_v47, %v305_v46  ;;  %v5515_v52 = vpack.i.bf16 %v302_v45, %v301_v44  ;;  %v5487_v60 = vpop.permute.xlu0 %5486 }
  0x96   : > { %v6738_v53 = vpack.c.bf16 %v306_v47, %v305_v46  ;;  %v6740_v54 = vpack.c.bf16 %v304_v42, %v303_v41  ;;  %v5489_v63 = vunpack.i.h.bf16 %v5487_v60 }
  0x97   : > { %5511 = vrot.lane.b32.xlu0 %v5510_v43, %s6592_s29  ;;  %5501 = vrot.lane.b32.xlu1 %v6659_v3, %s6592_s29  ;;  %9806 = vst [vmem:[#allocation5_spill] sm:$0xff] %v6736_v50 }
  0x98   : > { %9807 = vst [vmem:[#allocation6_spill] sm:$0xff] %v6738_v53  ;;  %9808 = vst [vmem:[#allocation7_spill] sm:$0xff] %v6740_v54 }
  0x9b   : > { %5521 = vrot.lane.b32.xlu0 %v5520_v51, %s6592_s29  ;;  %5516 = vrot.lane.b32.xlu1 %v5515_v52, %s6592_s29 }
  0x9f   : > { %5526 = vrot.lane.b32.xlu0 %v6669_v7, %s6596_s30  ;;  %5531 = vrot.lane.b32.xlu1 %v6677_v8, %s6596_s30  ;;  %v5484_v7 = vunpack.i.h.bf16 %v5482_v61  ;;  %v5483_v8 = vunpack.i.l.bf16 %v5482_v61 }
  0xa1   : > { %v362_v21 = vsel %vm352_vm3, %v5484_v7, %v5489_v63 }
  0xa3   : > { %5541 = vrot.lane.b32.xlu0 %v5495_v37, %s6596_s30  ;;  %5536 = vrot.lane.b32.xlu1 %v5490_v22, %s6596_s30 }
  0xa7   : > { %5546 = vrot.lane.b32.xlu0 %v6659_v3, %s6596_s30  ;;  %5551 = vrot.lane.b32.xlu1 %v5505_v36, %s6596_s30  ;;  %v5488_v3 = vunpack.i.l.bf16 %v5487_v60 }
  0xa9   : > { %v361_v20 = vsel %vm352_vm3, %v5483_v8, %v5488_v3 }
  0xaa   : > { %v6798_v36 = vpack.c.bf16 %v362_v21, %v361_v20  ;;  %v455_v20 = vld [vmem:[%s9729_s2 + $0x18] sm:$0xff] }
  0xab   : > { %5561 = vrot.lane.b32.xlu0 %v5515_v52, %s6596_s30  ;;  %5556 = vrot.lane.b32.xlu1 %v5510_v43, %s6596_s30 }
  0xac   : > { %9812 = vst [vmem:[#allocation11_spill] sm:$0xff] %v6798_v36 }
  0xaf   : > { %5566 = vrot.lane.b32.xlu1 %v5520_v51, %s6596_s30  ;;  %869 = vperm.xlu0 %5570, %v862_v56  }
  0xb3   : > { %874 = vperm.xlu1 %5571, %v863_v55   ;;  %884 = vperm.xlu0 %5570, %v865_v58   ;;  %v453_v58 = vld [vmem:[%s9729_s2 + $0x8] sm:$0xff] }
  0xb7   : > { %879 = vperm.xlu1 %5571, %v864_v57   ;;  %v452_v57 = vld [vmem:[%s9729_s2] sm:$0xff] }
  0xbb   : > { %889 = vperm.xlu1 %5571, %v866_v59  }
 0x101   : > { %v5492_v62 = vpop.permute.xlu0 %5491 }
 0x102   : > { %v5494_v11 = vunpack.i.h.bf16 %v5492_v62  ;;  %v5493_v12 = vunpack.i.l.bf16 %v5492_v62 }
 0x105   : > { %v5507_v13 = vpop.permute.xlu0 %5506  ;;  %v5497_v14 = vpop.permute.xlu1 %5496 }
 0x106   : > { %v5509_v15 = vunpack.i.h.bf16 %v5507_v13  ;;  %v5508_v16 = vunpack.i.l.bf16 %v5507_v13  ;;  %v5499_v18 = vunpack.i.h.bf16 %v5497_v14  ;;  %v5498_v19 = vunpack.i.l.bf16 %v5497_v14 }
 0x107   : > { %v457_v13 = vpack.c.bf16 %v453_v58, %v452_v57 }
 0x108   : > { %v359_v22 = vsel %vm352_vm3, %v5493_v12, %v5498_v19  ;;  %v360_v23 = vsel %vm352_vm3, %v5494_v11, %v5499_v18  ;;  %v353_v24 = vsel %vm352_vm3, %v5498_v19, %v5508_v16  ;;  %v354_v26 = vsel %vm352_vm3, %v5499_v18, %v5509_v15  ;;  %v454_v19 = vld [vmem:[%s9729_s2 + $0x10] sm:$0xff] }
 0x109   : > { %v5512_v27 = vpop.permute.xlu0 %5511  ;;  %v5502_v28 = vpop.permute.xlu1 %5501  ;;  %v6786_v29 = vpack.c.bf16 %v360_v23, %v359_v22  ;;  %v6788_v30 = vpack.c.bf16 %v354_v26, %v353_v24  ;;  %v365_v31 = vsel %vm352_vm3, %v5508_v16, %v5493_v12  ;;  %v366_v32 = vsel %vm352_vm3, %v5509_v15, %v5494_v11  ;;  %v456_v26 = vld [vmem:[%s9729_s2 + $0x20] sm:$0xff] }
 0x10a   : > { %v5504_v33 = vunpack.i.h.bf16 %v5502_v28  ;;  %v5503_v34 = vunpack.i.l.bf16 %v5502_v28  ;;  %v6796_v35 = vpack.c.bf16 %v366_v32, %v365_v31  ;;  %v5514_v42 = vunpack.i.h.bf16 %v5512_v27 }
 0x10b   : > { %9809 = vst [vmem:[#allocation8_spill] sm:$0xff] %v6786_v29  ;;  %9810 = vst [vmem:[#allocation9_spill] sm:$0xff] %v6788_v30  ;;  %470 = vmatprep.subr.bf16.mxu0 %v6786_v29  ;;  %5038 = vmatpush3.bf16.msra.mxu1 %v6788_v30  ;;  %v5513_v43 = vunpack.i.l.bf16 %v5512_v27  ;;  %v6856_v16 = vpack.c.bf16 %v6665_v6, %v6663_v5  ;;  %v6861_v18 = vpack.c.bf16 %v6653_v1, %v6651_v0 }
 0x10c   : > { %9811 = vst [vmem:[#allocation10_spill] sm:$0xff] %v6796_v35  ;;  %5039 = vmatprep.subr.bf16.mxu1 %v9737_v17  ;;  %v355_v37 = vsel %vm352_vm3, %v5488_v3, %v5503_v34  ;;  %v356_v38 = vsel %vm352_vm3, %v5489_v63, %v5504_v33  ;;  %v367_v39 = vsel %vm352_vm3, %v5503_v34, %v5483_v8 }
 0x10d   : > { %v368_v41 = vsel %vm352_vm3, %v5504_v33, %v5484_v7  ;;  %471 = vmatpush1.bf16.msra.mxu0 %v6796_v35  ;;  %v5522_v44 = vpop.permute.xlu0 %5521  ;;  %v5517_v45 = vpop.permute.xlu1 %5516  ;;  %v6810_v46 = vpack.c.bf16 %v356_v38, %v355_v37  ;;  %9818 = vst [vmem:[#allocation17_spill] sm:$0xff] %v6856_v16  ;;  %9819 = vst [vmem:[#allocation18_spill] sm:$0xff] %v6861_v18  ;;  %v6876_v1 = vpack.c.bf16 %v6661_v4, %v6655_v2 }
 0x10e   : > { %v6812_v47 = vpack.c.bf16 %v368_v41, %v367_v39  ;;  %v5524_v51 = vunpack.i.h.bf16 %v5522_v44  ;;  %v5523_v52 = vunpack.i.l.bf16 %v5522_v44  ;;  %v5519_v55 = vunpack.i.h.bf16 %v5517_v45  ;;  %472 = vmatprep.subr.bf16.mxu0 %v6798_v36  ;;  %v444_v39 = vld [vmem:[%s9729_s2 + $0x28] sm:$0xff]  ;;  %v445_v41 = vld [vmem:[%s9729_s2 + $0x30] sm:$0xff] }
 0x10f   : > { %9813 = vst [vmem:[#allocation12_spill] sm:$0xff] %v6810_v46  ;;  %v5518_v56 = vunpack.i.l.bf16 %v5517_v45  ;;  %5040 = vmatpush3.bf16.msra.mxu1 %v6810_v46  ;;  %9820 = vst [vmem:[#allocation19_spill] sm:$0xff] %v6876_v1  ;;  %v458_v22 = vpack.c.bf16 %v455_v20, %v454_v19  ;;  %v459_v28 = vpack.c.bf16 %v456_v26, %v456_v26 }
 0x110   : > { %9814 = vst [vmem:[#allocation13_spill] sm:$0xff] %v6812_v47  ;;  %5041 = vmatprep.subr.bf16.mxu1 %v9737_v17  ;;  %v364_v60 = vsel %vm352_vm3, %v5514_v42, %v5519_v55  ;;  %v358_v62 = vsel %vm352_vm3, %v5519_v55, %v5524_v51  ;;  %v369_v8 = vsel %vm352_vm3, %v5523_v52, %v5513_v43 }
 0x111   : > { %v363_v59 = vsel %vm352_vm3, %v5513_v43, %v5518_v56  ;;  %v357_v61 = vsel %vm352_vm3, %v5518_v56, %v5523_v52  ;;  %473 = vmatpush1.bf16.msra.mxu0 %v6812_v47  ;;  %v6832_v63 = vpop.permute.xlu1 %5531  ;;  %v370_v11 = vsel %vm352_vm3, %v5524_v51, %v5514_v42  ;;  %v6842_v12 = vpop.permute.xlu0 %5526  ;;  %v449_v56 = vpack.c.bf16 %v445_v41, %v444_v39  ;;  %v448_v41 = vld [vmem:[%s9729_s2 + $0x48] sm:$0xff] }
 0x112   : > { %v6834_v3 = vpack.c.bf16 %v364_v60, %v363_v59  ;;  %v6836_v7 = vpack.c.bf16 %v358_v62, %v357_v61  ;;  %v6846_v14 = vpack.c.bf16 %v370_v11, %v369_v8  ;;  %v5534_v33 = vunpack.i.h.bf16 %v6832_v63 }
 0x113   : > { %v5533_v34 = vunpack.i.l.bf16 %v6832_v63  ;;  %v5529_v42 = vunpack.i.h.bf16 %v6842_v12  ;;  %v5528_v43 = vunpack.i.l.bf16 %v6842_v12 }
 0x114   : > { %9815 = vst [vmem:[#allocation14_spill] sm:$0xff] %v6834_v3  ;;  %9816 = vst [vmem:[#allocation15_spill] sm:$0xff] %v6836_v7  ;;  %474 = vmatprep.subr.bf16.mxu0 %v6834_v3  ;;  %5042 = vmatpush3.bf16.msra.mxu1 %v6836_v7 }
 0x115   : > { %9817 = vst [vmem:[#allocation16_spill] sm:$0xff] %v6846_v14  ;;  %5055 = vmatprep.subr.bf16.mxu1 %v9737_v17  ;;  %475 = vmatpush1.bf16.msra.mxu0 %v6846_v14  ;;  %v6850_v15 = vpop.permute.xlu1 %5536  ;;  %v5542_v21 = vpop.permute.xlu0 %5541 }
 0x116   : > { %596 = vmatprep.subr.bf16.mxu0 %v6714_v40  ;;  %v5544_v23 = vunpack.i.h.bf16 %v5542_v21  ;;  %v5543_v24 = vunpack.i.l.bf16 %v5542_v21  ;;  %v5539_v44 = vunpack.i.h.bf16 %v6850_v15  ;;  %v5538_v45 = vunpack.i.l.bf16 %v6850_v15 }
 0x117   : > { %5044 = vmatmul.mubr.msk.bf16.vlgmr.msra.gmra.mrb[0].mxu1 %vm460_vm4, %v457_v13  ;;  %v425_v15 = vsel %vm416_vm5, %v5528_v43, %v5533_v34 }
 0x118   : > { %5056 = vmatpush3.bf16.msra.mxu1 %v6734_v49  ;;  %5047 = vmatprep.mubr.msk.bf16.mxu1 %vm6594_vm2, %v9737_v17  ;;  %v424_v59 = vsel %vm416_vm5, %v5539_v44, %v5544_v23  ;;  %v423_v60 = vsel %vm416_vm5, %v5538_v45, %v5543_v24 }
 0x119   : > { %4811 = vmatmul.mubr.msk.bf16.vlgmr.msra.gmra.mrb[0].mxu0 %vm460_vm4, %v457_v13  ;;  %5057 = vmatprep.subr.bf16.mxu1 %v9737_v17  ;;  %v5552_v0 = vpop.permute.xlu1 %5551  ;;  %v5547_v32 = vpop.permute.xlu0 %5546  ;;  %v426_v13 = vsel %vm416_vm5, %v5529_v42, %v5534_v33 }
 0x11a   : > { %597 = vmatpush1.bf16.msra.mxu0 %v6700_v25  ;;  %512 = vmatprep.mubr.bf16.mxu0 %v9735_v48  ;;  %v5554_v5 = vunpack.i.h.bf16 %v5552_v0  ;;  %v5553_v6 = vunpack.i.l.bf16 %v5552_v0  ;;  %v5549_v37 = vunpack.i.h.bf16 %v5547_v32  ;;  %v5548_v38 = vunpack.i.l.bf16 %v5547_v32 }
 0x11b   : > { %598 = vmatprep.subr.bf16.mxu0 %v6856_v16  ;;  %v6946_v0 = vpack.c.bf16 %v424_v59, %v423_v60 }
 0x11c   : > { %5058 = vmatpush3.bf16.msra.mxu1 %v6861_v18  ;;  %v417_v2 = vsel %vm416_vm5, %v5543_v24, %v5553_v6  ;;  %v418_v4 = vsel %vm416_vm5, %v5544_v23, %v5554_v5  ;;  %v429_v51 = vsel %vm416_vm5, %v5553_v6, %v5538_v45  ;;  %v430_v52 = vsel %vm416_vm5, %v5554_v5, %v5539_v44  ;;  %v446_v6 = vld [vmem:[%s9729_s2 + $0x38] sm:$0xff] }
 0x11d   : > { %5059 = vmatprep.subr.bf16.mxu1 %v9737_v17  ;;  %v6897_v27 = vpack.c.bf16 %v418_v4, %v417_v2  ;;  %v5557_v31 = vpop.permute.xlu1 %5556  ;;  %v419_v57 = vsel %vm416_vm5, %v5533_v34, %v5548_v38  ;;  %v420_v58 = vsel %vm416_vm5, %v5534_v33, %v5549_v37  ;;  %v432_v61 = vsel %vm416_vm5, %v5549_v37, %v5529_v42  ;;  %v5562_v63 = vpop.permute.xlu0 %5561  ;;  %v714_v44 = vld [vmem:[%s9729_s2 + $0x58] sm:$0xff] }
 0x11e   : > { %599 = vmatpush1.bf16.msra.mxu0 %v6876_v1  ;;  %v431_v62 = vsel %vm416_vm5, %v5548_v38, %v5528_v43  ;;  %v6936_v12 = vpack.c.bf16 %v430_v52, %v429_v51  ;;  %v6943_v19 = vpack.c.bf16 %v420_v58, %v419_v57  ;;  %v5564_v20 = vunpack.i.h.bf16 %v5562_v63  ;;  %9824 = vst [vmem:[#allocation23_spill] sm:$0xff] %v6946_v0  ;;  %v713_v43 = vld [vmem:[%s9729_s2 + $0x50] sm:$0xff]  ;;  %v715_v51 = vld [vmem:[%s9729_s2 + $0x60] sm:$0xff]  ;;  %v716_v52 = vld [vmem:[%s9729_s2 + $0x68] sm:$0xff] }
 0x11f   : > { %600 = vmatprep.subr.bf16.mxu0 %v6736_v50  ;;  %5048 = vmatmul.mubr.msk.bf16.gmra.mrb[4].mxu1 %vm460_vm4, %v458_v22  ;;  %9821 = vst [vmem:[#allocation20_spill] sm:$0xff] %v6897_v27  ;;  %v5563_v21 = vunpack.i.l.bf16 %v5562_v63  ;;  %v6948_v5 = vpack.c.bf16 %v432_v61, %v431_v62  ;;  %v5559_v23 = vunpack.i.h.bf16 %v5557_v31  ;;  %v5558_v24 = vunpack.i.l.bf16 %v5557_v31 }
 0x120   : > { %5060 = vmatpush3.bf16.msra.mxu1 %v6738_v53  ;;  %5051 = vmatprep.mubr.msk.bf16.mxu1 %vm6594_vm2, %v9737_v17  ;;  %9822 = vst [vmem:[#allocation21_spill] sm:$0xff] %v6936_v12  ;;  %9823 = vst [vmem:[#allocation22_spill] sm:$0xff] %v6943_v19  ;;  %v6961_v2 = vpack.c.bf16 %v426_v13, %v425_v15  ;;  %v451_v42 = vpack.c.bf16 %v448_v41, %v448_v41 }
 0x121   : > { %4812 = vmatmul.mubr.msk.bf16.gmra.mrb[4].mxu0 %vm460_vm4, %v458_v22  ;;  %5073 = vmatprep.subr.bf16.mxu1 %v9737_v17  ;;  %v5567_v55 = vpop.permute.xlu1 %5566  ;;  %9825 = vst [vmem:[#allocation24_spill] sm:$0xff] %v6948_v5  ;;  %v447_v22 = vld [vmem:[%s9729_s2 + $0x40] sm:$0xff]  ;;  %v428_v33 = vsel %vm416_vm5, %v5559_v23, %v5564_v20  ;;  %v427_v34 = vsel %vm416_vm5, %v5558_v24, %v5563_v21 }
 0x122   : > { %601 = vmatpush1.bf16.msra.mxu0 %v6740_v54  ;;  %522 = vmatprep.mubr.bf16.mxu0 %v9735_v48  ;;  %v5569_v8 = vunpack.i.h.bf16 %v5567_v55  ;;  %v5568_v11 = vunpack.i.l.bf16 %v5567_v55  ;;  %9826 = vst [vmem:[#allocation25_spill] sm:$0xff] %v6961_v2  ;;  %v450_v32 = vpack.c.bf16 %v447_v22, %v446_v6  ;;  %v6987_v39 = vpack.c.bf16 %v428_v33, %v427_v34 }
 0x123   : > { %730 = vmatprep.subr.bf16.mxu0 %v6897_v27  ;;  %v718_v45 = vpack.c.bf16 %v714_v44, %v713_v43  ;;  %v719_v55 = vpack.c.bf16 %v716_v52, %v715_v51 }
 0x124   : > { %v421_v4 = vsel %vm416_vm5, %v5563_v21, %v5568_v11  ;;  %v422_v26 = vsel %vm416_vm5, %v5564_v20, %v5569_v8  ;;  %v434_v31 = vsel %vm416_vm5, %v5569_v8, %v5559_v23  ;;  %9829 = vst [vmem:[#allocation28_spill] sm:$0xff] %v6987_v39 }
 0x125   : > { %v6978_v37 = vpack.c.bf16 %v422_v26, %v421_v4 }
 0x127   : > { %5052 = vmatmul.mubr.msk.bf16.gmra.mrb[8].mxu1 %vm460_vm4, %v459_v28  ;;  %9827 = vst [vmem:[#allocation26_spill] sm:$0xff] %v6978_v37 }
 0x128   : > { %5061 = vmatprep.mubr.msk.bf16.mxu1 %vm6594_vm2, %v9737_v17 }
 0x129   : > { %4813 = vmatmul.mubr.msk.bf16.gmra.mrb[8].mxu0 %vm460_vm4, %v459_v28  ;;  %v433_v28 = vsel %vm416_vm5, %v5568_v11, %v5558_v24 }
 0x12a   : > { %628 = vmatprep.mubr.bf16.mxu0 %v9735_v48  ;;  %v6982_v38 = vpack.c.bf16 %v434_v31, %v433_v28 }
 0x12c   : > { %9828 = vst [vmem:[#allocation27_spill] sm:$0xff] %v6982_v38 }
 0x12f   : > { %5062 = vmatmul.mubr.msk.bf16.vlgmr.msra.gmra.mrb[12].mxu1 %vm460_vm4, %v449_v56 }
 0x130   : > { %5074 = vmatpush3.bf16.msra.mxu1 %v6936_v12  ;;  %5065 = vmatprep.mubr.msk.bf16.mxu1 %vm6594_vm2, %v9737_v17 }
 0x131   : > { %4817 = vmatmul.mubr.msk.bf16.vlgmr.msra.gmra.mrb[0].mxu0 %vm460_vm4, %v449_v56  ;;  %5075 = vmatprep.subr.bf16.mxu1 %v9737_v17  ;;  %v717_v56 = vld [vmem:[%s9729_s2 + $0x70] sm:$0xff] }
 0x132   : > { %731 = vmatpush1.bf16.msra.mxu0 %v6946_v0  ;;  %638 = vmatprep.mubr.bf16.mxu0 %v9735_v48  ;;  %v720_v57 = vpack.c.bf16 %v717_v56, %v717_v56 }
 0x133   : > { %732 = vmatprep.subr.bf16.mxu0 %v6943_v19 }
 0x134   : > { %5076 = vmatpush3.bf16.msra.mxu1 %v6948_v5 }
 0x135   : > { %5077 = vmatprep.subr.bf16.mxu1 %v9737_v17 }
 0x136   : > { %733 = vmatpush1.bf16.msra.mxu0 %v6961_v2 }
 0x137   : > { %734 = vmatprep.subr.bf16.mxu0 %v6978_v37  ;;  %5066 = vmatmul.mubr.msk.bf16.gmra.mrb[16].mxu1 %vm460_vm4, %v450_v32 }
 0x138   : > { %5078 = vmatpush3.bf16.msra.mxu1 %v6982_v38  ;;  %5069 = vmatprep.mubr.msk.bf16.mxu1 %vm6594_vm2, %v9737_v17 }
 0x139   : > { %4818 = vmatmul.mubr.msk.bf16.gmra.mrb[4].mxu0 %vm460_vm4, %v450_v32  ;;  %5091 = vmatprep.subr.bf16.mxu1 %v9737_v17 }
 0x13a   : > { %735 = vmatpush1.bf16.msra.mxu0 %v6987_v39  ;;  %648 = vmatprep.mubr.bf16.mxu0 %v9735_v48 }
 0x13f   : > { %5070 = vmatmul.mubr.msk.bf16.gmra.mrb[20].mxu1 %vm460_vm4, %v451_v42 }
 0x140   : > { %5079 = vmatprep.mubr.msk.bf16.mxu1 %vm6594_vm2, %v9737_v17 }
 0x141   : > { %4819 = vmatmul.mubr.msk.bf16.gmra.mrb[12].mxu0 %vm460_vm4, %v451_v42 }
 0x142   : > { %762 = vmatprep.mubr.bf16.mxu0 %v9735_v48 }
 0x147   : > { %5080 = vmatmul.mubr.msk.bf16.vlgmr.msra.gmra.mrb[24].mxu1 %vm460_vm4, %v718_v45 }
 0x148   : > { %5083 = vmatprep.mubr.msk.bf16.mxu1 %vm6594_vm2, %v9737_v17 }
 0x149   : > { %4823 = vmatmul.mubr.msk.bf16.vlgmr.msra.gmra.mrb[0].mxu0 %vm460_vm4, %v718_v45 }
 0x14a   : > { %772 = vmatprep.mubr.bf16.mxu0 %v9735_v48 }
 0x14f   : > { %5084 = vmatmul.mubr.msk.bf16.gmra.mrb[28].mxu1 %vm460_vm4, %v719_v55 }
 0x150   : > { %5087 = vmatprep.mubr.msk.bf16.mxu1 %vm6594_vm2, %v9737_v17 }
 0x151   : > { %4824 = vmatmul.mubr.msk.bf16.gmra.mrb[4].mxu0 %vm460_vm4, %v719_v55 }
 0x152   : > { %782 = vmatprep.mubr.bf16.mxu0 %v9735_v48 }
 0x157   : > { %5088 = vmatmul.mubr.msk.bf16.gmra.mrb[32].mxu1 %vm460_vm4, %v720_v57 }
 0x158   : > { %5097 = vmatprep.mubr.msk.bf16.mxu1 %vm6594_vm2, %v9737_v17 }
 0x159   : > { %4825 = vmatmul.mubr.msk.bf16.gmra.mrb[16].mxu0 %vm460_vm4, %v720_v57 }
 0x15a   : > { %1165 = vmatprep.mubr.bf16.mxu0 %v9735_v48 }
 0x1ea   : > { %v565_v58 = vpop.f32.mrb[0].mxu1 }
 0x1eb   : > { %v5045_v59 = vpop.f32.mrb[1].mxu1 }
 0x1ec   : > { %v568_v60 = vpop.f32.mrb[2].mxu1 }
 0x1ed   : > { %v5046_v61 = vpop.f32.mrb[3].mxu1 }
 0x1f2   : > { %v573_v62 = vpop.f32.mrb[4].mxu1 }
 0x1f3   : > { %v5049_v63 = vpop.f32.mrb[5].mxu1 }
 0x1f4   : > { %v576_v8 = vpop.f32.mrb[6].mxu1 }
 0x1f5   : > { %v5050_v11 = vpop.f32.mrb[7].mxu1 }
 0x1f6   : > { %v7040_v11 = vshrl.u32 %v9734_v9, 7 }
 0x1f8   : > { %9830 = vst [vmem:[#allocation29_spill] sm:$0xff] %v7040_v11 }
 0x1fa   : > { %v581_v13 = vpop.f32.mrb[8].mxu1 }
 0x1fb   : > { %v5053_v15 = vpop.f32.mrb[9].mxu1 }
 0x1fc   : > { %v524_v20 = vpop.f32.mrb[8].mxu0  ;;  %v584_v21 = vpop.f32.mrb[10].mxu1 }
 0x1fd   : > { %v526_v6 = vpop.f32.mrb[9].mxu0  ;;  %v5054_v22 = vpop.f32.mrb[11].mxu1  ;;  %v933_v21 = vsub.s32 2, %v7040_v11 }
 0x1fe   : > { %v528_v23 = vpop.f32.mrb[10].mxu0  ;;  %v875_v15 = vpop.permute.xlu1 %874  ;;  %v260_v22 = vld [vmem:[%s9728_s1] sm:$0x7] }
 0x1ff   : > { %v529_v24 = vpop.f32.mrb[11].mxu0  ;;  %v925_v23 = vsub.s32 0, %v7040_v11 }
 0x202   : > { %v691_v4 = vpop.f32.mrb[12].mxu1 }
 0x203   : > { %v692_v26 = vadd.f32 %v691_v4, %v565_v58  ;;  %v5063_v28 = vpop.f32.mrb[13].mxu1  ;;  %v929_v4 = vsub.s32 1, %v7040_v11 }
 0x204   : > { %v694_v31 = vpop.f32.mrb[14].mxu1 }
 0x205   : > { %v695_v32 = vadd.f32 %v694_v31, %v568_v60  ;;  %v5064_v33 = vpop.f32.mrb[15].mxu1 }
 0x20a   : > { %v699_v34 = vpop.f32.mrb[16].mxu1 }
 0x20b   : > { %v700_v41 = vadd.f32 %v699_v34, %v573_v62  ;;  %v5067_v42 = vpop.f32.mrb[17].mxu1 }
 0x20c   : > { %v702_v43 = vpop.f32.mrb[18].mxu1 }
 0x20d   : > { %v703_v44 = vadd.f32 %v702_v43, %v576_v8  ;;  %v5068_v45 = vpop.f32.mrb[19].mxu1 }
 0x20e   : > { %v7048_v45 = vrot.slane %v260_v22, %v933_v21 }
 0x210   : > { %9831 = vst [vmem:[#allocation30_spill] sm:$0xff] %v7048_v45 }
 0x212   : > { %v707_v51 = vpop.f32.mrb[20].mxu1 }
 0x213   : > { %v7033_v52 = vadd.f32 %v707_v51, %v581_v13  ;;  %v5071_v55 = vpop.f32.mrb[21].mxu1  ;;  %v870_v13 = vpop.permute.xlu0 %869 }
 0x214   : > { %v650_v56 = vpop.f32.mrb[12].mxu0  ;;  %v710_v57 = vpop.f32.mrb[22].mxu1 }
 0x215   : > { %v7035_v59 = vadd.f32 %v650_v56, %v524_v20  ;;  %v652_v61 = vpop.f32.mrb[13].mxu0  ;;  %v5072_v58 = vpop.f32.mrb[23].mxu1  ;;  %v7050_v57 = vrot.slane %v260_v22, %v925_v23 }
 0x216   : > { %v7037_v63 = vadd.f32 %v652_v61, %v526_v6  ;;  %v654_v60 = vpop.f32.mrb[14].mxu0 }
 0x217   : > { %v655_v62 = vpop.f32.mrb[15].mxu0  ;;  %9832 = vst [vmem:[#allocation31_spill] sm:$0xff] %v7050_v57 }
 0x21a   : > { %v825_v8 = vpop.f32.mrb[24].mxu1 }
 0x21b   : > { %v849_v20 = vadd.f32 %v825_v8, %v692_v26  ;;  %v5081_v24 = vpop.f32.mrb[25].mxu1  ;;  %v7052_v8 = vrot.slane %v260_v22, %v929_v4 }
 0x21c   : > { %v764_v6 = vpop.f32.mrb[0].mxu0  ;;  %v828_v28 = vpop.f32.mrb[26].mxu1 }
 0x21d   : > { %v894_v31 = vadd.f32 %v870_v13, %v849_v20  ;;  %v892_v33 = vadd.f32 %v870_v13, %v764_v6  ;;  %v766_v34 = vpop.f32.mrb[1].mxu0  ;;  %v852_v42 = vadd.f32 %v828_v28, %v695_v32  ;;  %v5082_v43 = vpop.f32.mrb[27].mxu1  ;;  %9833 = vst [vmem:[#allocation32_spill] sm:$0xff] %v7052_v8 }
 0x21e   : > { %v893_v51 = vadd.f32 %v870_v13, %v766_v34  ;;  %v768_v55 = vpop.f32.mrb[2].mxu0  ;;  %v880_v28 = vpop.permute.xlu1 %879 }
 0x21f   : > { %v907_v56 = vmax.f32 %v892_v33, 0.0  ;;  %v897_v26 = vadd.f32 %v875_v15, %v852_v42  ;;  %v895_v61 = vadd.f32 %v875_v15, %v768_v55  ;;  %v770_v58 = vpop.f32.mrb[3].mxu0  ;;  %v909_v60 = vmax.f32 %v894_v31, 0.0 }
 0x220   : > { %v908_v62 = vmax.f32 %v893_v51, 0.0  ;;  %v896_v24 = vadd.f32 %v875_v15, %v770_v58 }
 0x221   : > { %v912_v20 = vmax.f32 %v897_v26, 0.0  ;;  %v910_v6 = vmax.f32 %v895_v61, 0.0  ;;  %v7055_v21 = vmul.f32 %v7050_v57, %v907_v56  ;;  %v7064_v22 = vmul.f32 %v7048_v45, %v909_v60 }
 0x222   : > { %v911_v9 = vmax.f32 %v896_v24, 0.0  ;;  %v833_v32 = vpop.f32.mrb[28].mxu1  ;;  %v7067_v15 = vmul.f32 %v7052_v8, %v908_v62 }
 0x223   : > { %v7058_v13 = vmul.f32 %v7048_v45, %v912_v20  ;;  %v7061_v23 = vmul.f32 %v7050_v57, %v910_v6  ;;  %v855_v33 = vadd.f32 %v833_v32, %v700_v41  ;;  %v5085_v31 = vpop.f32.mrb[29].mxu1  ;;  %v885_v41 = vpop.permute.xlu0 %884 }
 0x224   : > { %v7070_v4 = vmul.f32 %v7052_v8, %v911_v9  ;;  %v774_v34 = vpop.f32.mrb[4].mxu0  ;;  %v836_v42 = vpop.f32.mrb[30].mxu1 }
 0x225   : > { %v776_v43 = vpop.f32.mrb[5].mxu0  ;;  %v858_v51 = vadd.f32 %v836_v42, %v703_v44  ;;  %v7074_v55 = vpack.i.bf16 %v7061_v23, %v7055_v21  ;;  %v5086_v56 = vpop.f32.mrb[31].mxu1  ;;  %v7082_v58 = vpack.i.bf16 %v7058_v13, %v7064_v22  ;;  %v898_v9 = vadd.f32 %v880_v28, %v774_v34 }
 0x226   : > { %v778_v26 = vpop.f32.mrb[6].mxu0  ;;  %v7078_v61 = vpack.i.bf16 %v7070_v4, %v7067_v15  ;;  %v900_v6 = vadd.f32 %v880_v28, %v855_v33  ;;  %v899_v32 = vadd.f32 %v880_v28, %v776_v43  ;;  %v890_v42 = vpop.permute.xlu1 %889 }
 0x227   : > { %v901_v60 = vadd.f32 %v885_v41, %v778_v26  ;;  %5573 = vrot.lane.b32.xlu0 %v7074_v55, %s6590_s27  ;;  %v780_v44 = vpop.f32.mrb[7].mxu0  ;;  %v903_v62 = vadd.f32 %v885_v41, %v858_v51  ;;  %v913_v56 = vmax.f32 %v898_v9, 0.0 }
 0x228   : > { %5578 = vrot.lane.b32.xlu1 %v7078_v61, %s6590_s27  ;;  %v902_v20 = vadd.f32 %v885_v41, %v780_v44  ;;  %v914_v44 = vmax.f32 %v899_v32, 0.0 }
 0x229   : > { %v916_v24 = vmax.f32 %v901_v60, 0.0  ;;  %v918_v26 = vmax.f32 %v903_v62, 0.0  ;;  %v7099_v62 = vmul.f32 %v7050_v57, %v913_v56 }
 0x22a   : > { %v841_v31 = vpop.f32.mrb[32].mxu1  ;;  %v917_v33 = vmax.f32 %v902_v20, 0.0 }
 0x22b   : > { %v861_v48 = vadd.f32 %v841_v31, %v7033_v52  ;;  %5583 = vrot.lane.b32.xlu0 %v7082_v58, %s6590_s27  ;;  %v5089_v34 = vpop.f32.mrb[33].mxu1  ;;  %v7094_v60 = vmul.f32 %v7050_v57, %v916_v24  ;;  %v915_v52 = vmax.f32 %v900_v6, 0.0 }
 0x22c   : > { %5588 = vrot.lane.b32.xlu1 %v7074_v55, %s6591_s28  ;;  %v784_v51 = vpop.f32.mrb[16].mxu0  ;;  %v844_v17 = vpop.f32.mrb[34].mxu1  ;;  %v7113_v6 = vmul.f32 %v7052_v8, %v917_v33 }
 0x22d   : > { %v906_v28 = vadd.f32 %v890_v42, %v861_v48  ;;  %v859_v43 = vadd.f32 %v784_v51, %v7035_v59  ;;  %v786_v41 = vpop.f32.mrb[17].mxu0  ;;  %v5090_v9 = vpop.f32.mrb[35].mxu1  ;;  %v949_v59 = vmul.f32 %v7048_v45, %v918_v26  ;;  %v5602_v51 = vpack.i.bf16 %v7094_v60, %v7099_v62 }
 0x22e   : > { %v860_v31 = vadd.f32 %v786_v41, %v7037_v63  ;;  %v788_v34 = vpop.f32.mrb[18].mxu0  ;;  %v7122_v26 = vmul.f32 %v7052_v8, %v914_v44 }
 0x22f   : > { %v921_v11 = vmax.f32 %v906_v28, 0.0  ;;  %v904_v39 = vadd.f32 %v890_v42, %v859_v43  ;;  %5593 = vrot.lane.b32.xlu0 %v7078_v61, %s6591_s28  ;;  %v789_v17 = vpop.f32.mrb[19].mxu0 }
 0x230   : > { %v905_v24 = vadd.f32 %v890_v42, %v860_v31  ;;  %5598 = vrot.lane.b32.xlu1 %v7082_v58, %s6591_s28  ;;  %v7119_v42 = vmul.f32 %v7048_v45, %v915_v52  ;;  %v5612_v9 = vpack.i.bf16 %v7113_v6, %v7122_v26 }
 0x231   : > { %v952_v32 = vmul.f32 %v7048_v45, %v921_v11  ;;  %v919_v56 = vmax.f32 %v904_v39, 0.0 }
 0x232   : > { %v920_v28 = vmax.f32 %v905_v24, 0.0  ;;  %v5617_v11 = vpack.i.bf16 %v949_v59, %v7119_v42 }
 0x233   : > { %v7125_v43 = vmul.f32 %v7050_v57, %v919_v56  ;;  %5603 = vrot.lane.b32.xlu0 %v5602_v51, %s6590_s27  ;;  %v7128_v33 = vpack.i.bf16 %v952_v32, %v949_v59  ;;  %v7130_v41 = vpack.c.bf16 %v952_v32, %v949_v59 }
 0x234   : > { %v7133_v39 = vmul.f32 %v7052_v8, %v920_v28  ;;  %5608 = vrot.lane.b32.xlu1 %v5602_v51, %s6591_s28 }
 0x235   : > { %v7141_v52 = vpack.i.bf16 %v7125_v43, %v7094_v60 }
 0x236   : > { %v5627_v31 = vpack.i.bf16 %v7133_v39, %v7125_v43  ;;  %v7149_v34 = vpack.i.bf16 %v7133_v39, %v7113_v6 }
 0x237   : > { %5618 = vrot.lane.b32.xlu0 %v5617_v11, %s6590_s27 }
 0x238   : > { %5613 = vrot.lane.b32.xlu1 %v5612_v9, %s6590_s27 }
 0x23b   : > { %1456 = vrot.lane.b32.xlu0 %v952_v32, %s6590_s27 }
 0x23c   : > { %5628 = vrot.lane.b32.xlu1 %v5627_v31, %s6590_s27 }
 0x23f   : > { %5623 = vrot.lane.b32.xlu0 %v5612_v9, %s6591_s28 }
 0x240   : > { %5633 = vrot.lane.b32.xlu1 %v5617_v11, %s6591_s28 }
 0x243   : > { %5643 = vrot.lane.b32.xlu0 %v7078_v61, %s6592_s29 }
 0x244   : > { %1483 = vrot.lane.b32.xlu1 %v952_v32, %s6591_s28 }
 0x247   : > { %5653 = vrot.lane.b32.xlu0 %v5627_v31, %s6591_s28 }
 0x248   : > { %5638 = vrot.lane.b32.xlu1 %v7074_v55, %s6592_s29 }
 0x24c   : > { %5648 = vrot.lane.b32.xlu1 %v7082_v58, %s6592_s29 }
 0x299   : > { %v5574_v59 = vpop.permute.xlu0 %5573 }
 0x29a   : > { %v5576_v24 = vunpack.i.h.bf16 %v5574_v59  ;;  %v5575_v56 = vunpack.i.l.bf16 %v5574_v59  ;;  %v5579_v51 = vpop.permute.xlu1 %5578 }
 0x29b   : > { %v5581_v28 = vunpack.i.h.bf16 %v5579_v51  ;;  %v5580_v9 = vunpack.i.l.bf16 %v5579_v51 }
 0x29d   : > { %v5584_v11 = vpop.permute.xlu0 %5583  ;;  %v7169_v44 = vsel %vm281_vm0, %v5575_v56, %v5580_v9  ;;  %v7173_v32 = vsel %vm281_vm0, %v5576_v24, %v5581_v28 }
 0x29e   : > { %v5586_v31 = vunpack.i.h.bf16 %v5584_v11  ;;  %v5585_v17 = vunpack.i.l.bf16 %v5584_v11  ;;  %v5589_v20 = vpop.permute.xlu1 %5588  ;;  %v7177_v63 = vpack.i.bf16 %v7173_v32, %v7169_v44 }
 0x2a0   : > { %5663 = vrot.lane.b32.xlu1 %v7177_v63, %s6592_s29  ;;  %v7185_v51 = vsel %vm281_vm0, %v5585_v17, %v5575_v56  ;;  %v7189_v48 = vsel %vm281_vm0, %v5586_v31, %v5576_v24  ;;  %v7193_v11 = vsel %vm281_vm0, %v5580_v9, %v5585_v17  ;;  %v7197_v38 = vsel %vm281_vm0, %v5581_v28, %v5586_v31 }
 0x2a1   : > { %v5594_v59 = vpop.permute.xlu0 %5593  ;;  %v7201_v37 = vpack.i.bf16 %v7189_v48, %v7185_v51  ;;  %v5591_v17 = vunpack.i.h.bf16 %v5589_v20  ;;  %v5590_v9 = vunpack.i.l.bf16 %v5589_v20  ;;  %v7211_v28 = vpack.i.bf16 %v7197_v38, %v7193_v11 }
 0x2a2   : > { %v5596_v2 = vunpack.i.h.bf16 %v5594_v59  ;;  %v5595_v56 = vunpack.i.l.bf16 %v5594_v59  ;;  %v5599_v5 = vpop.permute.xlu1 %5598 }
 0x2a3   : > { %v5601_v0 = vunpack.i.h.bf16 %v5599_v5  ;;  %v5600_v12 = vunpack.i.l.bf16 %v5599_v5  ;;  %5658 = vrot.lane.b32.xlu0 %v7201_v37, %s6592_s29 }
 0x2a4   : > { %v7223_v20 = vsel %vm300_vm1, %v5590_v9, %v5595_v56  ;;  %v7227_v5 = vsel %vm300_vm1, %v5591_v17, %v5596_v2 }
 0x2a5   : > { %v5604_v31 = vpop.permute.xlu0 %5603  ;;  %v7215_v59 = vsel %vm300_vm1, %v5595_v56, %v5600_v12  ;;  %v7219_v24 = vsel %vm300_vm1, %v5596_v2, %v5601_v0  ;;  %v7233_v54 = vsel %vm300_vm1, %v5600_v12, %v5590_v9  ;;  %v7237_v53 = vsel %vm300_vm1, %v5601_v0, %v5591_v17 }
 0x2a6   : > { %v5609_v19 = vpop.permute.xlu1 %5608  ;;  %v5677_v27 = vpack.i.bf16 %v7219_v24, %v7215_v59  ;;  %v5672_v12 = vpack.i.bf16 %v7227_v5, %v7223_v20  ;;  %v5605_v0 = vunpack.i.l.bf16 %v5604_v31  ;;  %v5606_v16 = vunpack.i.h.bf16 %v5604_v31 }
 0x2a7   : > { %5668 = vrot.lane.b32.xlu0 %v7211_v28, %s6592_s29  ;;  %v5682_v56 = vpack.i.bf16 %v7237_v53, %v7233_v54  ;;  %v5610_v46 = vunpack.i.l.bf16 %v5609_v19 }
 0x2a8   : > { %5678 = vrot.lane.b32.xlu1 %v5677_v27, %s6592_s29 }
 0x2a9   : > { %v5619_v50 = vpop.permute.xlu0 %5618 }
 0x2aa   : > { %v5621_v17 = vunpack.i.h.bf16 %v5619_v50  ;;  %v5620_v1 = vunpack.i.l.bf16 %v5619_v50  ;;  %v5614_v18 = vpop.permute.xlu1 %5613 }
 0x2ab   : > { %v5616_v25 = vunpack.i.h.bf16 %v5614_v18  ;;  %v5615_v49 = vunpack.i.l.bf16 %v5614_v18  ;;  %5673 = vrot.lane.b32.xlu0 %v5672_v12, %s6592_s29 }
 0x2ac   : > { %5693 = vrot.lane.b32.xlu1 %v7082_v58, %s6596_s30  ;;  %v7257_v2 = vsel %vm281_vm0, %v5620_v1, %v5605_v0  ;;  %v7269_v31 = vsel %vm281_vm0, %v5621_v17, %v5606_v16 }
 0x2ad   : > { %v1457_v9 = vpop.permute.xlu0 %1456  ;;  %v7261_v50 = vsel %vm281_vm0, %v5605_v0, %v5615_v49  ;;  %v7265_v18 = vsel %vm281_vm0, %v5606_v16, %v5616_v25  ;;  %v1458_v58 = vsel %vm281_vm0, %v5615_v49, %v5620_v1  ;;  %v1459_v14 = vsel %vm281_vm0, %v5616_v25, %v5621_v17 }
 0x2ae   : > { %v5629_v40 = vpop.permute.xlu1 %5628  ;;  %v7280_v7 = vpack.c.bf16 %v1459_v14, %v1458_v58  ;;  %v5611_v17 = vunpack.i.h.bf16 %v5609_v19 }
 0x2af   : > { %5683 = vrot.lane.b32.xlu0 %v5682_v56, %s6592_s29 }
 0x2b0   : > { %5708 = vrot.lane.b32.xlu1 %v7149_v34, %s6592_s29 }
 0x2b1   : > { %v5624_v3 = vpop.permute.xlu0 %5623 }
 0x2b2   : > { %v5626_v47 = vunpack.i.h.bf16 %v5624_v3  ;;  %v5625_v49 = vunpack.i.l.bf16 %v5624_v3  ;;  %v5634_v1 = vpop.permute.xlu1 %5633 }
 0x2b3   : > { %v5636_v36 = vunpack.i.h.bf16 %v5634_v1  ;;  %v5635_v25 = vunpack.i.l.bf16 %v5634_v1  ;;  %5688 = vrot.lane.b32.xlu0 %v7078_v61, %s6596_s30 }
 0x2b4   : > { %5713 = vrot.lane.b32.xlu1 %v7177_v63, %s6596_s30  ;;  %v7290_v0 = vsel %vm300_vm1, %v5610_v46, %v5625_v49  ;;  %v7298_v3 = vsel %vm300_vm1, %v5611_v17, %v5626_v47 }
 0x2b5   : > { %9834 = vst [vmem:[#allocation33_spill] sm:$0xff] %v7290_v0  ;;  %v7294_v16 = vsel %vm300_vm1, %v5625_v49, %v5635_v25  ;;  %9836 = vst [vmem:[#allocation35_spill] sm:$0xff] %v7298_v3  ;;  %v1491_v1 = vsel %vm300_vm1, %v5635_v25, %v5610_v46  ;;  %v1492_v19 = vsel %vm300_vm1, %v5636_v36, %v5611_v17 }
 0x2b6   : > { %9835 = vst [vmem:[#allocation34_spill] sm:$0xff] %v7294_v16  ;;  %v7306_v61 = vsel %vm300_vm1, %v5626_v47, %v5636_v36  ;;  %v7314_v49 = vpack.c.bf16 %v1492_v19, %v1491_v1  ;;  %v5630_v36 = vunpack.i.l.bf16 %v5629_v40  ;;  %v5747_v47 = vpack.i.bf16 %v7265_v18, %v7261_v50 }
 0x2b7   : > { %5698 = vrot.lane.b32.xlu0 %v7074_v55, %s6596_s30  ;;  %v5777_v46 = vpack.i.bf16 %v7298_v3, %v7290_v0  ;;  %v5787_v35 = vpack.i.bf16 %v1492_v19, %v1491_v1 }
 0x2b8   : > { %5723 = vrot.lane.b32.xlu1 %v7201_v37, %s6596_s30  ;;  %9837 = vst [vmem:[#allocation36_spill] sm:$0xff] %v7314_v49  ;;  %v5631_v37 = vunpack.i.h.bf16 %v5629_v40  ;;  %v7329_v55 = vsel %vm281_vm0, %v1457_v9, %v5630_v36  ;;  %v7342_v40 = vpop.permute.xlu0 %5643 }
 0x2ba   : > { %v7348_v17 = vsel %vm281_vm0, %v5630_v36, %v5631_v37  ;;  %v1484_v36 = vpop.permute.xlu1 %1483 }
 0x2bb   : > { %5703 = vrot.lane.b32.xlu0 %v7141_v52, %s6592_s29 }
 0x2bc   : > { %5728 = vrot.lane.b32.xlu1 %v5677_v27, %s6596_s30  ;;  %v5742_v27 = vpack.i.bf16 %v7269_v31, %v7257_v2  ;;  %v5654_v63 = vpop.permute.xlu0 %5653 }
 0x2bf   : > { %5718 = vrot.lane.b32.xlu0 %v7211_v28, %s6596_s30  ;;  %v5757_v28 = vpack.i.bf16 %v7099_v62, %v7329_v55 }
 0x2c0   : > { %5738 = vrot.lane.b32.xlu1 %v5672_v12, %s6596_s30  ;;  %v7339_v12 = vsel %vm281_vm0, %v5631_v37, %v1457_v9  ;;  %v5762_v9 = vpack.i.bf16 %v7122_v26, %v7348_v17  ;;  %v5782_v37 = vpack.i.bf16 %v7306_v61, %v7294_v16 }
 0x2c1   : > { %v5772_v25 = vpack.i.bf16 %v7119_v42, %v7339_v12 }
 0x2c3   : > { %5733 = vrot.lane.b32.xlu0 %v5682_v56, %s6596_s30  ;;  %v5752_v56 = vpack.i.bf16 %v1459_v14, %v1458_v58  ;;  %v5656_v14 = vunpack.i.h.bf16 %v5654_v63  ;;  %v5655_v58 = vunpack.i.l.bf16 %v5654_v63 }
 0x2c4   : > { %5748 = vrot.lane.b32.xlu1 %v5747_v47, %s6592_s29 }
 0x2c5   : > { %v7365_v30 = vsel %vm300_vm1, %v5656_v14, %v1484_v36  ;;  %v7369_v29 = vsel %vm300_vm1, %v5655_v58, %v5656_v14  ;;  %v7374_v1 = vsel %vm300_vm1, %v1484_v36, %v5655_v58 }
 0x2c6   : > { %9838 = vst [vmem:[#allocation37_spill] sm:$0xff] %v7365_v30  ;;  %v5792_v19 = vpack.i.bf16 %v7365_v30, %v7369_v29 }
 0x2c7   : > { %5743 = vrot.lane.b32.xlu0 %v5742_v27, %s6592_s29 }
 0x2c8   : > { %5758 = vrot.lane.b32.xlu1 %v5757_v28, %s6592_s29 }
 0x2cb   : > { %5753 = vrot.lane.b32.xlu0 %v5752_v56, %s6592_s29 }
 0x2cc   : > { %5773 = vrot.lane.b32.xlu1 %v5772_v25, %s6592_s29 }
 0x2cf   : > { %5763 = vrot.lane.b32.xlu0 %v5762_v9, %s6592_s29 }
 0x2d0   : > { %5778 = vrot.lane.b32.xlu1 %v5777_v46, %s6592_s29 }
 0x2d3   : > { %5768 = vrot.lane.b32.xlu0 %v7128_v33, %s6592_s29 }
 0x2d4   : > { %5788 = vrot.lane.b32.xlu1 %v5787_v35, %s6592_s29 }
 0x2d7   : > { %5783 = vrot.lane.b32.xlu0 %v5782_v37, %s6592_s29 }
 0x2d8   : > { %1561 = vrot.lane.b32.xlu1 %v7374_v1, %s6592_s29 }
 0x2db   : > { %5793 = vrot.lane.b32.xlu0 %v5792_v19, %s6592_s29 }
 0x2dc   : > { %5803 = vrot.lane.b32.xlu1 %v5752_v56, %s6596_s30  ;;  %v5645_v56 = vunpack.i.l.bf16 %v7342_v40 }
 0x2df   : > { %5798 = vrot.lane.b32.xlu0 %v5747_v47, %s6596_s30 }
 0x2e0   : > { %5813 = vrot.lane.b32.xlu1 %v5757_v28, %s6596_s30  ;;  %v5646_v28 = vunpack.i.h.bf16 %v7342_v40 }
 0x2e3   : > { %5808 = vrot.lane.b32.xlu0 %v5742_v27, %s6596_s30 }
 0x2e4   : > { %5823 = vrot.lane.b32.xlu1 %v7128_v33, %s6596_s30  ;;  %v2070_v33 = vld [vmem:[%s9730_s3 + $0x40] sm:$0xff] }
 0x2e7   : > { %5818 = vrot.lane.b32.xlu0 %v7149_v34, %s6596_s30  ;;  %v2069_v34 = vld [vmem:[%s9730_s3 + $0x38] sm:$0xff] }
 0x2e8   : > { %5828 = vrot.lane.b32.xlu1 %v5762_v9, %s6596_s30 }
 0x2eb   : > { %5833 = vrot.lane.b32.xlu0 %v5772_v25, %s6596_s30 }
 0x2ec   : > { %5843 = vrot.lane.b32.xlu1 %v5782_v37, %s6596_s30 }
 0x2ef   : > { %5838 = vrot.lane.b32.xlu0 %v7141_v52, %s6596_s30  ;;  %v2071_v52 = vld [vmem:[%s9730_s3 + $0x48] sm:$0xff] }
 0x2f0   : > { %5853 = vrot.lane.b32.xlu1 %v5777_v46, %s6596_s30 }
 0x2f3   : > { %5848 = vrot.lane.b32.xlu0 %v5787_v35, %s6596_s30  ;;  %v5639_v35 = vpop.permute.xlu1 %5638 }
 0x2f4   : > { %1657 = vrot.lane.b32.xlu1 %v7374_v1, %s6596_s30  ;;  %v5641_v47 = vunpack.i.h.bf16 %v5639_v35  ;;  %v5640_v27 = vunpack.i.l.bf16 %v5639_v35 }
 0x2f6   : > { %v1043_v35 = vsel %vm352_vm3, %v5641_v47, %v5646_v28 }
 0x2f7   : > { %5858 = vrot.lane.b32.xlu0 %v5792_v19, %s6596_s30  ;;  %v5649_v63 = vpop.permute.xlu1 %5648 }
 0x2f8   : > { %2079 = vperm.xlu1 %5571, %v2070_v33   ;;  %v5651_v37 = vunpack.i.h.bf16 %v5649_v63  ;;  %v5650_v19 = vunpack.i.l.bf16 %v5649_v63 }
 0x2fa   : > { %v1037_v63 = vsel %vm352_vm3, %v5646_v28, %v5651_v37  ;;  %v1048_v28 = vsel %vm352_vm3, %v5650_v19, %v5640_v27 }
 0x2fb   : > { %2074 = vperm.xlu0 %5570, %v2069_v34  }
 0x2ff   : > { %2084 = vperm.xlu0 %5570, %v2071_v52   ;;  %v1042_v52 = vsel %vm352_vm3, %v5640_v27, %v5645_v56 }
 0x300   : > { %v1056_v0 = vpack.c.bf16 %v1043_v35, %v1042_v52 }
 0x312   : > { %v5664_v46 = vpop.permute.xlu1 %5663 }
 0x313   : > { %v5666_v9 = vunpack.i.h.bf16 %v5664_v46  ;;  %v5665_v14 = vunpack.i.l.bf16 %v5664_v46 }
 0x315   : > { %v5659_v25 = vpop.permute.xlu0 %5658 }
 0x316   : > { %v5661_v58 = vunpack.i.h.bf16 %v5659_v25  ;;  %v5660_v36 = vunpack.i.l.bf16 %v5659_v25  ;;  %v1036_v25 = vsel %vm352_vm3, %v5645_v56, %v5650_v19  ;;  %v1049_v56 = vsel %vm352_vm3, %v5651_v37, %v5641_v47 }
 0x318   : > { %v1040_v33 = vsel %vm352_vm3, %v5660_v36, %v5665_v14  ;;  %v1041_v34 = vsel %vm352_vm3, %v5661_v58, %v5666_v9 }
 0x319   : > { %v5669_v40 = vpop.permute.xlu0 %5668  ;;  %v1053_v45 = vpack.c.bf16 %v1041_v34, %v1040_v33 }
 0x31a   : > { %v5671_v8 = vunpack.i.h.bf16 %v5669_v40  ;;  %v5670_v46 = vunpack.i.l.bf16 %v5669_v40  ;;  %v5679_v57 = vpop.permute.xlu1 %5678 }
 0x31b   : > { %1133 = vmatprep.subr.bf16.mxu0 %v1053_v45  ;;  %v5681_v40 = vunpack.i.h.bf16 %v5679_v57 }
 0x31c   : > { %v1034_v3 = vsel %vm352_vm3, %v5665_v14, %v5670_v46  ;;  %v1035_v30 = vsel %vm352_vm3, %v5666_v9, %v5671_v8  ;;  %v1046_v33 = vsel %vm352_vm3, %v5670_v46, %v5660_v36  ;;  %v1047_v34 = vsel %vm352_vm3, %v5671_v8, %v5661_v58  ;;  %v1128_v46 = vld [vmem:[%s9729_s2 + $0x80] sm:$0xff] }
 0x31d   : > { %v5674_v45 = vpop.permute.xlu0 %5673  ;;  %v1052_v52 = vpack.c.bf16 %v1047_v34, %v1046_v33  ;;  %v1054_v35 = vpack.c.bf16 %v1035_v30, %v1034_v3  ;;  %v5680_v14 = vunpack.i.l.bf16 %v5679_v57  ;;  %v9839_v36 = vmov 0.0  }
 0x31e   : > { %v5676_v49 = vunpack.i.h.bf16 %v5674_v45  ;;  %v5675_v16 = vunpack.i.l.bf16 %v5674_v45  ;;  %v7434_v9 = vpop.permute.xlu1 %5693  ;;  %v1055_v58 = vpack.c.bf16 %v1049_v56, %v1048_v28  ;;  %v1057_v30 = vpack.c.bf16 %v1037_v63, %v1036_v25 }
 0x31f   : > { %1134 = vmatpush1.bf16.msra.mxu0 %v1052_v52  ;;  %5092 = vmatpush3.bf16.msra.mxu1 %v1054_v35 }
 0x320   : > { %1135 = vmatprep.subr.bf16.mxu0 %v1056_v0  ;;  %5093 = vmatprep.subr.bf16.mxu1 %v9839_v36  ;;  %v1044_v8 = vsel %vm352_vm3, %v5675_v16, %v5680_v14  ;;  %v1045_v47 = vsel %vm352_vm3, %v5676_v49, %v5681_v40  ;;  %v1127_v0 = vld [vmem:[%s9729_s2 + $0x78] sm:$0xff] }
 0x321   : > { %v5684_v27 = vpop.permute.xlu0 %5683  ;;  %v1059_v3 = vpack.c.bf16 %v1045_v47, %v1044_v8  ;;  %v1129_v35 = vpack.c.bf16 %v1128_v46, %v1127_v0  ;;  %v9842_v8 = vpack.c.bf16 %v7197_v38, %v7193_v11  ;;  %v1124_v38 = vld [vmem:[%s9729_s2 + $0x88] sm:$0xff]  ;;  %v5696_v0 = vunpack.i.h.bf16 %v7434_v9 }
 0x322   : > { %v5686_v57 = vunpack.i.h.bf16 %v5684_v27  ;;  %v5685_v37 = vunpack.i.l.bf16 %v5684_v27  ;;  %v7441_v19 = vpop.permute.xlu1 %5708  ;;  %v9847_v46 = vpack.c.bf16 %v7219_v24, %v7215_v59 }
 0x323   : > { %1136 = vmatpush1.bf16.msra.mxu0 %v1055_v58  ;;  %5094 = vmatpush3.bf16.msra.mxu1 %v1057_v30 }
 0x324   : > { %v1038_v33 = vsel %vm352_vm3, %v5680_v14, %v5685_v37  ;;  %v1039_v63 = vsel %vm352_vm3, %v5681_v40, %v5686_v57  ;;  %v1050_v25 = vsel %vm352_vm3, %v5685_v37, %v5675_v16  ;;  %v1051_v34 = vsel %vm352_vm3, %v5686_v57, %v5676_v49  ;;  %1137 = vmatprep.subr.bf16.mxu0 %v1059_v3 }
 0x325   : > { %v5689_v28 = vpop.permute.xlu0 %5688  ;;  %5095 = vmatprep.subr.bf16.mxu1 %v9839_v36  ;;  %v1058_v56 = vpack.c.bf16 %v1051_v34, %v1050_v25  ;;  %v1060_v45 = vpack.c.bf16 %v1039_v63, %v1038_v33  ;;  %v9840_v14 = vpack.c.bf16 %v7173_v32, %v7169_v44  ;;  %v9841_v49 = vpack.c.bf16 %v7189_v48, %v7185_v51 }
 0x326   : > { %v5714_v52 = vpop.permute.xlu1 %5713  ;;  %v9843_v44 = vpack.c.bf16 %v7070_v4, %v7067_v15  ;;  %v5690_v32 = vunpack.i.l.bf16 %v5689_v28  ;;  %v5691_v27 = vunpack.i.h.bf16 %v5689_v28  ;;  %v9844_v51 = vmov 0   ;;  %v1125_v15 = vld [vmem:[%s9729_s2 + $0x90] sm:$0xff] }
 0x327   : > { %1138 = vmatpush1.bf16.msra.mxu0 %v1058_v56  ;;  %5096 = vmatpush3.bf16.msra.mxu1 %v1060_v45  ;;  %v5695_v4 = vunpack.i.l.bf16 %v7434_v9  ;;  %v9845_v57 = vpack.c.bf16 %v7061_v23, %v7055_v21  ;;  %v9846_v37 = vpack.c.bf16 %v7058_v13, %v7064_v22  ;;  %v5716_v33 = vunpack.i.h.bf16 %v5714_v52 }
 0x328   : > { %1220 = vmatprep.subr.bf16.mxu0 %v9840_v14  ;;  %5101 = vmatprep.subr.bf16.mxu1 %v9839_v36  ;;  %v5715_v63 = vunpack.i.l.bf16 %v5714_v52  ;;  %v1126_v34 = vpack.c.bf16 %v1125_v15, %v1124_v38  ;;  %v1100_v9 = vsel %vm416_vm5, %v5691_v27, %v5696_v0  ;;  %v9848_v45 = vpack.c.bf16 %v7227_v5, %v7223_v20 }
 0x329   : > { %v5699_v16 = vpop.permute.xlu0 %5698  ;;  %v1099_v21 = vsel %vm416_vm5, %v5690_v32, %v5695_v4  ;;  %v9849_v52 = vpack.c.bf16 %v7237_v53, %v7233_v54 }
 0x32a   : > { %v5724_v40 = vpop.permute.xlu1 %5723  ;;  %4829 = vmatmul.mubr.msk.bf16.vlgmr.msra.gmra.mrb[20].mxu0 %vm460_vm4, %v1129_v35  ;;  %5098 = vmatmul.mubr.msk.bf16.vlgmr.msra.gmra.mrb[36].mxu1 %vm460_vm4, %v1129_v35  ;;  %v5700_v58 = vunpack.i.l.bf16 %v5699_v16  ;;  %v5701_v11 = vunpack.i.h.bf16 %v5699_v16 }
 0x32b   : > { %1221 = vmatpush1.bf16.msra.mxu0 %v9841_v49  ;;  %5102 = vmatpush3.bf16.msra.mxu1 %v9842_v8  ;;  %v5726_v30 = vunpack.i.h.bf16 %v5724_v40  ;;  %v5725_v3 = vunpack.i.l.bf16 %v5724_v40 }
 0x32c   : > { %1222 = vmatprep.subr.bf16.mxu0 %v9843_v44  ;;  %5103 = vmatprep.subr.bf16.mxu1 %v9839_v36  ;;  %v1105_v23 = vsel %vm416_vm5, %v5700_v58, %v5690_v32  ;;  %v1106_v24 = vsel %vm416_vm5, %v5701_v11, %v5691_v27  ;;  %v1111_v20 = vsel %vm416_vm5, %v5695_v4, %v5700_v58 }
 0x32d   : > { %v7473_v47 = vpop.permute.xlu0 %5703  ;;  %5107 = vmatprep.mubr.msk.bf16.mxu1 %vm6594_vm2, %v9839_v36  ;;  %1252 = vmatprep.mubr.bf16.mxu0 %v9844_v51  ;;  %v1103_v59 = vsel %vm416_vm5, %v5725_v3, %v5715_v63  ;;  %v1104_v56 = vsel %vm416_vm5, %v5726_v30, %v5716_v33  ;;  %v1112_v53 = vsel %vm416_vm5, %v5696_v0, %v5701_v11 }
 0x32e   : > { %v7478_v48 = vpop.permute.xlu1 %5728  ;;  %v1115_v38 = vpack.c.bf16 %v1104_v56, %v1103_v59  ;;  %v1119_v4 = vpack.c.bf16 %v1100_v9, %v1099_v21  ;;  %v1120_v11 = vpack.c.bf16 %v1112_v53, %v1111_v20  ;;  %v5705_v53 = vunpack.i.l.bf16 %v7473_v47 }
 0x32f   : > { %1223 = vmatpush1.bf16.msra.mxu0 %v9845_v57  ;;  %5104 = vmatpush3.bf16.msra.mxu1 %v9846_v37  ;;  %v5730_v8 = vunpack.i.l.bf16 %v7478_v48  ;;  %v5731_v15 = vunpack.i.h.bf16 %v7478_v48 }
 0x330   : > { %1224 = vmatprep.subr.bf16.mxu0 %v9847_v46  ;;  %5105 = vmatprep.subr.bf16.mxu1 %v9839_v36  ;;  %v1118_v46 = vpack.c.bf16 %v1106_v24, %v1105_v23 }
 0x331   : > { %v5719_v25 = vpop.permute.xlu0 %5718 }
 0x332   : > { %v5721_v13 = vunpack.i.h.bf16 %v5719_v25  ;;  %v5720_v22 = vunpack.i.l.bf16 %v5719_v25  ;;  %v5739_v28 = vpop.permute.xlu1 %5738 }
 0x333   : > { %1225 = vmatpush1.bf16.msra.mxu0 %v9848_v45  ;;  %5106 = vmatpush3.bf16.msra.mxu1 %v9849_v52  ;;  %v5740_v58 = vunpack.i.l.bf16 %v5739_v28 }
 0x334   : > { %v1109_v35 = vsel %vm416_vm5, %v5720_v22, %v5725_v3  ;;  %v1110_v14 = vsel %vm416_vm5, %v5721_v13, %v5726_v30  ;;  %5111 = vmatprep.subr.bf16.mxu1 %v9839_v36  ;;  %v1097_v16 = vsel %vm416_vm5, %v5715_v63, %v5720_v22  ;;  %v1098_v40 = vsel %vm416_vm5, %v5716_v33, %v5721_v13  ;;  %v1304_v33 = vld [vmem:[%s9729_s2 + $0x98] sm:$0xff]  ;;  %v1305_v63 = vld [vmem:[%s9729_s2 + $0xa0] sm:$0xff]  ;;  %v1706_v22 = vld [vmem:[%s9729_s2 + $0xa8] sm:$0xff] }
 0x335   : > { %v5734_v54 = vpop.permute.xlu0 %5733  ;;  %v1116_v5 = vpack.c.bf16 %v1098_v40, %v1097_v16  ;;  %v1117_v49 = vpack.c.bf16 %v1110_v14, %v1109_v35  ;;  %v5741_v30 = vunpack.i.h.bf16 %v5739_v28  ;;  %v1707_v28 = vld [vmem:[%s9729_s2 + $0xb0] sm:$0xff]  ;;  %v1107_v9 = vsel %vm416_vm5, %v5740_v58, %v5730_v8 }
 0x336   : > { %v5736_v44 = vunpack.i.h.bf16 %v5734_v54  ;;  %v5735_v32 = vunpack.i.l.bf16 %v5734_v54  ;;  %v5749_v27 = vpop.permute.xlu1 %5748  ;;  %5108 = vmatmul.mubr.msk.bf16.vlgmr.msra.gmra.mrb[40].mxu1 %vm460_vm4, %v1126_v34  ;;  %4831 = vmatmul.mubr.msk.bf16.vlgmr.msra.gmra.mrb[20].mxu0 %vm460_vm4, %v1126_v34  ;;  %v1306_v52 = vpack.c.bf16 %v1305_v63, %v1304_v33  ;;  %v5711_v35 = vunpack.i.h.bf16 %v7441_v19 }
 0x337   : > { %1310 = vmatprep.subr.bf16.mxu0 %v1116_v5  ;;  %5112 = vmatpush3.bf16.msra.mxu1 %v1117_v49  ;;  %v5751_v57 = vunpack.i.h.bf16 %v5749_v27  ;;  %v5750_v37 = vunpack.i.l.bf16 %v5749_v27  ;;  %v1108_v24 = vsel %vm416_vm5, %v5741_v30, %v5731_v15  ;;  %v5710_v14 = vunpack.i.l.bf16 %v7441_v19 }
 0x338   : > { %1311 = vmatpush1.bf16.msra.mxu0 %v1115_v38  ;;  %5113 = vmatprep.subr.bf16.mxu1 %v9839_v36  ;;  %v1101_v3 = vsel %vm416_vm5, %v5730_v8, %v5735_v32  ;;  %v1102_v48 = vsel %vm416_vm5, %v5731_v15, %v5736_v44  ;;  %v1113_v25 = vsel %vm416_vm5, %v5735_v32, %v5740_v58 }
 0x339   : > { %v5744_v0 = vpop.permute.xlu0 %5743  ;;  %1312 = vmatprep.subr.bf16.mxu0 %v1119_v4  ;;  %5117 = vmatprep.mubr.msk.bf16.mxu1 %vm6594_vm2, %v9839_v36  ;;  %v1114_v34 = vsel %vm416_vm5, %v5736_v44, %v5741_v30  ;;  %v1122_v59 = vpack.c.bf16 %v1102_v48, %v1101_v3  ;;  %v7569_v20 = vpack.c.bf16 %v1707_v28, %v1706_v22  ;;  %v5706_v44 = vunpack.i.h.bf16 %v7473_v47 }
 0x33a   : > { %v5746_v21 = vunpack.i.h.bf16 %v5744_v0  ;;  %v5745_v23 = vunpack.i.l.bf16 %v5744_v0  ;;  %v5759_v13 = vpop.permute.xlu1 %5758  ;;  %1342 = vmatprep.mubr.bf16.mxu0 %v9844_v51  ;;  %v1123_v40 = vpack.c.bf16 %v1114_v34, %v1113_v25  ;;  %v1121_v8 = vpack.c.bf16 %v1108_v24, %v1107_v9 }
 0x33b   : > { %5114 = vmatpush3.bf16.msra.mxu1 %v1120_v11  ;;  %v5761_v11 = vunpack.i.h.bf16 %v5759_v13  ;;  %v5760_v3 = vunpack.i.l.bf16 %v5759_v13  ;;  %v1576_v25 = vsel %vm352_vm3, %v5705_v53, %v5710_v14  ;;  %v1577_v34 = vsel %vm352_vm3, %v5706_v44, %v5711_v35 }
 0x33c   : > { %1313 = vmatpush1.bf16.msra.mxu0 %v1118_v46  ;;  %5115 = vmatprep.subr.bf16.mxu1 %v9839_v36  ;;  %v1572_v56 = vsel %vm352_vm3, %v5745_v23, %v5750_v37  ;;  %v1573_v45 = vsel %vm352_vm3, %v5746_v21, %v5751_v57 }
 0x33d   : > { %v5754_v16 = vpop.permute.xlu0 %5753  ;;  %1314 = vmatprep.subr.bf16.mxu0 %v1122_v59  ;;  %v1591_v38 = vpack.c.bf16 %v1573_v45, %v1572_v56 }
 0x33e   : > { %v5756_v54 = vunpack.i.h.bf16 %v5754_v16  ;;  %v5755_v5 = vunpack.i.l.bf16 %v5754_v16  ;;  %v5774_v49 = vpop.permute.xlu1 %5773 }
 0x33f   : > { %v5776_v32 = vunpack.i.h.bf16 %v5774_v49  ;;  %v5775_v27 = vunpack.i.l.bf16 %v5774_v49  ;;  %5116 = vmatpush3.bf16.msra.mxu1 %v1123_v40 }
 0x340   : > { %v1581_v15 = vsel %vm352_vm3, %v5755_v5, %v5745_v23  ;;  %v1582_v30 = vsel %vm352_vm3, %v5756_v54, %v5746_v21  ;;  %1315 = vmatpush1.bf16.msra.mxu0 %v1121_v8  ;;  %v1563_v58 = vsel %vm352_vm3, %v5750_v37, %v5755_v5  ;;  %v1564_v4 = vsel %vm352_vm3, %v5751_v57, %v5756_v54 }
 0x341   : > { %1728 = vmatprep.subr.bf16.mxu0 %v1591_v38  ;;  %v5764_v47 = vpop.permute.xlu0 %5763  ;;  %v1592_v0 = vpack.c.bf16 %v1564_v4, %v1563_v58  ;;  %v1590_v46 = vpack.c.bf16 %v1582_v30, %v1581_v15  ;;  %v1583_v37 = vsel %vm352_vm3, %v5775_v27, %v5760_v3  ;;  %v1584_v57 = vsel %vm352_vm3, %v5776_v32, %v5761_v11 }
 0x342   : > { %v5766_v48 = vunpack.i.h.bf16 %v5764_v47  ;;  %v5765_v33 = vunpack.i.l.bf16 %v5764_v47  ;;  %5118 = vmatmul.mubr.msk.bf16.vlgmr.msra.gmra.mrb[44].mxu1 %vm460_vm4, %v1306_v52  ;;  %v5779_v63 = vpop.permute.xlu1 %5778  ;;  %v1597_v54 = vpack.c.bf16 %v1577_v34, %v1576_v25 }
 0x343   : > { %4833 = vmatmul.mubr.msk.bf16.vlgmr.msra.gmra.mrb[20].mxu0 %vm460_vm4, %v1306_v52  ;;  %5121 = vmatprep.subr.bf16.mxu1 %v1592_v0  ;;  %v1593_v52 = vpack.c.bf16 %v1584_v57, %v1583_v37 }
 0x344   : > { %1729 = vmatpush1.bf16.msra.mxu0 %v1590_v46  ;;  %5122 = vmatpush3.bf16.msra.mxu1 %v1592_v0  ;;  %v1574_v21 = vsel %vm352_vm3, %v5760_v3, %v5765_v33  ;;  %v1575_v23 = vsel %vm352_vm3, %v5761_v11, %v5766_v48  ;;  %v1565_v13 = vsel %vm352_vm3, %v5765_v33, %v5775_v27  ;;  %v5780_v27 = vunpack.i.l.bf16 %v5779_v63 }
 0x345   : > { %v5769_v22 = vpop.permute.xlu0 %5768  ;;  %v1594_v28 = vpack.c.bf16 %v1575_v23, %v1574_v21  ;;  %v1566_v9 = vsel %vm352_vm3, %v5766_v48, %v5776_v32  ;;  %1760 = vmatprep.mubr.bf16.mxu0 %v9844_v51  ;;  %5131 = vmatprep.mubr.msk.bf16.mxu1 %vm1711_vm6, %v7569_v20  ;;  %v5781_v32 = vunpack.i.h.bf16 %v5779_v63 }
 0x346   : > { %v5771_v24 = vunpack.i.h.bf16 %v5769_v22  ;;  %v5770_v59 = vunpack.i.l.bf16 %v5769_v22  ;;  %v5789_v56 = vpop.permute.xlu1 %5788  ;;  %v1595_v45 = vpack.c.bf16 %v1566_v9, %v1565_v13  ;;  %v1708_v9 = vld [vmem:[%s9729_s2 + $0xb8] sm:$0xff] }
 0x347   : > { %v5791_v16 = vunpack.i.h.bf16 %v5789_v56  ;;  %v5790_v40 = vunpack.i.l.bf16 %v5789_v56  ;;  %1730 = vmatprep.subr.bf16.mxu0 %v1594_v28 }
 0x348   : > { %v1586_v5 = vsel %vm352_vm3, %v5771_v24, %v5706_v44  ;;  %v1585_v49 = vsel %vm352_vm3, %v5770_v59, %v5705_v53  ;;  %5123 = vmatprep.subr.bf16.mxu1 %v1595_v45  ;;  %1731 = vmatpush1.bf16.msra.mxu0 %v1593_v52  ;;  %v1567_v8 = vsel %vm352_vm3, %v5710_v14, %v5770_v59  ;;  %v1701_v52 = vld [vmem:[%s9729_s2 + $0xc0] sm:$0xff] }
 0x349   : > { %5124 = vmatpush3.bf16.msra.mxu1 %v1595_v45  ;;  %v5784_v38 = vpop.permute.xlu0 %5783  ;;  %1732 = vmatprep.subr.bf16.mxu0 %v1597_v54  ;;  %v1568_v15 = vsel %vm352_vm3, %v5711_v35, %v5771_v24  ;;  %v1596_v53 = vpack.c.bf16 %v1586_v5, %v1585_v49  ;;  %v1587_v11 = vsel %vm352_vm3, %v5790_v40, %v5780_v27 }
 0x34a   : > { %v5786_v30 = vunpack.i.h.bf16 %v5784_v38  ;;  %v5785_v44 = vunpack.i.l.bf16 %v5784_v38  ;;  %v1562_v58 = vpop.permute.xlu1 %1561  ;;  %v1598_v4 = vpack.c.bf16 %v1568_v15, %v1567_v8  ;;  %v1588_v14 = vsel %vm352_vm3, %v5791_v16, %v5781_v32  ;;  %v9854_v38 = vld [vmem:[#allocation34_spill] sm:$0xff] }
 0x34b   : > { %v1599_v37 = vpack.c.bf16 %v1588_v14, %v1587_v11  ;;  %v1710_v45 = vpack.c.bf16 %v1708_v9, %v1708_v9  ;;  %v9850_v54 = vpack.c.bf16 %v7265_v18, %v7261_v50  ;;  %v1498_v5 = vpack.c.bf16 %v7122_v26, %v7348_v17 }
 0x34c   : > { %5125 = vmatprep.subr.bf16.mxu1 %v1598_v4  ;;  %1733 = vmatpush1.bf16.msra.mxu0 %v1596_v53  ;;  %v1578_v3 = vsel %vm352_vm3, %v5780_v27, %v5785_v44  ;;  %v1579_v19 = vsel %vm352_vm3, %v5781_v32, %v5786_v30  ;;  %v1569_v35 = vsel %vm352_vm3, %v5785_v44, %v5790_v40  ;;  %v1703_v27 = vld [vmem:[%s9729_s2 + $0xd0] sm:$0xff]  ;;  %v9857_v44 = vld [vmem:[#allocation37_spill] sm:$0xff] }
 0x34d   : > { %5126 = vmatpush3.bf16.msra.mxu1 %v1598_v4  ;;  %v5794_v47 = vpop.permute.xlu0 %5793  ;;  %v1600_v0 = vpack.c.bf16 %v1579_v19, %v1578_v3  ;;  %v1570_v46 = vsel %vm352_vm3, %v5786_v30, %v5791_v16  ;;  %v1702_v16 = vld [vmem:[%s9729_s2 + $0xc8] sm:$0xff]  ;;  %v9851_v8 = vpack.c.bf16 %v7269_v31, %v7257_v2  ;;  %v1499_v50 = vpack.c.bf16 %v7119_v42, %v7339_v12  ;;  %v9856_v30 = vld [vmem:[#allocation36_spill] sm:$0xff] }
 0x34e   : > { %v5796_v48 = vunpack.i.h.bf16 %v5794_v47  ;;  %v5795_v33 = vunpack.i.l.bf16 %v5794_v47  ;;  %v7626_v63 = vpop.permute.xlu1 %5803  ;;  %v1601_v25 = vpack.c.bf16 %v1570_v46, %v1569_v35  ;;  %v7661_v49 = vpack.c.bf16 %v1702_v16, %v1701_v52  ;;  %v9858_v19 = vld [vmem:[#allocation35_spill] sm:$0xff]  ;;  %v9859_v35 = vld [vmem:[#allocation33_spill] sm:$0xff] }
 0x34f   : > { %1734 = vmatprep.subr.bf16.mxu0 %v1600_v0  ;;  %v1497_v26 = vpack.c.bf16 %v7099_v62, %v7329_v55  ;;  %v9852_v42 = vpack.c.bf16 %v7133_v39, %v7113_v6  ;;  %v1506_v55 = vpack.c.bf16 %v7369_v29, %v7369_v29  ;;  %v5806_v17 = vunpack.i.h.bf16 %v7626_v63 }
 0x350   : > { %5127 = vmatprep.subr.bf16.mxu1 %v1601_v25  ;;  %1735 = vmatpush1.bf16.msra.mxu0 %v1599_v37  ;;  %v1580_v57 = vsel %vm352_vm3, %v5795_v33, %v5796_v48  ;;  %v1571_v34 = vsel %vm352_vm3, %v5796_v48, %v1562_v58  ;;  %v1589_v21 = vsel %vm352_vm3, %v1562_v58, %v5795_v33  ;;  %v5805_v6 = vunpack.i.l.bf16 %v7626_v63 }
 0x351   : > { %5128 = vmatpush3.bf16.msra.mxu1 %v1601_v25  ;;  %v7634_v23 = vpop.permute.xlu0 %5798  ;;  %v1603_v13 = vpack.c.bf16 %v1580_v57, %v1580_v57  ;;  %v1604_v22 = vpack.c.bf16 %v1571_v34, %v1571_v34  ;;  %v1602_v28 = vpack.c.bf16 %v1589_v21, %v1589_v21  ;;  %v9855_v15 = vpack.c.bf16 %v7306_v61, %v9854_v38 }
 0x352   : > { %v7639_v24 = vpop.permute.xlu1 %5813  ;;  %v5801_v31 = vunpack.i.h.bf16 %v7634_v23  ;;  %v5800_v12 = vunpack.i.l.bf16 %v7634_v23  ;;  %v1834_v11 = vsel %vm1718_vm7, %v1506_v55, 0  ;;  %v7716_v14 = vpack.c.bf16 %v1703_v27, %v1703_v27 }
 0x353   : > { %4835 = vmatprep.subr.msk.bf16.mxu0 %vm1718_vm7, %v1603_v13  ;;  %5425 = vmatprep.subr.msk.bf16.mxu1 %vm1718_vm7, %v1604_v22  ;;  %v1720_v59 = vsel %vm1718_vm7, %v1602_v28, 0  ;;  %v1726_v56 = vsel %vm1718_vm7, %v1604_v22, 0  ;;  %v5816_v61 = vunpack.i.h.bf16 %v7639_v24  ;;  %v5815_v3 = vunpack.i.l.bf16 %v7639_v24 }
 0x354   : > { %1737 = vmatpush1.bf16.msra.mxu0 %v1720_v59  ;;  %v1659_v58 = vsel %vm416_vm5, %v5800_v12, %v5805_v6  ;;  %v1660_v4 = vsel %vm416_vm5, %v5801_v31, %v5806_v17  ;;  %v9860_v47 = vpack.c.bf16 %v9858_v19, %v9859_v35  ;;  %v1941_v59 = vld [vmem:[%s9729_s2 + $0xd8] sm:$0xff] }
 0x355   : > { %5130 = vmatpush3.bf16.msra.mxu1 %v1726_v56  ;;  %v7651_v40 = vpop.permute.xlu0 %5808  ;;  %1842 = vmatprep.subr.bf16.mxu0 %v9850_v54  ;;  %v1687_v37 = vpack.c.bf16 %v1660_v4, %v1659_v58  ;;  %v1942_v56 = vld [vmem:[%s9729_s2 + $0xe0] sm:$0xff] }
 0x356   : > { %5135 = vmatprep.subr.bf16.mxu1 %v7280_v7  ;;  %v7669_v18 = vpop.permute.xlu1 %5823  ;;  %v5811_v39 = vunpack.i.h.bf16 %v7651_v40 }
 0x357   : > { %4836 = vmatmul.mubr.msk.bf16.vlgmr.msra.gmra.mrb[24].mxu0 %vm1711_vm6, %v7569_v20  ;;  %v9853_v20 = vpack.c.bf16 %v7125_v43, %v7094_v60  ;;  %v1507_v60 = vpack.c.bf16 %v9857_v44, %v9857_v44  ;;  %v5826_v48 = vunpack.i.h.bf16 %v7669_v18  ;;  %v5825_v34 = vunpack.i.l.bf16 %v7669_v18 }
 0x358   : > { %5132 = vmatmul.mubr.msk.bf16.vlgmr.msra.gmra.mrb[48].mxu1 %vm1711_vm6, %v1710_v45  ;;  %1843 = vmatpush1.bf16.msra.mxu0 %v9851_v8  ;;  %v1678_v46 = vsel %vm416_vm5, %v5806_v17, %v5811_v39  ;;  %v1669_v13 = vsel %vm416_vm5, %v5811_v39, %v5801_v31 }
 0x359   : > { %5136 = vmatpush3.bf16.msra.mxu1 %v7280_v7  ;;  %v7672_v32 = vpop.permute.xlu0 %5818  ;;  %1844 = vmatprep.subr.bf16.mxu0 %v1498_v5  ;;  %v1508_v7 = vpack.c.bf16 %v7374_v1, %v7374_v1  ;;  %v5810_v1 = vunpack.i.l.bf16 %v7651_v40 }
 0x35a   : > { %5137 = vmatprep.subr.bf16.mxu1 %v1499_v50  ;;  %1770 = vmatprep.mubr.bf16.mxu0 %v9844_v51  ;;  %v5829_v62 = vpop.permute.xlu1 %5828  ;;  %v5821_v21 = vunpack.i.h.bf16 %v7672_v32  ;;  %v5820_v23 = vunpack.i.l.bf16 %v7672_v32 }
 0x35b   : > { %5145 = vmatprep.mubr.msk.bf16.mxu1 %vm1711_vm6, %v7661_v49  ;;  %v1840_v43 = vsel %vm1718_vm7, %v1508_v7, 0  ;;  %v1677_v0 = vsel %vm416_vm5, %v5805_v6, %v5810_v1  ;;  %v5831_v33 = vunpack.i.h.bf16 %v5829_v62  ;;  %v5830_v63 = vunpack.i.l.bf16 %v5829_v62 }
 0x35c   : > { %1845 = vmatpush1.bf16.msra.mxu0 %v1497_v26  ;;  %v1668_v57 = vsel %vm416_vm5, %v5810_v1, %v5800_v12  ;;  %v1688_v28 = vpack.c.bf16 %v1678_v46, %v1677_v0  ;;  %v1663_v5 = vsel %vm416_vm5, %v5820_v23, %v5825_v34  ;;  %v1664_v8 = vsel %vm416_vm5, %v5821_v21, %v5826_v48 }
 0x35d   : > { %5138 = vmatpush3.bf16.msra.mxu1 %v1499_v50  ;;  %v5834_v2 = vpop.permute.xlu0 %5833  ;;  %1846 = vmatprep.subr.bf16.mxu0 %v9852_v42  ;;  %v1686_v54 = vpack.c.bf16 %v1669_v13, %v1668_v57  ;;  %v7760_v50 = vpack.c.bf16 %v1942_v56, %v1941_v59  ;;  %v1671_v18 = vsel %vm416_vm5, %v5816_v61, %v5831_v33 }
 0x35e   : > { %5139 = vmatprep.subr.bf16.mxu1 %v7130_v41  ;;  %v5835_v53 = vunpack.i.l.bf16 %v5834_v2  ;;  %v7728_v25 = vpop.permute.xlu1 %5843  ;;  %v1670_v32 = vsel %vm416_vm5, %v5815_v3, %v5830_v63  ;;  %v1693_v17 = vpack.c.bf16 %v1664_v8, %v1663_v5 }
 0x35f   : > { %4837 = vmatmul.mubr.msk.bf16.gmra.mrb[28].mxu0 %vm1711_vm6, %v1710_v45  ;;  %v5845_v6 = vunpack.i.l.bf16 %v7728_v25  ;;  %v1689_v1 = vpack.c.bf16 %v1671_v18, %v1670_v32 }
 0x360   : > { %1847 = vmatpush1.bf16.msra.mxu0 %v9853_v20  ;;  %1874 = vmatprep.mubr.bf16.mxu0 %v9844_v51  ;;  %v1661_v9 = vsel %vm416_vm5, %v5830_v63, %v5835_v53  ;;  %v1679_v16 = vsel %vm416_vm5, %v5835_v53, %v5815_v3 }
 0x361   : > { %5140 = vmatpush3.bf16.msra.mxu1 %v7130_v41  ;;  %v7702_v29 = vpop.permute.xlu0 %5838  ;;  %1848 = vmatprep.subr.bf16.mxu0 %v9855_v15  ;;  %v5836_v41 = vunpack.i.h.bf16 %v5834_v2 }
 0x362   : > { %5141 = vmatprep.subr.bf16.mxu1 %v9856_v30  ;;  %v5841_v45 = vunpack.i.h.bf16 %v7702_v29  ;;  %v5840_v52 = vunpack.i.l.bf16 %v7702_v29  ;;  %v5854_v26 = vpop.permute.xlu1 %5853 }
 0x363   : > { %v1662_v24 = vsel %vm416_vm5, %v5831_v33, %v5836_v41  ;;  %v1680_v40 = vsel %vm416_vm5, %v5836_v41, %v5816_v61  ;;  %v5856_v39 = vunpack.i.h.bf16 %v5854_v26  ;;  %v5855_v29 = vunpack.i.l.bf16 %v5854_v26  ;;  %v1943_v33 = vld [vmem:[%s9729_s2 + $0xe8] sm:$0xff] }
 0x364   : > { %1849 = vmatpush1.bf16.msra.mxu0 %v9860_v47  ;;  %v1690_v2 = vpack.c.bf16 %v1662_v24, %v1661_v9  ;;  %v1691_v42 = vpack.c.bf16 %v1680_v40, %v1679_v16  ;;  %v1681_v12 = vsel %vm416_vm5, %v5825_v34, %v5840_v52  ;;  %v1682_v62 = vsel %vm416_vm5, %v5826_v48, %v5841_v45 }
 0x365   : > { %5142 = vmatpush3.bf16.msra.mxu1 %v9856_v30  ;;  %4840 = vmatprep.subr.msk.bf16.mxu0 %vm1718_vm7, %v1507_v60  ;;  %v5849_v22 = vpop.permute.xlu0 %5848  ;;  %v1672_v20 = vsel %vm416_vm5, %v5840_v52, %v5820_v23  ;;  %v1673_v27 = vsel %vm416_vm5, %v5841_v45, %v5821_v21  ;;  %v1694_v38 = vpack.c.bf16 %v1682_v62, %v1681_v12 }
 0x366   : > { %5426 = vmatprep.subr.msk.bf16.mxu1 %vm1718_vm7, %v1508_v7  ;;  %v5851_v7 = vunpack.i.h.bf16 %v5849_v22  ;;  %v5850_v31 = vunpack.i.l.bf16 %v5849_v22  ;;  %v1692_v4 = vpack.c.bf16 %v1673_v27, %v1672_v20  ;;  %v1674_v41 = vsel %vm416_vm5, %v5855_v29, %v5845_v6 }
 0x368   : > { %1851 = vmatpush1.bf16.msra.mxu0 %v1834_v11  ;;  %v1665_v44 = vsel %vm416_vm5, %v5845_v6, %v5850_v31  ;;  %v1684_v58 = vsel %vm416_vm5, %v5851_v7, %v5856_v39  ;;  %v1658_v11 = vpop.permute.xlu1 %1657 }
 0x369   : > { %5144 = vmatpush3.bf16.msra.mxu1 %v1840_v43  ;;  %1961 = vmatprep.subr.bf16.mxu0 %v1687_v37  ;;  %v5859_v55 = vpop.permute.xlu0 %5858  ;;  %v1683_v43 = vsel %vm416_vm5, %v5850_v31, %v5855_v29  ;;  %v1945_v37 = vpack.c.bf16 %v1943_v33, %v1943_v33 }
 0x36a   : > { %5149 = vmatprep.subr.bf16.mxu1 %v1688_v28  ;;  %v5861_v15 = vunpack.i.h.bf16 %v5859_v55  ;;  %v5860_v30 = vunpack.i.l.bf16 %v5859_v55  ;;  %v1697_v3 = vpack.c.bf16 %v1684_v58, %v1683_v43 }
 0x36b   : > { %4841 = vmatmul.mubr.msk.bf16.vlgmr.msra.gmra.mrb[24].mxu0 %vm1711_vm6, %v7661_v49  ;;  %v5846_v49 = vunpack.i.h.bf16 %v7728_v25 }
 0x36c   : > { %5146 = vmatmul.mubr.msk.bf16.vlgmr.msra.gmra.mrb[52].mxu1 %vm1711_vm6, %v7716_v14  ;;  %1962 = vmatpush1.bf16.msra.mxu0 %v1686_v54  ;;  %v1667_v19 = vsel %vm416_vm5, %v5861_v15, %v1658_v11  ;;  %v1676_v35 = vsel %vm416_vm5, %v5860_v30, %v5861_v15  ;;  %v1685_v47 = vsel %vm416_vm5, %v1658_v11, %v5860_v30 }
 0x36d   : > { %5150 = vmatpush3.bf16.msra.mxu1 %v1688_v28  ;;  %1963 = vmatprep.subr.bf16.mxu0 %v1690_v2  ;;  %v1666_v60 = vsel %vm416_vm5, %v5846_v49, %v5851_v7  ;;  %v1675_v53 = vsel %vm416_vm5, %v5856_v39, %v5846_v49  ;;  %v1699_v46 = vpack.c.bf16 %v1667_v19, %v1667_v19 }
 0x36e   : > { %5151 = vmatprep.subr.bf16.mxu1 %v1691_v42  ;;  %1884 = vmatprep.mubr.bf16.mxu0 %v9844_v51  ;;  %v1696_v61 = vpack.c.bf16 %v1666_v60, %v1665_v44  ;;  %v1695_v0 = vpack.c.bf16 %v1675_v53, %v1674_v41  ;;  %v1700_v48 = vpack.c.bf16 %v1685_v47, %v1685_v47 }
 0x36f   : > { %5159 = vmatprep.mubr.msk.bf16.mxu1 %vm1711_vm6, %v7760_v50 }
 0x370   : > { %1964 = vmatpush1.bf16.msra.mxu0 %v1689_v1  ;;  %v1959_v25 = vsel %vm1718_vm7, %v1700_v48, 0 }
 0x371   : > { %5152 = vmatpush3.bf16.msra.mxu1 %v1691_v42  ;;  %1965 = vmatprep.subr.bf16.mxu0 %v1693_v17 }
 0x372   : > { %5153 = vmatprep.subr.bf16.mxu1 %v1694_v38 }
 0x373   : > { %4842 = vmatmul.mubr.msk.bf16.gmra.mrb[32].mxu0 %vm1711_vm6, %v7716_v14  ;;  %v1698_v14 = vpack.c.bf16 %v1676_v35, %v1676_v35 }
 0x374   : > { %1966 = vmatpush1.bf16.msra.mxu0 %v1692_v4  ;;  %1993 = vmatprep.mubr.bf16.mxu0 %v9844_v51 }
 0x375   : > { %5154 = vmatpush3.bf16.msra.mxu1 %v1694_v38  ;;  %1967 = vmatprep.subr.bf16.mxu0 %v1696_v61  ;;  %v1953_v63 = vsel %vm1718_vm7, %v1698_v14, 0 }
 0x376   : > { %5155 = vmatprep.subr.bf16.mxu1 %v1697_v3 }
 0x377   : > { %v2080_v43 = vpop.permute.xlu1 %2079 }
 0x378   : > { %1968 = vmatpush1.bf16.msra.mxu0 %v1695_v0 }
 0x379   : > { %5156 = vmatpush3.bf16.msra.mxu1 %v1697_v3  ;;  %4845 = vmatprep.subr.msk.bf16.mxu0 %vm1718_vm7, %v1699_v46 }
 0x37a   : > { %5427 = vmatprep.subr.msk.bf16.mxu1 %vm1718_vm7, %v1700_v48  ;;  %v2075_v60 = vpop.permute.xlu0 %2074 }
 0x37c   : > { %1970 = vmatpush1.bf16.msra.mxu0 %v1953_v63 }
 0x37d   : > { %5158 = vmatpush3.bf16.msra.mxu1 %v1959_v25 }
 0x37e   : > { %5163 = vmatprep.subr.bf16.mxu1 %v9839_v36  ;;  %v2085_v58 = vpop.permute.xlu0 %2084 }
 0x37f   : > { %4846 = vmatmul.mubr.msk.bf16.vlgmr.msra.gmra.mrb[24].mxu0 %vm1711_vm6, %v7760_v50 }
 0x380   : > { %5160 = vmatmul.mubr.msk.bf16.vlgmr.msra.gmra.mrb[56].mxu1 %vm1711_vm6, %v1945_v37  ;;  %2003 = vmatprep.mubr.bf16.mxu0 %v9844_v51 }
 0x381   : > { %5173 = vmatprep.mubr.msk.bf16.mxu1 %vm6594_vm2, %v9839_v36 }
 0x387   : > { %4847 = vmatmul.mubr.msk.bf16.gmra.mrb[36].mxu0 %vm1711_vm6, %v1945_v37 }
 0x388   : > { %2425 = vmatprep.mubr.bf16.mxu0 %v9844_v51 }
 0x3fd   : > { %v1210_v57 = vpop.f32.mrb[36].mxu1 }
 0x3fe   : > { %v5099_v34 = vpop.f32.mrb[37].mxu1 }
 0x3ff   : > { %v1213_v21 = vpop.f32.mrb[38].mxu1 }
 0x400   : > { %v5100_v23 = vpop.f32.mrb[39].mxu1 }
 0x401   : > { %v9867_v23 = vld [vmem:[#allocation31_spill] sm:$0xff] }
 0x409   : > { %v1297_v13 = vpop.f32.mrb[40].mxu1 }
 0x40a   : > { %v1298_v22 = vadd.f32 %v1297_v13, %v1210_v57  ;;  %v5109_v28 = vpop.f32.mrb[41].mxu1 }
 0x40b   : > { %v1300_v9 = vpop.f32.mrb[42].mxu1 }
 0x40c   : > { %v1301_v24 = vadd.f32 %v1300_v9, %v1213_v21  ;;  %v5110_v59 = vpop.f32.mrb[43].mxu1 }
 0x415   : > { %v1387_v56 = vpop.f32.mrb[44].mxu1 }
 0x416   : > { %v7820_v45 = vadd.f32 %v1387_v56, %v1298_v22  ;;  %v7822_v52 = vpop.f32.mrb[20].mxu0  ;;  %v5119_v16 = vpop.f32.mrb[45].mxu1  ;;  %v9868_v56 = vld [vmem:[#allocation32_spill] sm:$0xff] }
 0x417   : > { %9862 = vst [vmem:[#allocation36_spill] sm:$0xff] %v7822_v52  ;;  %v7824_v40 = vpop.f32.mrb[21].mxu0  ;;  %v1390_v54 = vpop.f32.mrb[46].mxu1 }
 0x418   : > { %9861 = vst [vmem:[#allocation34_spill] sm:$0xff] %v7820_v45  ;;  %9863 = vst [vmem:[#allocation37_spill] sm:$0xff] %v7824_v40  ;;  %v7826_v5 = vadd.f32 %v1390_v54, %v1301_v24  ;;  %v7828_v8 = vpop.f32.mrb[22].mxu0  ;;  %v5120_v50 = vpop.f32.mrb[47].mxu1 }
 0x419   : > { %9865 = vst [vmem:[#allocation33_spill] sm:$0xff] %v7828_v8  ;;  %v7830_v18 = vpop.f32.mrb[23].mxu0 }
 0x41a   : > { %9864 = vst [vmem:[#allocation35_spill] sm:$0xff] %v7826_v5  ;;  %9866 = vst [vmem:[#allocation38_spill] sm:$0xff] %v7830_v18 }
 0x42b   : > { %v5133_v32 = vpop.f32.mrb[48].mxu1 }
 0x42c   : > { %v1813_v26 = vpop.f32.mrb[49].mxu1 }
 0x42d   : > { %v5134_v2 = vpop.f32.mrb[50].mxu1 }
 0x42e   : > { %v1816_v42 = vpop.f32.mrb[51].mxu1 }
 0x432   : > { %v1772_v7 = vpop.f32.mrb[28].mxu0 }
 0x433   : > { %v1774_v31 = vpop.f32.mrb[29].mxu0 }
 0x434   : > { %v1776_v12 = vpop.f32.mrb[30].mxu0 }
 0x435   : > { %v1777_v62 = vpop.f32.mrb[31].mxu0 }
 0x436   : > { %v9869_v62 = vld [vmem:[#allocation30_spill] sm:$0xff] }
 0x43f   : > { %v5147_v55 = vpop.f32.mrb[52].mxu1 }
 0x440   : > { %v1936_v17 = vadd.f32 %v5147_v55, %v5133_v32  ;;  %v1927_v49 = vpop.f32.mrb[53].mxu1 }
 0x441   : > { %v1928_v6 = vadd.f32 %v1927_v49, %v1813_v26  ;;  %v5148_v39 = vpop.f32.mrb[54].mxu1 }
 0x442   : > { %v1930_v1 = vpop.f32.mrb[55].mxu1 }
 0x443   : > { %v1931_v20 = vadd.f32 %v1930_v1, %v1816_v42 }
 0x446   : > { %v1886_v27 = vpop.f32.mrb[32].mxu0 }
 0x447   : > { %v1887_v29 = vadd.f32 %v1886_v27, %v1772_v7  ;;  %v1888_v38 = vpop.f32.mrb[33].mxu0 }
 0x448   : > { %v1889_v15 = vadd.f32 %v1888_v38, %v1774_v31  ;;  %v1890_v30 = vpop.f32.mrb[34].mxu0 }
 0x449   : > { %v1891_v44 = vpop.f32.mrb[35].mxu0 }
 0x452   : > { %v1995_v4 = vpop.f32.mrb[24].mxu0 }
 0x453   : > { %v2087_v41 = vadd.f32 %v2075_v60, %v1995_v4  ;;  %v5161_v53 = vpop.f32.mrb[56].mxu1  ;;  %v1997_v11 = vpop.f32.mrb[25].mxu0 }
 0x454   : > { %v2068_v61 = vadd.f32 %v5161_v53, %v1936_v17  ;;  %v2088_v3 = vadd.f32 %v2075_v60, %v1997_v11  ;;  %v2046_v19 = vpop.f32.mrb[57].mxu1  ;;  %v1999_v35 = vpop.f32.mrb[26].mxu0 }
 0x455   : > { %v2096_v47 = vmax.f32 %v2087_v41, 0.0  ;;  %v2062_v0 = vadd.f32 %v2046_v19, %v1928_v6  ;;  %v2090_v46 = vadd.f32 %v2080_v43, %v1999_v35  ;;  %v5162_v14 = vpop.f32.mrb[58].mxu1  ;;  %v2001_v48 = vpop.f32.mrb[27].mxu0 }
 0x456   : > { %v2095_v33 = vadd.f32 %v2085_v58, %v2068_v61  ;;  %v2097_v63 = vmax.f32 %v2088_v3, 0.0  ;;  %v2091_v25 = vadd.f32 %v2080_v43, %v2001_v48  ;;  %v2049_v37 = vpop.f32.mrb[59].mxu1 }
 0x457   : > { %v2089_v57 = vadd.f32 %v2075_v60, %v2062_v0  ;;  %v2099_v34 = vmax.f32 %v2090_v46, 0.0  ;;  %v2065_v21 = vadd.f32 %v2049_v37, %v1931_v20  ;;  %v7833_v13 = vmul.f32 %v2096_v47, %v9867_v23 }
 0x458   : > { %v2100_v22 = vmax.f32 %v2091_v25, 0.0  ;;  %v2104_v28 = vmax.f32 %v2095_v33, 0.0  ;;  %v7839_v16 = vmul.f32 %v2097_v63, %v9868_v56 }
 0x459   : > { %v2098_v9 = vmax.f32 %v2089_v57, 0.0  ;;  %v7836_v24 = vmul.f32 %v2099_v34, %v9867_v23  ;;  %v2092_v59 = vadd.f32 %v2080_v43, %v2065_v21 }
 0x45a   : > { %v7842_v54 = vmul.f32 %v2100_v22, %v9868_v56  ;;  %v2005_v50 = vpop.f32.mrb[36].mxu0  ;;  %v7849_v55 = vmul.f32 %v2104_v28, %v9869_v62 }
 0x45b   : > { %v2101_v32 = vmax.f32 %v2092_v59, 0.0  ;;  %v2066_v26 = vadd.f32 %v2005_v50, %v1887_v29  ;;  %v2007_v2 = vpop.f32.mrb[37].mxu0  ;;  %v5862_v42 = vpack.i.bf16 %v7836_v24, %v7833_v13  ;;  %v7852_v17 = vmul.f32 %v2098_v9, %v9869_v62 }
 0x45c   : > { %v2067_v7 = vadd.f32 %v2007_v2, %v1889_v15  ;;  %v5867_v31 = vpack.i.bf16 %v7842_v54, %v7839_v16  ;;  %v2009_v12 = vpop.f32.mrb[38].mxu0 }
 0x45d   : > { %v7855_v49 = vmul.f32 %v2101_v32, %v9869_v62  ;;  %v2093_v6 = vadd.f32 %v2085_v58, %v2066_v26  ;;  %5863 = vrot.lane.b32.xlu1 %v5862_v42, %s6590_s27  ;;  %v2010_v39 = vpop.f32.mrb[39].mxu0 }
 0x45e   : > { %v2094_v1 = vadd.f32 %v2085_v58, %v2067_v7  ;;  %5868 = vrot.lane.b32.xlu0 %v5867_v31, %s6590_s27 }
 0x45f   : > { %v2102_v20 = vmax.f32 %v2093_v6, 0.0  ;;  %v5872_v27 = vpack.i.bf16 %v7855_v49, %v7852_v17  ;;  %v7863_v29 = vpack.i.bf16 %v7849_v55, %v7855_v49 }
 0x460   : > { %v2103_v38 = vmax.f32 %v2094_v1, 0.0 }
 0x461   : > { %v7868_v30 = vmul.f32 %v2102_v20, %v9867_v23  ;;  %5873 = vrot.lane.b32.xlu1 %v5872_v27, %s6590_s27 }
 0x462   : > { %v7872_v44 = vmul.f32 %v2103_v38, %v9868_v56 }
 0x463   : > { %v7876_v60 = vpack.i.bf16 %v7868_v30, %v7836_v24 }
 0x464   : > { %v5877_v58 = vpack.i.bf16 %v7872_v44, %v7868_v30  ;;  %v7884_v4 = vpack.i.bf16 %v7872_v44, %v7842_v54 }
 0x465   : > { %2130 = vrot.lane.b32.xlu1 %v7849_v55, %s6590_s27 }
 0x466   : > { %5878 = vrot.lane.b32.xlu0 %v5877_v58, %s6590_s27 }
 0x469   : > { %5888 = vrot.lane.b32.xlu1 %v5867_v31, %s6591_s28 }
 0x46a   : > { %5883 = vrot.lane.b32.xlu0 %v5862_v42, %s6591_s28 }
 0x46d   : > { %5898 = vrot.lane.b32.xlu1 %v5877_v58, %s6591_s28 }
 0x46e   : > { %5893 = vrot.lane.b32.xlu0 %v5872_v27, %s6591_s28 }
 0x471   : > { %5903 = vrot.lane.b32.xlu1 %v7876_v60, %s6592_s29 }
 0x472   : > { %2157 = vrot.lane.b32.xlu0 %v7849_v55, %s6591_s28 }
 0x476   : > { %5908 = vrot.lane.b32.xlu0 %v7884_v4, %s6592_s29 }
 0x4cf   : > { %v5864_v53 = vpop.permute.xlu1 %5863 }
 0x4d0   : > { %v5866_v11 = vunpack.i.h.bf16 %v5864_v53  ;;  %v5865_v61 = vunpack.i.l.bf16 %v5864_v53  ;;  %v5869_v3 = vpop.permute.xlu0 %5868 }
 0x4d1   : > { %v5871_v19 = vunpack.i.h.bf16 %v5869_v3  ;;  %v5870_v35 = vunpack.i.l.bf16 %v5869_v3 }
 0x4d3   : > { %v7903_v47 = vsel %vm281_vm0, %v5866_v11, %v5871_v19  ;;  %v7907_v0 = vsel %vm281_vm0, %v5865_v61, %v5870_v35  ;;  %v5874_v46 = vpop.permute.xlu1 %5873 }
 0x4d4   : > { %v5876_v14 = vunpack.i.h.bf16 %v5874_v46  ;;  %v5875_v48 = vunpack.i.l.bf16 %v5874_v46  ;;  %v5912_v33 = vpack.i.bf16 %v7903_v47, %v7907_v0 }
 0x4d6   : > { %v7915_v25 = vsel %vm281_vm0, %v5870_v35, %v5875_v48  ;;  %v7919_v37 = vsel %vm281_vm0, %v5871_v19, %v5876_v14  ;;  %v7923_v57 = vsel %vm281_vm0, %v5875_v48, %v5865_v61  ;;  %v7927_v34 = vsel %vm281_vm0, %v5876_v14, %v5866_v11  ;;  %5913 = vrot.lane.b32.xlu0 %v5912_v33, %s6592_s29 }
 0x4d7   : > { %v2131_v21 = vpop.permute.xlu1 %2130  ;;  %v5917_v22 = vpack.i.bf16 %v7927_v34, %v7923_v57  ;;  %v5922_v42 = vpack.i.bf16 %v7919_v37, %v7915_v25 }
 0x4d8   : > { %v5879_v28 = vpop.permute.xlu0 %5878 }
 0x4d9   : > { %v5881_v50 = vunpack.i.h.bf16 %v5879_v28  ;;  %v5880_v32 = vunpack.i.l.bf16 %v5879_v28  ;;  %5918 = vrot.lane.b32.xlu1 %v5917_v22, %s6592_s29 }
 0x4db   : > { %v7939_v26 = vsel %vm281_vm0, %v2131_v21, %v5880_v32  ;;  %v5889_v2 = vpop.permute.xlu1 %5888  ;;  %v7945_v7 = vsel %vm281_vm0, %v5880_v32, %v5881_v50  ;;  %v7951_v1 = vsel %vm281_vm0, %v5881_v50, %v2131_v21 }
 0x4dc   : > { %v5891_v31 = vunpack.i.h.bf16 %v5889_v2  ;;  %v5890_v12 = vunpack.i.l.bf16 %v5889_v2  ;;  %v5884_v6 = vpop.permute.xlu0 %5883  ;;  %v5927_v39 = vpack.i.bf16 %v7833_v13, %v7939_v26  ;;  %v5932_v53 = vpack.i.bf16 %v7839_v16, %v7945_v7 }
 0x4dd   : > { %v5886_v20 = vunpack.i.h.bf16 %v5884_v6  ;;  %v5885_v27 = vunpack.i.l.bf16 %v5884_v6  ;;  %5923 = vrot.lane.b32.xlu1 %v5922_v42, %s6592_s29  ;;  %v5942_v61 = vpack.i.bf16 %v7852_v17, %v7951_v1 }
 0x4de   : > { %5928 = vrot.lane.b32.xlu0 %v5927_v39, %s6592_s29 }
 0x4df   : > { %v7957_v38 = vsel %vm300_vm1, %v5886_v20, %v5891_v31  ;;  %v7961_v58 = vsel %vm300_vm1, %v5885_v27, %v5890_v12  ;;  %v5899_v46 = vpop.permute.xlu1 %5898 }
 0x4e0   : > { %v5894_v11 = vpop.permute.xlu0 %5893  ;;  %v5947_v50 = vpack.i.bf16 %v7957_v38, %v7961_v58  ;;  %v5901_v2 = vunpack.i.h.bf16 %v5899_v46 }
 0x4e1   : > { %v5896_v3 = vunpack.i.h.bf16 %v5894_v11  ;;  %v5895_v19 = vunpack.i.l.bf16 %v5894_v11  ;;  %5933 = vrot.lane.b32.xlu1 %v5932_v53, %s6592_s29 }
 0x4e2   : > { %5943 = vrot.lane.b32.xlu0 %v5942_v61, %s6592_s29 }
 0x4e3   : > { %v7973_v14 = vsel %vm300_vm1, %v5891_v31, %v5896_v3  ;;  %v7977_v48 = vsel %vm300_vm1, %v5890_v12, %v5895_v19  ;;  %v7981_v21 = vsel %vm300_vm1, %v5895_v19, %v5885_v27  ;;  %v7985_v28 = vsel %vm300_vm1, %v5896_v3, %v5886_v20 }
 0x4e4   : > { %v2158_v32 = vpop.permute.xlu0 %2157  ;;  %v5900_v31 = vunpack.i.l.bf16 %v5899_v46  ;;  %v5952_v6 = vpack.i.bf16 %v7973_v14, %v7977_v48  ;;  %v5957_v3 = vpack.i.bf16 %v7985_v28, %v7981_v21 }
 0x4e5   : > { %5938 = vrot.lane.b32.xlu1 %v7863_v29, %s6592_s29  ;;  %v8000_v27 = vsel %vm300_vm1, %v5901_v2, %v2158_v32 }
 0x4e6   : > { %5948 = vrot.lane.b32.xlu0 %v5947_v50, %s6592_s29  ;;  %v8004_v11 = vsel %vm300_vm1, %v2158_v32, %v5900_v31  ;;  %v8015_v46 = vsel %vm300_vm1, %v5900_v31, %v5901_v2 }
 0x4e7   : > { %v5962_v19 = vpack.i.bf16 %v8004_v11, %v8000_v27 }
 0x4e9   : > { %5953 = vrot.lane.b32.xlu1 %v5952_v6, %s6592_s29 }
 0x4ea   : > { %5958 = vrot.lane.b32.xlu0 %v5957_v3, %s6592_s29 }
 0x4ed   : > { %5963 = vrot.lane.b32.xlu1 %v5962_v19, %s6592_s29 }
 0x4ee   : > { %2199 = vrot.lane.b32.xlu0 %v8015_v46, %s6592_s29 }
 0x4f1   : > { %5968 = vrot.lane.b32.xlu1 %v5917_v22, %s6596_s30  ;;  %v5904_v22 = vpop.permute.xlu1 %5903 }
 0x4f2   : > { %5973 = vrot.lane.b32.xlu0 %v5912_v33, %s6596_s30  ;;  %v6027_v33 = vpack.i.bf16 %v8004_v11, %v8015_v46  ;;  %v5906_v15 = vunpack.i.h.bf16 %v5904_v22 }
 0x4f5   : > { %5978 = vrot.lane.b32.xlu1 %v5922_v42, %s6596_s30 }
 0x4f6   : > { %5983 = vrot.lane.b32.xlu0 %v5927_v39, %s6596_s30 }
 0x4f9   : > { %5988 = vrot.lane.b32.xlu1 %v7876_v60, %s6596_s30  ;;  %v2678_v60 = vld [vmem:[%s9730_s3 + $0x50] sm:$0xff] }
 0x4fa   : > { %5993 = vrot.lane.b32.xlu0 %v7884_v4, %s6596_s30  ;;  %v5909_v4 = vpop.permute.xlu0 %5908 }
 0x4fb   : > { %v5910_v20 = vunpack.i.l.bf16 %v5909_v4 }
 0x4fd   : > { %5998 = vrot.lane.b32.xlu1 %v5932_v53, %s6596_s30 }
 0x4fe   : > { %6008 = vrot.lane.b32.xlu0 %v5942_v61, %s6596_s30 }
 0x501   : > { %6003 = vrot.lane.b32.xlu1 %v7863_v29, %s6596_s30  ;;  %v2679_v29 = vld [vmem:[%s9730_s3 + $0x58] sm:$0xff] }
 0x502   : > { %6013 = vrot.lane.b32.xlu0 %v5947_v50, %s6596_s30 }
 0x505   : > { %6018 = vrot.lane.b32.xlu1 %v5952_v6, %s6596_s30 }
 0x506   : > { %6023 = vrot.lane.b32.xlu0 %v5957_v3, %s6596_s30 }
 0x509   : > { %6028 = vrot.lane.b32.xlu1 %v6027_v33, %s6596_s30 }
 0x50a   : > { %2313 = vrot.lane.b32.xlu0 %v8000_v27, %s6596_s30 }
 0x50d   : > { %2682 = vperm.xlu1 %5571, %v2678_v60  }
 0x50e   : > { %2687 = vperm.xlu0 %5570, %v2679_v29   ;;  %v5911_v29 = vunpack.i.h.bf16 %v5909_v4 }
 0x548   : > { %v5914_v42 = vpop.permute.xlu0 %5913 }
 0x549   : > { %v5916_v53 = vunpack.i.h.bf16 %v5914_v42  ;;  %v5915_v61 = vunpack.i.l.bf16 %v5914_v42 }
 0x54b   : > { %v5919_v39 = vpop.permute.xlu1 %5918 }
 0x54c   : > { %v5921_v50 = vunpack.i.h.bf16 %v5919_v39  ;;  %v5920_v32 = vunpack.i.l.bf16 %v5919_v39 }
 0x54e   : > { %v2246_v2 = vsel %vm352_vm3, %v5920_v32, %v5915_v61  ;;  %v2247_v31 = vsel %vm352_vm3, %v5921_v50, %v5916_v53 }
 0x54f   : > { %v5924_v6 = vpop.permute.xlu1 %5923  ;;  %v2265_v3 = vpack.c.bf16 %v2247_v31, %v2246_v2  ;;  %v5905_v2 = vunpack.i.l.bf16 %v5904_v22 }
 0x550   : > { %v5926_v19 = vunpack.i.h.bf16 %v5924_v6  ;;  %v5925_v33 = vunpack.i.l.bf16 %v5924_v6  ;;  %v5929_v60 = vpop.permute.xlu0 %5928 }
 0x551   : > { %2393 = vmatprep.subr.bf16.mxu0 %v2265_v3  ;;  %v5931_v41 = vunpack.i.h.bf16 %v5929_v60  ;;  %v5930_v4 = vunpack.i.l.bf16 %v5929_v60 }
 0x552   : > { %v2237_v35 = vsel %vm352_vm3, %v5915_v61, %v5925_v33  ;;  %v2238_v42 = vsel %vm352_vm3, %v5916_v53, %v5926_v19  ;;  %v2255_v39 = vsel %vm352_vm3, %v5925_v33, %v5920_v32  ;;  %v2256_v12 = vsel %vm352_vm3, %v5926_v19, %v5921_v50 }
 0x553   : > { %v5934_v31 = vpop.permute.xlu1 %5933  ;;  %v2264_v6 = vpack.c.bf16 %v2256_v12, %v2255_v39  ;;  %v2266_v43 = vpack.c.bf16 %v2238_v42, %v2237_v35  ;;  %v2250_v35 = vsel %vm352_vm3, %v5905_v2, %v5910_v20  ;;  %v2251_v12 = vsel %vm352_vm3, %v5906_v15, %v5911_v29 }
 0x554   : > { %v5936_v3 = vunpack.i.h.bf16 %v5934_v31  ;;  %v5935_v59 = vunpack.i.l.bf16 %v5934_v31  ;;  %v5944_v9 = vpop.permute.xlu0 %5943  ;;  %v2271_v5 = vpack.c.bf16 %v2251_v12, %v2250_v35 }
 0x555   : > { %v5946_v61 = vunpack.i.h.bf16 %v5944_v9  ;;  %v5945_v63 = vunpack.i.l.bf16 %v5944_v9  ;;  %2394 = vmatpush1.bf16.msra.mxu0 %v2264_v6  ;;  %5164 = vmatpush3.bf16.msra.mxu1 %v2266_v43 }
 0x556   : > { %v2248_v53 = vsel %vm352_vm3, %v5930_v4, %v5935_v59  ;;  %v2249_v50 = vsel %vm352_vm3, %v5931_v41, %v5936_v3  ;;  %5165 = vmatprep.subr.bf16.mxu1 %v9839_v36 }
 0x557   : > { %v2239_v22 = vsel %vm352_vm3, %v5935_v59, %v5945_v63  ;;  %v2240_v43 = vsel %vm352_vm3, %v5936_v3, %v5946_v61  ;;  %v2257_v9 = vsel %vm352_vm3, %v5945_v63, %v5930_v4  ;;  %v2258_v32 = vsel %vm352_vm3, %v5946_v61, %v5931_v41  ;;  %v5939_v19 = vpop.permute.xlu1 %5938 }
 0x558   : > { %v5941_v33 = vunpack.i.h.bf16 %v5939_v19  ;;  %v5940_v60 = vunpack.i.l.bf16 %v5939_v19  ;;  %v5949_v42 = vpop.permute.xlu0 %5948  ;;  %v2268_v39 = vpack.c.bf16 %v2249_v50, %v2248_v53  ;;  %v2267_v31 = vpack.c.bf16 %v2258_v32, %v2257_v9 }
 0x559   : > { %v2269_v6 = vpack.c.bf16 %v2240_v43, %v2239_v22  ;;  %v5951_v4 = vunpack.i.h.bf16 %v5949_v42  ;;  %v5950_v50 = vunpack.i.l.bf16 %v5949_v42 }
 0x55a   : > { %v2242_v59 = vsel %vm352_vm3, %v5911_v29, %v5941_v33  ;;  %v2260_v3 = vsel %vm352_vm3, %v5941_v33, %v5906_v15  ;;  %v2241_v63 = vsel %vm352_vm3, %v5910_v20, %v5940_v60  ;;  %v2259_v41 = vsel %vm352_vm3, %v5940_v60, %v5905_v2  ;;  %2395 = vmatprep.subr.bf16.mxu0 %v2268_v39 }
 0x55b   : > { %2396 = vmatpush1.bf16.msra.mxu0 %v2267_v31  ;;  %5166 = vmatpush3.bf16.msra.mxu1 %v2269_v6  ;;  %v5954_v61 = vpop.permute.xlu1 %5953  ;;  %v2270_v53 = vpack.c.bf16 %v2260_v3, %v2259_v41  ;;  %v2272_v15 = vpack.c.bf16 %v2242_v59, %v2241_v63 }
 0x55c   : > { %v5956_v35 = vunpack.i.h.bf16 %v5954_v61  ;;  %v5955_v12 = vunpack.i.l.bf16 %v5954_v61  ;;  %2397 = vmatprep.subr.bf16.mxu0 %v2271_v5  ;;  %v5959_v29 = vpop.permute.xlu0 %5958  ;;  %5167 = vmatprep.subr.bf16.mxu1 %v9839_v36 }
 0x55d   : > { %v5961_v22 = vunpack.i.h.bf16 %v5959_v29  ;;  %v5960_v43 = vunpack.i.l.bf16 %v5959_v29 }
 0x55e   : > { %v2252_v20 = vsel %vm352_vm3, %v5950_v50, %v5955_v12  ;;  %v2253_v2 = vsel %vm352_vm3, %v5951_v4, %v5956_v35 }
 0x55f   : > { %v2243_v9 = vsel %vm352_vm3, %v5955_v12, %v5960_v43  ;;  %v2244_v32 = vsel %vm352_vm3, %v5956_v35, %v5961_v22  ;;  %v2261_v5 = vsel %vm352_vm3, %v5960_v43, %v5950_v50  ;;  %v2262_v19 = vsel %vm352_vm3, %v5961_v22, %v5951_v4  ;;  %2398 = vmatpush1.bf16.msra.mxu0 %v2270_v53  ;;  %v5964_v33 = vpop.permute.xlu1 %5963  ;;  %v2378_v35 = vld [vmem:[%s9729_s2 + $0xf0] sm:$0xff]  ;;  %v2379_v12 = vld [vmem:[%s9729_s2 + $0xf8] sm:$0xff] }
 0x560   : > { %5168 = vmatpush3.bf16.msra.mxu1 %v2272_v15  ;;  %v5966_v60 = vunpack.i.h.bf16 %v5964_v33  ;;  %v5965_v42 = vunpack.i.l.bf16 %v5964_v33  ;;  %v2200_v39 = vpop.permute.xlu0 %2199  ;;  %v2274_v31 = vpack.c.bf16 %v2253_v2, %v2252_v20  ;;  %v2273_v6 = vpack.c.bf16 %v2262_v19, %v2261_v5 }
 0x561   : > { %5169 = vmatprep.subr.bf16.mxu1 %v9839_v36  ;;  %v2275_v59 = vpack.c.bf16 %v2244_v32, %v2243_v9  ;;  %v2380_v43 = vpack.c.bf16 %v2379_v12, %v2378_v35  ;;  %v9870_v2 = vpack.c.bf16 %v7903_v47, %v7907_v0  ;;  %v2172_v32 = vpack.c.bf16 %v7839_v16, %v7945_v7 }
 0x562   : > { %v2254_v3 = vsel %vm352_vm3, %v2200_v39, %v5965_v42  ;;  %v2263_v63 = vsel %vm352_vm3, %v5966_v60, %v2200_v39  ;;  %2399 = vmatprep.subr.bf16.mxu0 %v2274_v31  ;;  %v2245_v41 = vsel %vm352_vm3, %v5965_v42, %v5966_v60  ;;  %v9871_v5 = vpack.c.bf16 %v7927_v34, %v7923_v57 }
 0x563   : > { %v2276_v4 = vpack.c.bf16 %v2263_v63, %v2263_v63  ;;  %v2277_v61 = vpack.c.bf16 %v2254_v3, %v2254_v3  ;;  %2400 = vmatpush1.bf16.msra.mxu0 %v2273_v6  ;;  %v8102_v53 = vpop.permute.xlu1 %5968  ;;  %v2278_v50 = vpack.c.bf16 %v2245_v41, %v2245_v41  ;;  %v9872_v47 = vpack.c.bf16 %v7919_v37, %v7915_v25 }
 0x564   : > { %5170 = vmatpush3.bf16.msra.mxu1 %v2275_v59  ;;  %v5974_v29 = vpop.permute.xlu0 %5973  ;;  %v2171_v16 = vpack.c.bf16 %v7833_v13, %v7939_v26  ;;  %v2173_v57 = vpack.c.bf16 %v7852_v17, %v7951_v1  ;;  %v9873_v25 = vpack.c.bf16 %v7872_v44, %v7842_v54  ;;  %v5971_v7 = vunpack.i.h.bf16 %v8102_v53 }
 0x565   : > { %4850 = vmatprep.subr.msk.bf16.mxu0 %vm1718_vm7, %v2277_v61  ;;  %5171 = vmatprep.subr.bf16.mxu1 %v9839_v36  ;;  %v2385_v15 = vsel %vm1718_vm7, %v2276_v4, 0  ;;  %v2391_v22 = vsel %vm1718_vm7, %v2278_v50, 0  ;;  %v5970_v13 = vunpack.i.l.bf16 %v8102_v53  ;;  %v5976_v26 = vunpack.i.h.bf16 %v5974_v29 }
 0x566   : > { %v5975_v33 = vunpack.i.l.bf16 %v5974_v29  ;;  %v9874_v1 = vpack.c.bf16 %v7868_v30, %v7836_v24  ;;  %v9875_v42 = vpack.c.bf16 %v7849_v55, %v7855_v49  ;;  %v9876_v44 = vpack.c.bf16 %v7973_v14, %v7977_v48 }
 0x567   : > { %2402 = vmatpush1.bf16.msra.mxu0 %v2385_v15  ;;  %v5979_v20 = vpop.permute.xlu1 %5978  ;;  %v2180_v39 = vpack.c.bf16 %v8015_v46, %v8015_v46  ;;  %v2181_v31 = vpack.c.bf16 %v8000_v27, %v8000_v27  ;;  %v2182_v24 = vpack.c.bf16 %v8004_v11, %v8004_v11  ;;  %v2343_v49 = vsel %vm416_vm5, %v5971_v7, %v5976_v26  ;;  %v2375_v27 = vld [vmem:[%s9729_s2 + $0x100] sm:$0xff]  ;;  %v2376_v11 = vld [vmem:[%s9729_s2 + $0x108] sm:$0xff] }
 0x568   : > { %5172 = vmatpush3.bf16.msra.mxu1 %v2391_v22  ;;  %2489 = vmatprep.subr.bf16.mxu0 %v9870_v2  ;;  %v8117_v9 = vpop.permute.xlu0 %5983  ;;  %v5981_v60 = vunpack.i.h.bf16 %v5979_v20  ;;  %v5980_v17 = vunpack.i.l.bf16 %v5979_v20  ;;  %v2342_v55 = vsel %vm416_vm5, %v5970_v13, %v5975_v33  ;;  %v9877_v63 = vpack.c.bf16 %v7957_v38, %v7961_v58 }
 0x569   : > { %5177 = vmatprep.subr.bf16.mxu1 %v9839_v36  ;;  %v9878_v41 = vpack.c.bf16 %v7985_v28, %v7981_v21  ;;  %v2481_v4 = vsel %vm1718_vm7, %v2180_v39, 0  ;;  %v2487_v50 = vsel %vm1718_vm7, %v2182_v24, 0  ;;  %v2377_v38 = vpack.c.bf16 %v2376_v11, %v2375_v27 }
 0x56a   : > { %4851 = vmatmul.mubr.msk.bf16.vlgmr.msra.gmra.mrb[40].mxu0 %vm1711_vm6, %v2380_v43  ;;  %v2333_v14 = vsel %vm416_vm5, %v5975_v33, %v5980_v17  ;;  %v2334_v48 = vsel %vm416_vm5, %v5976_v26, %v5981_v60  ;;  %v2351_v61 = vsel %vm416_vm5, %v5980_v17, %v5970_v13  ;;  %v2352_v53 = vsel %vm416_vm5, %v5981_v60, %v5971_v7 }
 0x56b   : > { %5174 = vmatmul.mubr.msk.bf16.vlgmr.msra.gmra.mrb[60].mxu1 %vm1711_vm6, %v2380_v43  ;;  %2490 = vmatpush1.bf16.msra.mxu0 %v9871_v5  ;;  %v8127_v19 = vpop.permute.xlu1 %5988  ;;  %v2361_v35 = vpack.c.bf16 %v2334_v48, %v2333_v14  ;;  %v2360_v12 = vpack.c.bf16 %v2343_v49, %v2342_v55  ;;  %v5986_v29 = vunpack.i.h.bf16 %v8117_v9  ;;  %v5985_v15 = vunpack.i.l.bf16 %v8117_v9 }
 0x56c   : > { %5178 = vmatpush3.bf16.msra.mxu1 %v9872_v47  ;;  %2491 = vmatprep.subr.bf16.mxu0 %v2172_v32  ;;  %v8132_v0 = vpop.permute.xlu0 %5993  ;;  %v5991_v20 = vunpack.i.h.bf16 %v8127_v19  ;;  %v2362_v47 = vpack.c.bf16 %v2352_v53, %v2351_v61 }
 0x56d   : > { %5179 = vmatprep.subr.bf16.mxu1 %v9839_v36  ;;  %5187 = vmatprep.mubr.msk.bf16.mxu1 %vm6594_vm2, %v9839_v36  ;;  %v5996_v2 = vunpack.i.h.bf16 %v8132_v0  ;;  %v5995_v32 = vunpack.i.l.bf16 %v8132_v0 }
 0x56e   : > { %2521 = vmatprep.mubr.bf16.mxu0 %v9844_v51 }
 0x56f   : > { %2492 = vmatpush1.bf16.msra.mxu0 %v2171_v16  ;;  %v5999_v34 = vpop.permute.xlu1 %5998  ;;  %v5990_v16 = vunpack.i.l.bf16 %v8127_v19 }
 0x570   : > { %5180 = vmatpush3.bf16.msra.mxu1 %v2173_v57  ;;  %2493 = vmatprep.subr.bf16.mxu0 %v9873_v25  ;;  %v6009_v37 = vpop.permute.xlu0 %6008  ;;  %v6001_v46 = vunpack.i.h.bf16 %v5999_v34  ;;  %v6000_v6 = vunpack.i.l.bf16 %v5999_v34 }
 0x571   : > { %5181 = vmatprep.subr.bf16.mxu1 %v9839_v36  ;;  %v6011_v59 = vunpack.i.h.bf16 %v6009_v37  ;;  %v6010_v3 = vunpack.i.l.bf16 %v6009_v37  ;;  %v2346_v17 = vsel %vm416_vm5, %v5990_v16, %v5995_v32 }
 0x572   : > { %v2345_v9 = vsel %vm416_vm5, %v5986_v29, %v6001_v46  ;;  %v2344_v57 = vsel %vm416_vm5, %v5985_v15, %v6000_v6 }
 0x573   : > { %2494 = vmatpush1.bf16.msra.mxu0 %v9874_v1  ;;  %v8154_v54 = vpop.permute.xlu1 %6003  ;;  %v2335_v22 = vsel %vm416_vm5, %v6000_v6, %v6010_v3  ;;  %v2336_v43 = vsel %vm416_vm5, %v6001_v46, %v6011_v59  ;;  %v2353_v34 = vsel %vm416_vm5, %v6010_v3, %v5985_v15  ;;  %v2354_v0 = vsel %vm416_vm5, %v6011_v59, %v5986_v29 }
 0x574   : > { %5182 = vmatpush3.bf16.msra.mxu1 %v9875_v42  ;;  %2495 = vmatprep.subr.bf16.mxu0 %v9876_v44  ;;  %v8170_v30 = vpop.permute.xlu0 %6013  ;;  %v6006_v58 = vunpack.i.h.bf16 %v8154_v54  ;;  %v6005_v21 = vunpack.i.l.bf16 %v8154_v54  ;;  %v2364_v25 = vpack.c.bf16 %v2336_v43, %v2335_v22  ;;  %v2347_v1 = vsel %vm416_vm5, %v5991_v20, %v5996_v2  ;;  %v9879_v43 = vld [vmem:[#allocation8_spill] sm:$0xff] }
 0x575   : > { %5183 = vmatprep.subr.bf16.mxu1 %v9839_v36  ;;  %v2363_v42 = vpack.c.bf16 %v2345_v9, %v2344_v57  ;;  %v2365_v39 = vpack.c.bf16 %v2354_v0, %v2353_v34  ;;  %v6016_v48 = vunpack.i.h.bf16 %v8170_v30  ;;  %v6015_v27 = vunpack.i.l.bf16 %v8170_v30 }
 0x576   : > { %v2337_v19 = vsel %vm416_vm5, %v5995_v32, %v6005_v21  ;;  %v2338_v37 = vsel %vm416_vm5, %v5996_v2, %v6006_v58  ;;  %v2355_v54 = vsel %vm416_vm5, %v6005_v21, %v5990_v16  ;;  %v2356_v44 = vsel %vm416_vm5, %v6006_v58, %v5991_v20  ;;  %v9880_v20 = vld [vmem:[#allocation9_spill] sm:$0xff]  ;;  %v9881_v2 = vld [vmem:[#allocation10_spill] sm:$0xff] }
 0x577   : > { %2496 = vmatpush1.bf16.msra.mxu0 %v9877_v63  ;;  %v6019_v28 = vpop.permute.xlu1 %6018  ;;  %v2366_v46 = vpack.c.bf16 %v2347_v1, %v2346_v17  ;;  %v2368_v3 = vpack.c.bf16 %v2356_v44, %v2355_v54 }
 0x578   : > { %5184 = vmatpush3.bf16.msra.mxu1 %v9878_v41  ;;  %4853 = vmatprep.subr.msk.bf16.mxu0 %vm1718_vm7, %v2181_v31  ;;  %v6024_v5 = vpop.permute.xlu0 %6023  ;;  %v6021_v7 = vunpack.i.h.bf16 %v6019_v28  ;;  %v6020_v13 = vunpack.i.l.bf16 %v6019_v28  ;;  %v2367_v31 = vpack.c.bf16 %v2338_v37, %v2337_v19 }
 0x579   : > { %5185 = vmatprep.subr.bf16.mxu1 %v9839_v36  ;;  %v6026_v26 = vunpack.i.h.bf16 %v6024_v5  ;;  %v6025_v33 = vunpack.i.l.bf16 %v6024_v5 }
 0x57a   : > { %v2349_v6 = vsel %vm416_vm5, %v6016_v48, %v6021_v7  ;;  %v2348_v59 = vsel %vm416_vm5, %v6015_v27, %v6020_v13 }
 0x57b   : > { %2498 = vmatpush1.bf16.msra.mxu0 %v2481_v4  ;;  %v6029_v60 = vpop.permute.xlu1 %6028  ;;  %v2339_v49 = vsel %vm416_vm5, %v6020_v13, %v6025_v33  ;;  %v2340_v14 = vsel %vm416_vm5, %v6021_v7, %v6026_v26  ;;  %v2357_v41 = vsel %vm416_vm5, %v6025_v33, %v6015_v27  ;;  %v2358_v30 = vsel %vm416_vm5, %v6026_v26, %v6016_v48 }
 0x57c   : > { %5186 = vmatpush3.bf16.msra.mxu1 %v2487_v50  ;;  %2588 = vmatprep.subr.bf16.mxu0 %v2361_v35  ;;  %v6031_v24 = vunpack.i.h.bf16 %v6029_v60  ;;  %v6030_v55 = vunpack.i.l.bf16 %v6029_v60  ;;  %v2314_v11 = vpop.permute.xlu0 %2313  ;;  %v2370_v63 = vpack.c.bf16 %v2340_v14, %v2339_v49  ;;  %v2369_v50 = vpack.c.bf16 %v2349_v6, %v2348_v59  ;;  %v2573_v35 = vld [vmem:[%s9729_s2 + $0x110] sm:$0xff] }
 0x57d   : > { %5191 = vmatprep.subr.bf16.mxu1 %v9839_v36  ;;  %v2371_v21 = vpack.c.bf16 %v2358_v30, %v2357_v41 }
 0x57e   : > { %4854 = vmatmul.mubr.msk.bf16.vlgmr.msra.gmra.mrb[40].mxu0 %vm1711_vm6, %v2377_v38  ;;  %v2341_v4 = vsel %vm416_vm5, %v2314_v11, %v6031_v24  ;;  %v2350_v61 = vsel %vm416_vm5, %v6030_v55, %v2314_v11  ;;  %v2359_v53 = vsel %vm416_vm5, %v6031_v24, %v6030_v55 }
 0x57f   : > { %5188 = vmatmul.mubr.msk.bf16.vlgmr.msra.gmra.mrb[64].mxu1 %vm1711_vm6, %v2377_v38  ;;  %2589 = vmatpush1.bf16.msra.mxu0 %v2360_v12  ;;  %v2372_v38 = vpack.c.bf16 %v2350_v61, %v2350_v61  ;;  %v2373_v58 = vpack.c.bf16 %v2341_v4, %v2341_v4  ;;  %v2374_v28 = vpack.c.bf16 %v2359_v53, %v2359_v53  ;;  %v2574_v12 = vld [vmem:[%s9729_s2 + $0x118] sm:$0xff] }
 0x580   : > { %5192 = vmatpush3.bf16.msra.mxu1 %v2362_v47  ;;  %2590 = vmatprep.subr.bf16.mxu0 %v2364_v25  ;;  %v2575_v15 = vpack.c.bf16 %v2574_v12, %v2573_v35 }
 0x581   : > { %5193 = vmatprep.subr.bf16.mxu1 %v9839_v36  ;;  %2620 = vmatprep.mubr.bf16.mxu0 %v9844_v51  ;;  %v2580_v29 = vsel %vm1718_vm7, %v2372_v38, 0  ;;  %v2586_v22 = vsel %vm1718_vm7, %v2374_v28, 0 }
 0x582   : > { %5201 = vmatprep.mubr.msk.bf16.mxu1 %vm6594_vm2, %v9839_v36 }
 0x583   : > { %2591 = vmatpush1.bf16.msra.mxu0 %v2363_v42 }
 0x584   : > { %5194 = vmatpush3.bf16.msra.mxu1 %v2365_v39  ;;  %2592 = vmatprep.subr.bf16.mxu0 %v2367_v31 }
 0x585   : > { %5195 = vmatprep.subr.bf16.mxu1 %v9839_v36 }
 0x587   : > { %2593 = vmatpush1.bf16.msra.mxu0 %v2366_v46 }
 0x588   : > { %5196 = vmatpush3.bf16.msra.mxu1 %v2368_v3  ;;  %2594 = vmatprep.subr.bf16.mxu0 %v2370_v63 }
 0x589   : > { %5197 = vmatprep.subr.bf16.mxu1 %v9839_v36 }
 0x58b   : > { %2595 = vmatpush1.bf16.msra.mxu0 %v2369_v50 }
 0x58c   : > { %5198 = vmatpush3.bf16.msra.mxu1 %v2371_v21  ;;  %4856 = vmatprep.subr.msk.bf16.mxu0 %vm1718_vm7, %v2373_v58  ;;  %v2683_v37 = vpop.permute.xlu1 %2682 }
 0x58d   : > { %5199 = vmatprep.subr.bf16.mxu1 %v9839_v36  ;;  %v2688_v7 = vpop.permute.xlu0 %2687 }
 0x58f   : > { %2597 = vmatpush1.bf16.msra.mxu0 %v2580_v29 }
 0x590   : > { %5200 = vmatpush3.bf16.msra.mxu1 %v2586_v22  ;;  %2892 = vmatprep.subr.bf16.mxu0 %v9879_v43 }
 0x591   : > { %5205 = vmatprep.subr.bf16.mxu1 %v9880_v20 }
 0x592   : > { %4857 = vmatmul.mubr.msk.bf16.vlgmr.msra.gmra.mrb[40].mxu0 %vm1711_vm6, %v2575_v15 }
 0x593   : > { %5202 = vmatmul.mubr.msk.bf16.vlgmr.msra.gmra.mrb[68].mxu1 %vm1711_vm6, %v2575_v15  ;;  %2893 = vmatpush1.bf16.msra.mxu0 %v9881_v2 }
 0x594   : > { %5206 = vmatpush3.bf16.msra.mxu1 %v9880_v20  ;;  %2924 = vmatprep.mubr.bf16.mxu0 %v9844_v51 }
 0x63e   : > { %v2470_v32 = vpop.f32.mrb[60].mxu1 }
 0x63f   : > { %v5175_v5 = vpop.f32.mrb[61].mxu1 }
 0x640   : > { %v2473_v47 = vpop.f32.mrb[62].mxu1 }
 0x641   : > { %v5176_v16 = vpop.f32.mrb[63].mxu1 }
 0x652   : > { %v2566_v9 = vpop.f32.mrb[64].mxu1 }
 0x653   : > { %v2567_v57 = vadd.f32 %v2566_v9, %v2470_v32  ;;  %v5189_v34 = vpop.f32.mrb[65].mxu1 }
 0x654   : > { %v2569_v0 = vpop.f32.mrb[66].mxu1 }
 0x655   : > { %v2570_v25 = vadd.f32 %v2569_v0, %v2473_v47  ;;  %v5190_v19 = vpop.f32.mrb[67].mxu1 }
 0x665   : > { %v2622_v13 = vpop.f32.mrb[40].mxu0 }
 0x666   : > { %v2690_v26 = vadd.f32 %v2683_v37, %v2622_v13  ;;  %v2665_v33 = vpop.f32.mrb[68].mxu1  ;;  %v2624_v60 = vpop.f32.mrb[41].mxu0 }
 0x667   : > { %v2674_v17 = vadd.f32 %v2665_v33, %v2567_v57  ;;  %v2691_v1 = vadd.f32 %v2683_v37, %v2624_v60  ;;  %v5203_v42 = vpop.f32.mrb[69].mxu1  ;;  %v2626_v54 = vpop.f32.mrb[42].mxu0 }
 0x668   : > { %v2693_v44 = vadd.f32 %v2688_v7, %v2626_v54  ;;  %v2668_v39 = vpop.f32.mrb[70].mxu1  ;;  %v2628_v31 = vpop.f32.mrb[43].mxu0  ;;  %v8275_v48 = vmul.f32 %v2690_v26, %v9867_v23 }
 0x669   : > { %v2692_v24 = vadd.f32 %v2683_v37, %v2674_v17  ;;  %v2677_v55 = vadd.f32 %v2668_v39, %v2570_v25  ;;  %v2694_v49 = vadd.f32 %v2688_v7, %v2628_v31  ;;  %v5204_v14 = vpop.f32.mrb[71].mxu1  ;;  %v8282_v46 = vmul.f32 %v2691_v1, %v9868_v56 }
 0x66a   : > { %v8278_v27 = vmul.f32 %v2693_v44, %v9867_v23 }
 0x66b   : > { %v2698_v11 = vmul.f32 %v2692_v24, %v9869_v62  ;;  %v2695_v6 = vadd.f32 %v2688_v7, %v2677_v55  ;;  %v8285_v59 = vmul.f32 %v2694_v49, %v9868_v56 }
 0x66c   : > { %v8289_v3 = vpack.i.bf16 %v8278_v27, %v8275_v48  ;;  %v2741_v4 = vpack.c.bf16 %v8278_v27, %v8275_v48  ;;  %v2875_v48 = vld [vmem:[%s9729_s2 + $0x150] sm:$0xff]  ;;  %v2876_v27 = vld [vmem:[%s9729_s2 + $0x158] sm:$0xff] }
 0x66d   : > { %v2701_v63 = vmul.f32 %v2695_v6, %v9869_v62  ;;  %v8294_v41 = vpack.i.bf16 %v8285_v59, %v8282_v46  ;;  %v2742_v30 = vpack.c.bf16 %v8285_v59, %v8282_v46  ;;  %v9896_v59 = vld [vmem:[#allocation7_spill] sm:$0xff] }
 0x66e   : > { %6033 = vrot.lane.b32.xlu1 %v8289_v3, %s6590_s27 }
 0x66f   : > { %6038 = vrot.lane.b32.xlu0 %v8294_v41, %s6590_s27  ;;  %v8304_v61 = vpack.i.bf16 %v2701_v63, %v2698_v11  ;;  %v8306_v53 = vpack.c.bf16 %v2701_v63, %v2698_v11  ;;  %v2879_v63 = vld [vmem:[%s9729_s2 + $0x120] sm:$0xff] }
 0x672   : > { %6043 = vrot.lane.b32.xlu1 %v8304_v61, %s6590_s27 }
 0x673   : > { %6048 = vrot.lane.b32.xlu0 %v8289_v3, %s6591_s28 }
 0x676   : > { %6053 = vrot.lane.b32.xlu1 %v8294_v41, %s6591_s28 }
 0x677   : > { %6058 = vrot.lane.b32.xlu0 %v8304_v61, %s6591_s28 }
 0x6e0   : > { %v6034_v50 = vpop.permute.xlu1 %6033 }
 0x6e1   : > { %v6036_v38 = vunpack.i.h.bf16 %v6034_v50  ;;  %v6035_v58 = vunpack.i.l.bf16 %v6034_v50  ;;  %v6039_v21 = vpop.permute.xlu0 %6038  ;;  %v2880_v50 = vld [vmem:[%s9729_s2 + $0x128] sm:$0xff] }
 0x6e2   : > { %v6041_v28 = vunpack.i.h.bf16 %v6039_v21  ;;  %v6040_v35 = vunpack.i.l.bf16 %v6039_v21 }
 0x6e4   : > { %v8318_v12 = vsel %vm281_vm0, %v6036_v38, %v6041_v28  ;;  %v8322_v29 = vsel %vm281_vm0, %v6035_v58, %v6040_v35  ;;  %v6044_v15 = vpop.permute.xlu1 %6043 }
 0x6e5   : > { %v6046_v22 = vunpack.i.h.bf16 %v6044_v15  ;;  %v6045_v43 = vunpack.i.l.bf16 %v6044_v15  ;;  %v6049_v20 = vpop.permute.xlu0 %6048  ;;  %v6067_v2 = vpack.i.bf16 %v8318_v12, %v8322_v29  ;;  %v2739_v32 = vpack.c.bf16 %v8318_v12, %v8322_v29  ;;  %v9893_v29 = vld [vmem:[#allocation19_spill] sm:$0xff] }
 0x6e6   : > { %v6051_v57 = vunpack.i.h.bf16 %v6049_v20  ;;  %v6050_v34 = vunpack.i.l.bf16 %v6049_v20 }
 0x6e7   : > { %v2714_v5 = vsel %vm281_vm0, %v6040_v35, %v6045_v43  ;;  %v2715_v47 = vsel %vm281_vm0, %v6041_v28, %v6046_v22  ;;  %v8334_v16 = vsel %vm281_vm0, %v6045_v43, %v6035_v58  ;;  %v8338_v9 = vsel %vm281_vm0, %v6046_v22, %v6036_v38  ;;  %6068 = vrot.lane.b32.xlu0 %v6067_v2, %s6592_s29  ;;  %v3229_v58 = vld [vmem:[%s9730_s3 + $0x68] sm:$0xff] }
 0x6e8   : > { %v6054_v0 = vpop.permute.xlu1 %6053  ;;  %v6062_v25 = vpack.i.bf16 %v8338_v9, %v8334_v16  ;;  %v8343_v13 = vpack.c.bf16 %v2715_v47, %v2714_v5  ;;  %v2738_v26 = vpack.c.bf16 %v8338_v9, %v8334_v16  ;;  %v6072_v42 = vpack.i.bf16 %v2715_v47, %v2714_v5  ;;  %v9894_v16 = vld [vmem:[#allocation5_spill] sm:$0xff] }
 0x6e9   : > { %v6056_v19 = vunpack.i.h.bf16 %v6054_v0  ;;  %v6055_v37 = vunpack.i.l.bf16 %v6054_v0  ;;  %v6059_v7 = vpop.permute.xlu0 %6058  ;;  %v8396_v38 = vpack.c.bf16 %v2880_v50, %v2879_v63 }
 0x6ea   : > { %v6061_v33 = vunpack.i.h.bf16 %v6059_v7  ;;  %v6060_v60 = vunpack.i.l.bf16 %v6059_v7  ;;  %6063 = vrot.lane.b32.xlu1 %v6062_v25, %s6592_s29 }
 0x6eb   : > { %v8350_v17 = vsel %vm300_vm1, %v6050_v34, %v6055_v37  ;;  %v8354_v1 = vsel %vm300_vm1, %v6051_v57, %v6056_v19  ;;  %6078 = vrot.lane.b32.xlu0 %v8289_v3, %s6592_s29  ;;  %5217 = vmatprep.mubr.msk.bf16.mxu1 %vm2885_vm8, %v8396_v38 }
 0x6ec   : > { %v8360_v54 = vsel %vm300_vm1, %v6056_v19, %v6061_v33  ;;  %v8364_v44 = vsel %vm300_vm1, %v6055_v37, %v6060_v60  ;;  %v2736_v39 = vsel %vm300_vm1, %v6060_v60, %v6050_v34  ;;  %v2737_v31 = vsel %vm300_vm1, %v6061_v33, %v6051_v57 }
 0x6ed   : > { %v2745_v24 = vpack.c.bf16 %v8360_v54, %v8364_v44  ;;  %v8373_v55 = vpack.c.bf16 %v2737_v31, %v2736_v39  ;;  %v2744_v49 = vpack.c.bf16 %v8354_v1, %v8350_v17  ;;  %v6097_v14 = vpack.i.bf16 %v8360_v54, %v8364_v44 }
 0x6ee   : > { %6073 = vrot.lane.b32.xlu1 %v6072_v42, %s6592_s29  ;;  %v6092_v11 = vpack.i.bf16 %v8354_v1, %v8350_v17  ;;  %v6102_v6 = vpack.i.bf16 %v2737_v31, %v2736_v39  ;;  %v2878_v54 = vpack.c.bf16 %v2876_v27, %v2875_v48  ;;  %v9903_v48 = vld [vmem:[#allocation26_spill] sm:$0xff] }
 0x6ef   : > { %6088 = vrot.lane.b32.xlu0 %v8304_v61, %s6592_s29 }
 0x6f2   : > { %6083 = vrot.lane.b32.xlu1 %v8294_v41, %s6592_s29 }
 0x6f3   : > { %6098 = vrot.lane.b32.xlu0 %v6097_v14, %s6592_s29 }
 0x6f6   : > { %6093 = vrot.lane.b32.xlu1 %v6092_v11, %s6592_s29 }
 0x6f7   : > { %6108 = vrot.lane.b32.xlu0 %v6067_v2, %s6596_s30 }
 0x6fa   : > { %6103 = vrot.lane.b32.xlu1 %v6102_v6, %s6592_s29 }
 0x6fb   : > { %6118 = vrot.lane.b32.xlu0 %v6062_v25, %s6596_s30 }
 0x6fe   : > { %6113 = vrot.lane.b32.xlu1 %v6072_v42, %s6596_s30 }
 0x6ff   : > { %6128 = vrot.lane.b32.xlu0 %v8304_v61, %s6596_s30  ;;  %v3228_v61 = vld [vmem:[%s9730_s3 + $0x60] sm:$0xff] }
 0x702   : > { %6123 = vrot.lane.b32.xlu1 %v8294_v41, %s6596_s30  ;;  %v3231_v41 = vld [vmem:[%s9730_s3 + $0x78] sm:$0xff] }
 0x703   : > { %6138 = vrot.lane.b32.xlu0 %v6097_v14, %s6596_s30 }
 0x706   : > { %6133 = vrot.lane.b32.xlu1 %v8289_v3, %s6596_s30  ;;  %v3230_v3 = vld [vmem:[%s9730_s3 + $0x70] sm:$0xff] }
 0x707   : > { %6148 = vrot.lane.b32.xlu0 %v6092_v11, %s6596_s30 }
 0x70a   : > { %6143 = vrot.lane.b32.xlu1 %v6102_v6, %s6596_s30 }
 0x70b   : > { %3239 = vperm.xlu0 %5570, %v3229_v58   ;;  %v9882_v58 = vld [vmem:[#allocation11_spill] sm:$0xff] }
 0x70e   : > { %3234 = vperm.xlu1 %5571, %v3228_v61  }
 0x70f   : > { %3249 = vperm.xlu0 %5570, %v3231_v41  }
 0x712   : > { %3244 = vperm.xlu1 %5571, %v3230_v3  }
 0x759   : > { %v6069_v21 = vpop.permute.xlu0 %6068 }
 0x75a   : > { %v6071_v35 = vunpack.i.h.bf16 %v6069_v21  ;;  %v6070_v15 = vunpack.i.l.bf16 %v6069_v21 }
 0x75c   : > { %v6064_v28 = vpop.permute.xlu1 %6063 }
 0x75d   : > { %v6066_v22 = vunpack.i.h.bf16 %v6064_v28  ;;  %v6065_v43 = vunpack.i.l.bf16 %v6064_v28  ;;  %v6079_v20 = vpop.permute.xlu0 %6078  ;;  %v9883_v28 = vld [vmem:[#allocation12_spill] sm:$0xff] }
 0x75e   : > { %v6081_v60 = vunpack.i.h.bf16 %v6079_v20  ;;  %v6080_v42 = vunpack.i.l.bf16 %v6079_v20 }
 0x75f   : > { %v2789_v2 = vsel %vm352_vm3, %v6065_v43, %v6070_v15  ;;  %v2790_v5 = vsel %vm352_vm3, %v6066_v22, %v6071_v35 }
 0x760   : > { %v6074_v47 = vpop.permute.xlu1 %6073  ;;  %v2802_v57 = vpack.c.bf16 %v2790_v5, %v2789_v2 }
 0x761   : > { %v6076_v34 = vunpack.i.h.bf16 %v6074_v47  ;;  %v6075_v0 = vunpack.i.l.bf16 %v6074_v47  ;;  %v6089_v25 = vpop.permute.xlu0 %6088  ;;  %v9884_v47 = vld [vmem:[#allocation13_spill] sm:$0xff] }
 0x762   : > { %2894 = vmatprep.subr.bf16.mxu0 %v2802_v57  ;;  %v6091_v11 = vunpack.i.h.bf16 %v6089_v25  ;;  %v6090_v6 = vunpack.i.l.bf16 %v6089_v25 }
 0x763   : > { %v2796_v19 = vsel %vm352_vm3, %v6076_v34, %v6066_v22  ;;  %v2795_v37 = vsel %vm352_vm3, %v6075_v0, %v6065_v43  ;;  %v2783_v7 = vsel %vm352_vm3, %v6070_v15, %v6075_v0  ;;  %v2784_v33 = vsel %vm352_vm3, %v6071_v35, %v6076_v34 }
 0x764   : > { %v6084_v39 = vpop.permute.xlu1 %6083  ;;  %v2801_v31 = vpack.c.bf16 %v2796_v19, %v2795_v37  ;;  %v2803_v14 = vpack.c.bf16 %v2784_v33, %v2783_v7  ;;  %v2797_v22 = vsel %vm352_vm3, %v6090_v6, %v6080_v42  ;;  %v2798_v43 = vsel %vm352_vm3, %v6091_v11, %v6081_v60 }
 0x765   : > { %v6086_v63 = vunpack.i.h.bf16 %v6084_v39  ;;  %v6085_v50 = vunpack.i.l.bf16 %v6084_v39  ;;  %v6099_v20 = vpop.permute.xlu0 %6098  ;;  %v2804_v19 = vpack.c.bf16 %v2798_v43, %v2797_v22  ;;  %v9889_v22 = vld [vmem:[#allocation4_spill] sm:$0xff] }
 0x766   : > { %2895 = vmatpush1.bf16.msra.mxu0 %v2801_v31  ;;  %5207 = vmatprep.subr.bf16.mxu1 %v2803_v14  ;;  %v6101_v34 = vunpack.i.h.bf16 %v6099_v20  ;;  %v6100_v0 = vunpack.i.l.bf16 %v6099_v20  ;;  %v9886_v31 = vld [vmem:[#allocation15_spill] sm:$0xff]  ;;  %v9890_v20 = vld [vmem:[#allocation2_spill] sm:$0xff] }
 0x767   : > { %2896 = vmatprep.subr.bf16.mxu0 %v9882_v58  ;;  %5208 = vmatpush3.bf16.msra.mxu1 %v2803_v14  ;;  %v2791_v61 = vsel %vm352_vm3, %v6080_v42, %v6085_v50  ;;  %v2792_v41 = vsel %vm352_vm3, %v6081_v60, %v6086_v63  ;;  %v2785_v3 = vsel %vm352_vm3, %v6085_v50, %v6090_v6  ;;  %v9885_v42 = vld [vmem:[#allocation14_spill] sm:$0xff]  ;;  %v9887_v50 = vld [vmem:[#allocation16_spill] sm:$0xff] }
 0x768   : > { %v6094_v21 = vpop.permute.xlu1 %6093  ;;  %5209 = vmatprep.subr.bf16.mxu1 %v9883_v28  ;;  %v2805_v35 = vpack.c.bf16 %v2792_v41, %v2791_v61  ;;  %v2786_v15 = vsel %vm352_vm3, %v6086_v63, %v6091_v11  ;;  %v2881_v61 = vld [vmem:[%s9729_s2 + $0x130] sm:$0xff]  ;;  %v2882_v41 = vld [vmem:[%s9729_s2 + $0x138] sm:$0xff] }
 0x769   : > { %v6096_v2 = vunpack.i.h.bf16 %v6094_v21  ;;  %v6095_v5 = vunpack.i.l.bf16 %v6094_v21  ;;  %v2806_v57 = vpack.c.bf16 %v2786_v15, %v2785_v3  ;;  %v2884_v21 = vpack.c.bf16 %v2882_v41, %v2881_v61  ;;  %v9888_v15 = vld [vmem:[#allocation3_spill] sm:$0xff]  ;;  %v6109_v12 = vpop.permute.xlu0 %6108 }
 0x76a   : > { %2897 = vmatpush1.bf16.msra.mxu0 %v9884_v47 }
 0x76b   : > { %2898 = vmatprep.subr.bf16.mxu0 %v2805_v35  ;;  %5210 = vmatpush3.bf16.msra.mxu1 %v9883_v28  ;;  %v2793_v33 = vsel %vm352_vm3, %v6095_v5, %v6100_v0  ;;  %v2794_v60 = vsel %vm352_vm3, %v6096_v2, %v6101_v34  ;;  %v2873_v28 = vld [vmem:[%s9729_s2 + $0x140] sm:$0xff]  ;;  %v2874_v35 = vld [vmem:[%s9729_s2 + $0x148] sm:$0xff] }
 0x76c   : > { %v6104_v25 = vpop.permute.xlu1 %6103  ;;  %5211 = vmatprep.subr.bf16.mxu1 %v2806_v57  ;;  %v2808_v63 = vpack.c.bf16 %v2794_v60, %v2793_v33  ;;  %v2877_v43 = vpack.c.bf16 %v2874_v35, %v2873_v28 }
 0x76d   : > { %v6106_v37 = vunpack.i.h.bf16 %v6104_v25  ;;  %v6105_v7 = vunpack.i.l.bf16 %v6104_v25  ;;  %v6119_v9 = vpop.permute.xlu0 %6118  ;;  %v9897_v25 = vld [vmem:[#allocation20_spill] sm:$0xff] }
 0x76e   : > { %2899 = vmatpush1.bf16.msra.mxu0 %v2804_v19  ;;  %v6120_v47 = vunpack.i.l.bf16 %v6119_v9  ;;  %v9898_v19 = vld [vmem:[#allocation21_spill] sm:$0xff] }
 0x76f   : > { %2900 = vmatprep.subr.bf16.mxu0 %v9885_v42  ;;  %5212 = vmatpush3.bf16.msra.mxu1 %v2806_v57  ;;  %v2787_v39 = vsel %vm352_vm3, %v6100_v0, %v6105_v7  ;;  %v2788_v14 = vsel %vm352_vm3, %v6101_v34, %v6106_v37  ;;  %v2799_v11 = vsel %vm352_vm3, %v6105_v7, %v6095_v5  ;;  %v3102_v34 = vld [vmem:[%s9729_s2 + $0x160] sm:$0xff]  ;;  %v3103_v0 = vld [vmem:[%s9729_s2 + $0x168] sm:$0xff] }
 0x770   : > { %5213 = vmatprep.subr.bf16.mxu1 %v9886_v31  ;;  %v2800_v6 = vsel %vm352_vm3, %v6106_v37, %v6096_v2  ;;  %v2809_v58 = vpack.c.bf16 %v2788_v14, %v2787_v39  ;;  %v9892_v2 = vld [vmem:[#allocation18_spill] sm:$0xff]  ;;  %v8548_v33 = vpack.c.bf16 %v3103_v0, %v3102_v34  ;;  %v9899_v39 = vld [vmem:[#allocation23_spill] sm:$0xff]  ;;  %v3105_v34 = vld [vmem:[%s9729_s2 + $0x178] sm:$0xff] }
 0x771   : > { %v2807_v3 = vpack.c.bf16 %v2800_v6, %v2799_v11  ;;  %v6129_v57 = vpop.permute.xlu0 %6128 }
 0x772   : > { %2901 = vmatpush1.bf16.msra.mxu0 %v9887_v50  ;;  %v6131_v6 = vunpack.i.h.bf16 %v6129_v57 }
 0x773   : > { %2902 = vmatprep.subr.bf16.mxu0 %v2808_v63  ;;  %5214 = vmatpush3.bf16.msra.mxu1 %v9886_v31  ;;  %v6130_v63 = vunpack.i.l.bf16 %v6129_v57 }
 0x774   : > { %5215 = vmatprep.subr.bf16.mxu1 %v2809_v58 }
 0x775   : > { %v6139_v50 = vpop.permute.xlu0 %6138 }
 0x776   : > { %2903 = vmatpush1.bf16.msra.mxu0 %v2807_v3 }
 0x777   : > { %5216 = vmatpush3.bf16.msra.mxu1 %v2809_v58  ;;  %3000 = vmatprep.subr.bf16.mxu0 %v9888_v15  ;;  %v9901_v15 = vld [vmem:[#allocation24_spill] sm:$0xff] }
 0x778   : > { %5221 = vmatprep.subr.bf16.mxu1 %v9889_v22 }
 0x779   : > { %4859 = vmatmul.mubr.msk.bf16.vlgmr.msra.gmra.mrb[44].mxu0 %vm2885_vm8, %v8396_v38  ;;  %v9891_v38 = vld [vmem:[#allocation17_spill] sm:$0xff] }
 0x77a   : > { %3001 = vmatpush1.bf16.msra.mxu0 %v9890_v20  ;;  %5218 = vmatmul.mubr.msk.bf16.vlgmr.msra.gmra.mrb[72].mxu1 %vm2885_vm8, %v2884_v21 }
 0x77b   : > { %3002 = vmatprep.subr.bf16.mxu0 %v2739_v32  ;;  %5222 = vmatpush3.bf16.msra.mxu1 %v9889_v22  ;;  %v6114_v32 = vpop.permute.xlu1 %6113 }
 0x77c   : > { %5223 = vmatprep.subr.bf16.mxu1 %v8343_v13  ;;  %2934 = vmatprep.mubr.bf16.mxu0 %v9844_v51  ;;  %v6115_v5 = vunpack.i.l.bf16 %v6114_v32 }
 0x77d   : > { %5233 = vmatprep.mubr.msk.bf16.mxu1 %vm2885_vm8, %v2877_v43 }
 0x77e   : > { %3003 = vmatpush1.bf16.msra.mxu0 %v2738_v26  ;;  %v6116_v26 = vunpack.i.h.bf16 %v6114_v32  ;;  %v2858_v17 = vsel %vm416_vm5, %v6115_v5, %v6120_v47 }
 0x77f   : > { %5224 = vmatpush3.bf16.msra.mxu1 %v8343_v13  ;;  %3004 = vmatprep.subr.bf16.mxu0 %v9891_v38  ;;  %v9895_v13 = vld [vmem:[#allocation6_spill] sm:$0xff]  ;;  %v6124_v46 = vpop.permute.xlu1 %6123  ;;  %v6149_v38 = vpop.permute.xlu0 %6148 }
 0x780   : > { %5225 = vmatprep.subr.bf16.mxu1 %v9892_v2  ;;  %v6126_v60 = vunpack.i.h.bf16 %v6124_v46  ;;  %v6125_v42 = vunpack.i.l.bf16 %v6124_v46 }
 0x781   : > { %4860 = vmatmul.mubr.msk.bf16.gmra.mrb[48].mxu0 %vm2885_vm8, %v2884_v21  ;;  %v9900_v21 = vld [vmem:[#allocation22_spill] sm:$0xff] }
 0x782   : > { %3005 = vmatpush1.bf16.msra.mxu0 %v9893_v29  ;;  %3032 = vmatprep.mubr.bf16.mxu0 %v9844_v51  ;;  %v2848_v61 = vsel %vm416_vm5, %v6125_v42, %v6130_v63  ;;  %v2849_v41 = vsel %vm416_vm5, %v6126_v60, %v6131_v6  ;;  %v9902_v29 = vld [vmem:[#allocation25_spill] sm:$0xff] }
 0x783   : > { %3006 = vmatprep.subr.bf16.mxu0 %v2742_v30  ;;  %5226 = vmatpush3.bf16.msra.mxu1 %v9892_v2  ;;  %v6111_v30 = vunpack.i.h.bf16 %v6109_v12  ;;  %v2868_v20 = vpack.c.bf16 %v2849_v41, %v2848_v61 }
 0x784   : > { %5227 = vmatprep.subr.bf16.mxu1 %v8306_v53 }
 0x786   : > { %3007 = vmatpush1.bf16.msra.mxu0 %v2741_v4  ;;  %v6110_v4 = vunpack.i.l.bf16 %v6109_v12 }
 0x787   : > { %3008 = vmatprep.subr.bf16.mxu0 %v9894_v16  ;;  %5228 = vmatpush3.bf16.msra.mxu1 %v8306_v53  ;;  %v6121_v53 = vunpack.i.h.bf16 %v6119_v9  ;;  %v6141_v16 = vunpack.i.h.bf16 %v6139_v50  ;;  %v6140_v9 = vunpack.i.l.bf16 %v6139_v50 }
 0x788   : > { %5229 = vmatprep.subr.bf16.mxu1 %v9895_v13  ;;  %v2846_v44 = vsel %vm416_vm5, %v6110_v4, %v6115_v5  ;;  %v2852_v37 = vsel %vm416_vm5, %v6120_v47, %v6110_v4  ;;  %v6150_v5 = vunpack.i.l.bf16 %v6149_v38  ;;  %v9904_v4 = vld [vmem:[#allocation27_spill] sm:$0xff] }
 0x789   : > { %v2859_v1 = vsel %vm416_vm5, %v6116_v26, %v6121_v53  ;;  %v2853_v7 = vsel %vm416_vm5, %v6121_v53, %v6111_v30 }
 0x78a   : > { %3009 = vmatpush1.bf16.msra.mxu0 %v9896_v59  ;;  %v2866_v31 = vpack.c.bf16 %v2859_v1, %v2858_v17  ;;  %v2864_v58 = vpack.c.bf16 %v2853_v7, %v2852_v37  ;;  %v2856_v53 = vsel %vm416_vm5, %v6150_v5, %v6140_v9  ;;  %v3240_v17 = vpop.permute.xlu0 %3239 }
 0x78b   : > { %3010 = vmatprep.subr.bf16.mxu0 %v2745_v24  ;;  %5230 = vmatpush3.bf16.msra.mxu1 %v9895_v13  ;;  %v2847_v24 = vsel %vm416_vm5, %v6111_v30, %v6116_v26  ;;  %v6151_v26 = vunpack.i.h.bf16 %v6149_v38 }
 0x78c   : > { %5231 = vmatprep.subr.bf16.mxu1 %v8373_v55 }
 0x78d   : > { %v2857_v47 = vsel %vm416_vm5, %v6151_v26, %v6141_v16 }
 0x78e   : > { %3011 = vmatpush1.bf16.msra.mxu0 %v2744_v49  ;;  %v6134_v49 = vpop.permute.xlu1 %6133  ;;  %v2870_v0 = vpack.c.bf16 %v2857_v47, %v2856_v53 }
 0x78f   : > { %5232 = vmatpush3.bf16.msra.mxu1 %v8373_v55  ;;  %3114 = vmatprep.subr.bf16.mxu0 %v9897_v25  ;;  %v2865_v55 = vpack.c.bf16 %v2847_v24, %v2846_v44  ;;  %v6136_v14 = vunpack.i.h.bf16 %v6134_v49  ;;  %v6135_v11 = vunpack.i.l.bf16 %v6134_v49  ;;  %v3104_v24 = vld [vmem:[%s9729_s2 + $0x170] sm:$0xff]  ;;  %v3250_v49 = vpop.permute.xlu0 %3249 }
 0x790   : > { %5237 = vmatprep.subr.bf16.mxu1 %v9898_v19  ;;  %v3107_v25 = vpack.c.bf16 %v3105_v34, %v3104_v24 }
 0x791   : > { %4863 = vmatmul.mubr.msk.bf16.vlgmr.msra.gmra.mrb[44].mxu0 %vm2885_vm8, %v2877_v43  ;;  %v2860_v28 = vsel %vm416_vm5, %v6130_v63, %v6135_v11  ;;  %v2861_v35 = vsel %vm416_vm5, %v6131_v6, %v6136_v14  ;;  %v2854_v22 = vsel %vm416_vm5, %v6135_v11, %v6125_v42  ;;  %v2855_v43 = vsel %vm416_vm5, %v6136_v14, %v6126_v60 }
 0x792   : > { %3115 = vmatpush1.bf16.msra.mxu0 %v9899_v39  ;;  %5234 = vmatmul.mubr.msk.bf16.vlgmr.msra.gmra.mrb[72].mxu1 %vm2885_vm8, %v2878_v54  ;;  %v6144_v3 = vpop.permute.xlu1 %6143  ;;  %v2869_v32 = vpack.c.bf16 %v2861_v35, %v2860_v28  ;;  %v2867_v13 = vpack.c.bf16 %v2855_v43, %v2854_v22 }
 0x793   : > { %3116 = vmatprep.subr.bf16.mxu0 %v2865_v55  ;;  %5238 = vmatpush3.bf16.msra.mxu1 %v9898_v19  ;;  %v6146_v2 = vunpack.i.h.bf16 %v6144_v3  ;;  %v6145_v12 = vunpack.i.l.bf16 %v6144_v3 }
 0x794   : > { %5239 = vmatprep.subr.bf16.mxu1 %v2866_v31  ;;  %3042 = vmatprep.mubr.bf16.mxu0 %v9844_v51 }
 0x795   : > { %5249 = vmatprep.mubr.msk.bf16.mxu1 %vm2885_vm8, %v8548_v33  ;;  %v2850_v46 = vsel %vm416_vm5, %v6140_v9, %v6145_v12  ;;  %v2851_v59 = vsel %vm416_vm5, %v6141_v16, %v6146_v2  ;;  %v2862_v27 = vsel %vm416_vm5, %v6145_v12, %v6150_v5  ;;  %v2863_v30 = vsel %vm416_vm5, %v6146_v2, %v6151_v26 }
 0x796   : > { %3117 = vmatpush1.bf16.msra.mxu0 %v2864_v58  ;;  %v2871_v57 = vpack.c.bf16 %v2851_v59, %v2850_v46  ;;  %v2872_v44 = vpack.c.bf16 %v2863_v30, %v2862_v27  ;;  %v3235_v1 = vpop.permute.xlu1 %3234 }
 0x797   : > { %3118 = vmatprep.subr.bf16.mxu0 %v9900_v21  ;;  %5240 = vmatpush3.bf16.msra.mxu1 %v2866_v31 }
 0x798   : > { %5241 = vmatprep.subr.bf16.mxu1 %v9901_v15 }
 0x799   : > { %4864 = vmatmul.mubr.msk.bf16.gmra.mrb[48].mxu0 %vm2885_vm8, %v2878_v54  ;;  %v9905_v54 = vld [vmem:[#allocation28_spill] sm:$0xff] }
 0x79a   : > { %3119 = vmatpush1.bf16.msra.mxu0 %v9902_v29  ;;  %3146 = vmatprep.mubr.bf16.mxu0 %v9844_v51  ;;  %v3245_v19 = vpop.permute.xlu1 %3244 }
 0x79b   : > { %3120 = vmatprep.subr.bf16.mxu0 %v2868_v20  ;;  %5242 = vmatpush3.bf16.msra.mxu1 %v9901_v15 }
 0x79c   : > { %5243 = vmatprep.subr.bf16.mxu1 %v2869_v32 }
 0x79e   : > { %3121 = vmatpush1.bf16.msra.mxu0 %v2867_v13 }
 0x79f   : > { %3122 = vmatprep.subr.bf16.mxu0 %v9903_v48  ;;  %5244 = vmatpush3.bf16.msra.mxu1 %v2869_v32 }
 0x7a0   : > { %5245 = vmatprep.subr.bf16.mxu1 %v9904_v4 }
 0x7a2   : > { %3123 = vmatpush1.bf16.msra.mxu0 %v9905_v54 }
 0x7a3   : > { %3124 = vmatprep.subr.bf16.mxu0 %v2871_v57  ;;  %5246 = vmatpush3.bf16.msra.mxu1 %v9904_v4 }
 0x7a4   : > { %5247 = vmatprep.subr.bf16.mxu1 %v2872_v44 }
 0x7a6   : > { %3125 = vmatpush1.bf16.msra.mxu0 %v2870_v0 }
 0x7a7   : > { %5248 = vmatpush3.bf16.msra.mxu1 %v2872_v44 }
 0x7a9   : > { %4867 = vmatmul.mubr.msk.bf16.vlgmr.msra.gmra.mrb[44].mxu0 %vm2885_vm8, %v8548_v33 }
 0x7aa   : > { %5250 = vmatmul.mubr.msk.bf16.vlgmr.msra.gmra.mrb[72].mxu1 %vm2885_vm8, %v3107_v25  ;;  %3156 = vmatprep.mubr.bf16.mxu0 %v9844_v51 }
 0x7b1   : > { %4868 = vmatmul.mubr.msk.bf16.gmra.mrb[48].mxu0 %vm2885_vm8, %v3107_v25 }
 0x7b2   : > { %3678 = vmatprep.mubr.bf16.mxu0 %v9844_v51 }
 0x87c   : > { %v3148_v37 = vpop.f32.mrb[44].mxu0 }
 0x87d   : > { %v3252_v7 = vadd.f32 %v3235_v1, %v3148_v37  ;;  %v3150_v55 = vpop.f32.mrb[45].mxu0  ;;  %v5251_v60 = vpop.f32.mrb[72].mxu1 }
 0x87e   : > { %v3253_v42 = vadd.f32 %v3235_v1, %v3150_v55  ;;  %v3260_v39 = vadd.f32 %v5251_v60, %v3245_v19  ;;  %v3152_v31 = vpop.f32.mrb[46].mxu0  ;;  %v3201_v33 = vpop.f32.mrb[73].mxu1 }
 0x87f   : > { %v3264_v14 = vmax.f32 %v3252_v7, 0.0  ;;  %v3255_v11 = vadd.f32 %v3240_v17, %v3152_v31  ;;  %v3254_v6 = vadd.f32 %v3235_v1, %v3201_v33  ;;  %v3154_v63 = vpop.f32.mrb[47].mxu0  ;;  %v5252_v50 = vpop.f32.mrb[74].mxu1 }
 0x880   : > { %v3265_v58 = vmax.f32 %v3253_v42, 0.0  ;;  %v3272_v61 = vmax.f32 %v3260_v39, 0.0  ;;  %v3256_v41 = vadd.f32 %v3240_v17, %v3154_v63  ;;  %v3263_v3 = vadd.f32 %v5252_v50, %v3250_v49  ;;  %v3204_v21 = vpop.f32.mrb[75].mxu1 }
 0x881   : > { %v3267_v28 = vmax.f32 %v3255_v11, 0.0  ;;  %v3266_v35 = vmax.f32 %v3254_v6, 0.0  ;;  %v3257_v15 = vadd.f32 %v3240_v17, %v3204_v21  ;;  %v8603_v20 = vmul.f32 %v3264_v14, %v9867_v23 }
 0x882   : > { %v3268_v22 = vmax.f32 %v3256_v41, 0.0  ;;  %v3275_v43 = vmax.f32 %v3263_v3, 0.0  ;;  %v8606_v38 = vmul.f32 %v3265_v58, %v9868_v56  ;;  %v3284_v29 = vmul.f32 %v3272_v61, %v9869_v62 }
 0x883   : > { %v8609_v2 = vmul.f32 %v3267_v28, %v9867_v23  ;;  %v3269_v12 = vmax.f32 %v3257_v15, 0.0  ;;  %v3278_v32 = vmul.f32 %v3266_v35, %v9869_v62 }
 0x884   : > { %v8614_v16 = vmul.f32 %v3268_v22, %v9868_v56  ;;  %v3287_v9 = vmul.f32 %v3275_v43, %v9869_v62  ;;  %v3158_v13 = vpop.f32.mrb[48].mxu0 }
 0x885   : > { %v3281_v26 = vmul.f32 %v3269_v12, %v9869_v62  ;;  %v3258_v5 = vadd.f32 %v3245_v19, %v3158_v13  ;;  %v3160_v46 = vpop.f32.mrb[49].mxu0  ;;  %v8620_v59 = vpack.i.bf16 %v8609_v2, %v8603_v20 }
 0x886   : > { %v3259_v48 = vadd.f32 %v3245_v19, %v3160_v46  ;;  %v3162_v27 = vpop.f32.mrb[50].mxu0  ;;  %v8624_v30 = vpack.i.bf16 %v8614_v16, %v8606_v38  ;;  %v8626_v4 = vpack.i.bf16 %v3287_v9, %v3284_v29  ;;  %v8666_v39 = vpack.c.bf16 %v3287_v9, %v3284_v29 }
 0x887   : > { %v3270_v53 = vmax.f32 %v3258_v5, 0.0  ;;  %v3261_v47 = vadd.f32 %v3250_v49, %v3162_v27  ;;  %6153 = vrot.lane.b32.xlu1 %v8620_v59, %s6590_s27  ;;  %v3164_v57 = vpop.f32.mrb[51].mxu0  ;;  %v8630_v54 = vpack.i.bf16 %v3281_v26, %v3278_v32  ;;  %v8650_v37 = vpack.c.bf16 %v3281_v26, %v3278_v32 }
 0x888   : > { %v3271_v44 = vmax.f32 %v3259_v48, 0.0  ;;  %v3262_v24 = vadd.f32 %v3250_v49, %v3164_v57  ;;  %6158 = vrot.lane.b32.xlu0 %v8624_v30, %s6590_s27 }
 0x889   : > { %v8635_v34 = vmul.f32 %v3270_v53, %v9867_v23  ;;  %v3273_v0 = vmax.f32 %v3261_v47, 0.0 }
 0x88a   : > { %v8638_v25 = vmul.f32 %v3271_v44, %v9868_v56  ;;  %v3274_v17 = vmax.f32 %v3262_v24, 0.0 }
 0x88b   : > { %v8641_v1 = vmul.f32 %v3273_v0, %v9867_v23  ;;  %6163 = vrot.lane.b32.xlu1 %v8630_v54, %s6590_s27 }
 0x88c   : > { %v8646_v19 = vmul.f32 %v3274_v17, %v9868_v56 }
 0x88d   : > { %v8656_v55 = vpack.i.bf16 %v8641_v1, %v8635_v34 }
 0x88e   : > { %v8660_v60 = vpack.i.bf16 %v8646_v19, %v8638_v25 }
 0x88f   : > { %6168 = vrot.lane.b32.xlu0 %v8656_v55, %s6590_s27 }
 0x890   : > { %6173 = vrot.lane.b32.xlu1 %v8660_v60, %s6590_s27 }
 0x893   : > { %6178 = vrot.lane.b32.xlu0 %v8626_v4, %s6590_s27 }
 0x894   : > { %6183 = vrot.lane.b32.xlu1 %v8620_v59, %s6591_s28 }
 0x897   : > { %6188 = vrot.lane.b32.xlu0 %v8624_v30, %s6591_s28 }
 0x898   : > { %6193 = vrot.lane.b32.xlu1 %v8630_v54, %s6591_s28 }
 0x89b   : > { %6198 = vrot.lane.b32.xlu0 %v8656_v55, %s6591_s28 }
 0x89c   : > { %6203 = vrot.lane.b32.xlu1 %v8660_v60, %s6591_s28 }
 0x89f   : > { %6208 = vrot.lane.b32.xlu0 %v8626_v4, %s6591_s28 }
 0x8a0   : > { %6213 = vrot.lane.b32.xlu1 %v8620_v59, %s6592_s29 }
 0x8a3   : > { %6218 = vrot.lane.b32.xlu0 %v8624_v30, %s6592_s29 }
 0x8a4   : > { %6223 = vrot.lane.b32.xlu1 %v8630_v54, %s6592_s29 }
 0x8a7   : > { %6228 = vrot.lane.b32.xlu0 %v8656_v55, %s6592_s29 }
 0x8f9   : > { %v6154_v33 = vpop.permute.xlu1 %6153 }
 0x8fa   : > { %v6156_v14 = vunpack.i.h.bf16 %v6154_v33  ;;  %v6155_v11 = vunpack.i.l.bf16 %v6154_v33  ;;  %v6159_v6 = vpop.permute.xlu0 %6158 }
 0x8fb   : > { %v6161_v63 = vunpack.i.h.bf16 %v6159_v6  ;;  %v6160_v50 = vunpack.i.l.bf16 %v6159_v6 }
 0x8fd   : > { %v8696_v58 = vsel %vm281_vm0, %v6156_v14, %v6161_v63  ;;  %v8700_v61 = vsel %vm281_vm0, %v6155_v11, %v6160_v50  ;;  %v6164_v41 = vpop.permute.xlu1 %6163 }
 0x8fe   : > { %v6166_v3 = vunpack.i.h.bf16 %v6164_v41  ;;  %v6165_v21 = vunpack.i.l.bf16 %v6164_v41  ;;  %v8704_v28 = vpack.i.bf16 %v8696_v58, %v8700_v61 }
 0x900   : > { %v3312_v15 = vsel %vm281_vm0, %v6160_v50, %v6165_v21  ;;  %v3313_v22 = vsel %vm281_vm0, %v6161_v63, %v6166_v3  ;;  %v8714_v43 = vsel %vm281_vm0, %v6165_v21, %v6155_v11  ;;  %v8718_v12 = vsel %vm281_vm0, %v6166_v3, %v6156_v14  ;;  %6238 = vrot.lane.b32.xlu0 %v8704_v28, %s6592_s29 }
 0x901   : > { %v6169_v29 = vpop.permute.xlu0 %6168  ;;  %v8724_v32 = vpack.i.bf16 %v8718_v12, %v8714_v43  ;;  %v8726_v5 = vpack.c.bf16 %v3313_v22, %v3312_v15  ;;  %v8740_v44 = vpack.i.bf16 %v3313_v22, %v3312_v15 }
 0x902   : > { %v6171_v9 = vunpack.i.h.bf16 %v6169_v29  ;;  %v6170_v13 = vunpack.i.l.bf16 %v6169_v29  ;;  %v6174_v26 = vpop.permute.xlu1 %6173 }
 0x903   : > { %v6176_v48 = vunpack.i.h.bf16 %v6174_v26  ;;  %v6175_v27 = vunpack.i.l.bf16 %v6174_v26  ;;  %6233 = vrot.lane.b32.xlu1 %v8724_v32, %s6592_s29 }
 0x905   : > { %v8734_v53 = vsel %vm281_vm0, %v6171_v9, %v6176_v48  ;;  %v8738_v47 = vsel %vm281_vm0, %v6170_v13, %v6175_v27  ;;  %v6179_v57 = vpop.permute.xlu0 %6178 }
 0x906   : > { %v6181_v24 = vunpack.i.h.bf16 %v6179_v57  ;;  %v6180_v0 = vunpack.i.l.bf16 %v6179_v57  ;;  %v6184_v17 = vpop.permute.xlu1 %6183  ;;  %v8764_v3 = vpack.i.bf16 %v8734_v53, %v8738_v47 }
 0x907   : > { %6243 = vrot.lane.b32.xlu1 %v8740_v44, %s6592_s29  ;;  %v6186_v26 = vunpack.i.h.bf16 %v6184_v17 }
 0x908   : > { %v3314_v14 = vsel %vm281_vm0, %v6175_v27, %v6180_v0  ;;  %v3315_v11 = vsel %vm281_vm0, %v6176_v48, %v6181_v24  ;;  %v8752_v6 = vsel %vm281_vm0, %v6180_v0, %v6170_v13  ;;  %v8756_v63 = vsel %vm281_vm0, %v6181_v24, %v6171_v9 }
 0x909   : > { %v6189_v50 = vpop.permute.xlu0 %6188  ;;  %v8760_v41 = vpack.i.bf16 %v8756_v63, %v8752_v6  ;;  %v8766_v29 = vpack.c.bf16 %v3315_v11, %v3314_v14  ;;  %v6185_v9 = vunpack.i.l.bf16 %v6184_v17  ;;  %v6262_v57 = vpack.i.bf16 %v3315_v11, %v3314_v14 }
 0x90a   : > { %v6191_v21 = vunpack.i.h.bf16 %v6189_v50  ;;  %v6190_v15 = vunpack.i.l.bf16 %v6189_v50  ;;  %v6194_v22 = vpop.permute.xlu1 %6193 }
 0x90b   : > { %v6196_v48 = vunpack.i.h.bf16 %v6194_v22  ;;  %v6195_v27 = vunpack.i.l.bf16 %v6194_v22  ;;  %6248 = vrot.lane.b32.xlu0 %v8760_v41, %s6592_s29  ;;  %6253 = vrot.lane.b32.xlu1 %v8764_v3, %s6592_s29 }
 0x90c   : > { %v8788_v31 = vsel %vm300_vm1, %v6185_v9, %v6190_v15  ;;  %v8792_v14 = vsel %vm300_vm1, %v6186_v26, %v6191_v21 }
 0x90d   : > { %v8776_v24 = vsel %vm300_vm1, %v6191_v21, %v6196_v48  ;;  %v8780_v0 = vsel %vm300_vm1, %v6190_v15, %v6195_v27  ;;  %v3356_v17 = vsel %vm300_vm1, %v6195_v27, %v6185_v9  ;;  %v3357_v50 = vsel %vm300_vm1, %v6196_v48, %v6186_v26  ;;  %v6199_v22 = vpop.permute.xlu0 %6198 }
 0x90e   : > { %v6201_v11 = vunpack.i.h.bf16 %v6199_v22  ;;  %v6200_v42 = vunpack.i.l.bf16 %v6199_v22  ;;  %v6204_v7 = vpop.permute.xlu1 %6203  ;;  %v8799_v27 = vpack.c.bf16 %v3357_v50, %v3356_v17  ;;  %v6282_v18 = vpack.i.bf16 %v3357_v50, %v3356_v17 }
 0x90f   : > { %v6206_v49 = vunpack.i.h.bf16 %v6204_v7  ;;  %v6205_v13 = vunpack.i.l.bf16 %v6204_v7  ;;  %6258 = vrot.lane.b32.xlu1 %v8660_v60, %s6592_s29  ;;  %6263 = vrot.lane.b32.xlu0 %v6262_v57, %s6592_s29  ;;  %v6272_v7 = vpack.i.bf16 %v8792_v14, %v8788_v31  ;;  %v6277_v8 = vpack.i.bf16 %v8776_v24, %v8780_v0 }
 0x911   : > { %v8803_v15 = vsel %vm300_vm1, %v6201_v11, %v6206_v49  ;;  %v8807_v21 = vsel %vm300_vm1, %v6200_v42, %v6205_v13  ;;  %v6209_v26 = vpop.permute.xlu0 %6208 }
 0x912   : > { %v6211_v22 = vunpack.i.h.bf16 %v6209_v26  ;;  %v6210_v33 = vunpack.i.l.bf16 %v6209_v26 }
 0x913   : > { %6273 = vrot.lane.b32.xlu1 %v6272_v7, %s6592_s29  ;;  %6268 = vrot.lane.b32.xlu0 %v8626_v4, %s6592_s29 }
 0x914   : > { %v8820_v46 = vsel %vm300_vm1, %v6205_v13, %v6210_v33  ;;  %v8824_v35 = vsel %vm300_vm1, %v6206_v49, %v6211_v22  ;;  %v3358_v9 = vsel %vm300_vm1, %v6210_v33, %v6200_v42  ;;  %v3359_v26 = vsel %vm300_vm1, %v6211_v22, %v6201_v11  ;;  %v3635_v33 = vld [vmem:[%s9729_s2 + $0x180] sm:$0xff]  ;;  %v3636_v13 = vld [vmem:[%s9729_s2 + $0x188] sm:$0xff] }
 0x915   : > { %v8834_v45 = vpack.c.bf16 %v3359_v26, %v3358_v9  ;;  %v6292_v49 = vpack.i.bf16 %v8824_v35, %v8820_v46  ;;  %v6287_v42 = vpack.i.bf16 %v8803_v15, %v8807_v21  ;;  %v8850_v17 = vpack.c.bf16 %v3636_v13, %v3635_v33 }
 0x916   : > { %v6297_v50 = vpack.i.bf16 %v3359_v26, %v3358_v9 }
 0x917   : > { %6283 = vrot.lane.b32.xlu1 %v6282_v18, %s6592_s29  ;;  %6278 = vrot.lane.b32.xlu0 %v6277_v8, %s6592_s29 }
 0x918   : > { %5265 = vmatprep.mubr.msk.bf16.mxu1 %vm2885_vm8, %v8850_v17 }
 0x91b   : > { %6293 = vrot.lane.b32.xlu1 %v6292_v49, %s6592_s29  ;;  %6288 = vrot.lane.b32.xlu0 %v6287_v42, %s6592_s29 }
 0x91f   : > { %6303 = vrot.lane.b32.xlu1 %v8704_v28, %s6596_s30  ;;  %6298 = vrot.lane.b32.xlu0 %v6297_v50, %s6592_s29 }
 0x923   : > { %6313 = vrot.lane.b32.xlu1 %v8724_v32, %s6596_s30  ;;  %6308 = vrot.lane.b32.xlu0 %v8740_v44, %s6596_s30 }
 0x927   : > { %6323 = vrot.lane.b32.xlu1 %v8624_v30, %s6596_s30  ;;  %6318 = vrot.lane.b32.xlu0 %v8760_v41, %s6596_s30  ;;  %v3970_v30 = vld [vmem:[%s9730_s3 + $0x88] sm:$0xff] }
 0x92b   : > { %6333 = vrot.lane.b32.xlu1 %v8620_v59, %s6596_s30  ;;  %6328 = vrot.lane.b32.xlu0 %v8630_v54, %s6596_s30  ;;  %v3969_v59 = vld [vmem:[%s9730_s3 + $0x80] sm:$0xff] }
 0x92f   : > { %6348 = vrot.lane.b32.xlu1 %v6262_v57, %s6596_s30  ;;  %6338 = vrot.lane.b32.xlu0 %v8764_v3, %s6596_s30 }
 0x933   : > { %6353 = vrot.lane.b32.xlu1 %v8626_v4, %s6596_s30  ;;  %6343 = vrot.lane.b32.xlu0 %v8660_v60, %s6596_s30  ;;  %v6214_v4 = vpop.permute.xlu1 %6213 }
 0x934   : > { %v6215_v40 = vunpack.i.l.bf16 %v6214_v4 }
 0x937   : > { %6363 = vrot.lane.b32.xlu1 %v6277_v8, %s6596_s30  ;;  %6358 = vrot.lane.b32.xlu0 %v8656_v55, %s6596_s30  ;;  %v3971_v8 = vld [vmem:[%s9730_s3 + $0x90] sm:$0xff]  ;;  %v6224_v55 = vpop.permute.xlu1 %6223 }
 0x938   : > { %v6226_v52 = vunpack.i.h.bf16 %v6224_v55 }
 0x93b   : > { %6373 = vrot.lane.b32.xlu1 %v6272_v7, %s6596_s30  ;;  %6368 = vrot.lane.b32.xlu0 %v6282_v18, %s6596_s30  ;;  %v6219_v18 = vpop.permute.xlu0 %6218 }
 0x93f   : > { %6378 = vrot.lane.b32.xlu1 %v6297_v50, %s6596_s30  ;;  %6383 = vrot.lane.b32.xlu0 %v6292_v49, %s6596_s30  ;;  %v8893_v54 = vpop.permute.xlu0 %6228  ;;  %v6221_v49 = vunpack.i.h.bf16 %v6219_v18 }
 0x943   : > { %3974 = vperm.xlu1 %5571, %v3969_v59   ;;  %6388 = vrot.lane.b32.xlu0 %v6287_v42, %s6596_s30  ;;  %v6220_v59 = vunpack.i.l.bf16 %v6219_v18 }
 0x947   : > { %3984 = vperm.xlu1 %5571, %v3971_v8   ;;  %3979 = vperm.xlu0 %5570, %v3970_v30   ;;  %v6225_v8 = vunpack.i.l.bf16 %v6224_v55 }
 0x972   : > { %v6239_v60 = vpop.permute.xlu0 %6238 }
 0x973   : > { %v6241_v32 = vunpack.i.h.bf16 %v6239_v60  ;;  %v6240_v44 = vunpack.i.l.bf16 %v6239_v60 }
 0x975   : > { %v6234_v28 = vpop.permute.xlu1 %6233 }
 0x976   : > { %v6236_v41 = vunpack.i.h.bf16 %v6234_v28  ;;  %v6235_v3 = vunpack.i.l.bf16 %v6234_v28 }
 0x978   : > { %v3462_v57 = vsel %vm352_vm3, %v6235_v3, %v6240_v44  ;;  %v3463_v11 = vsel %vm352_vm3, %v6236_v41, %v6241_v32 }
 0x979   : > { %v6244_v7 = vpop.permute.xlu1 %6243  ;;  %v3487_v9 = vpack.c.bf16 %v3463_v11, %v3462_v57 }
 0x97a   : > { %v6246_v22 = vunpack.i.h.bf16 %v6244_v7  ;;  %v6245_v26 = vunpack.i.l.bf16 %v6244_v7 }
 0x97b   : > { %3646 = vmatprep.subr.bf16.mxu0 %v3487_v9 }
 0x97c   : > { %v3474_v42 = vsel %vm352_vm3, %v6245_v26, %v6235_v3  ;;  %v3475_v33 = vsel %vm352_vm3, %v6246_v22, %v6236_v41  ;;  %v3450_v13 = vsel %vm352_vm3, %v6240_v44, %v6245_v26  ;;  %v3451_v50 = vsel %vm352_vm3, %v6241_v32, %v6246_v22 }
 0x97d   : > { %v3486_v30 = vpack.c.bf16 %v3475_v33, %v3474_v42  ;;  %v6249_v60 = vpop.permute.xlu0 %6248  ;;  %v6254_v28 = vpop.permute.xlu1 %6253  ;;  %v3488_v57 = vpack.c.bf16 %v3451_v50, %v3450_v13  ;;  %v6216_v3 = vunpack.i.h.bf16 %v6214_v4  ;;  %v3478_v32 = vsel %vm352_vm3, %v6225_v8, %v6215_v40 }
 0x97e   : > { %v6251_v11 = vunpack.i.h.bf16 %v6249_v60  ;;  %v6250_v7 = vunpack.i.l.bf16 %v6249_v60  ;;  %v6256_v9 = vunpack.i.h.bf16 %v6254_v28  ;;  %v6255_v48 = vunpack.i.l.bf16 %v6254_v28 }
 0x97f   : > { %3647 = vmatpush1.bf16.msra.mxu0 %v3486_v30  ;;  %5253 = vmatprep.subr.bf16.mxu1 %v3488_v57  ;;  %v3466_v42 = vsel %vm352_vm3, %v6215_v40, %v6220_v59  ;;  %v3467_v4 = vsel %vm352_vm3, %v6216_v3, %v6221_v49  ;;  %v6231_v30 = vunpack.i.h.bf16 %v8893_v54  ;;  %v6230_v60 = vunpack.i.l.bf16 %v8893_v54 }
 0x980   : > { %5254 = vmatpush3.bf16.msra.mxu1 %v3488_v57  ;;  %v3464_v44 = vsel %vm352_vm3, %v6250_v7, %v6255_v48  ;;  %v3465_v18 = vsel %vm352_vm3, %v6251_v11, %v6256_v9  ;;  %v3454_v28 = vsel %vm352_vm3, %v6220_v59, %v6225_v8  ;;  %v3455_v57 = vsel %vm352_vm3, %v6221_v49, %v6226_v52 }
 0x981   : > { %v6259_v41 = vpop.permute.xlu1 %6258  ;;  %v6264_v22 = vpop.permute.xlu0 %6263  ;;  %v3490_v26 = vpack.c.bf16 %v3465_v18, %v3464_v44  ;;  %v3479_v54 = vsel %vm352_vm3, %v6226_v52, %v6216_v3  ;;  %v3493_v49 = vpack.c.bf16 %v3467_v4, %v3466_v42 }
 0x982   : > { %v6261_v55 = vunpack.i.h.bf16 %v6259_v41  ;;  %v6260_v33 = vunpack.i.l.bf16 %v6259_v41  ;;  %v6266_v13 = vunpack.i.h.bf16 %v6264_v22  ;;  %v6265_v50 = vunpack.i.l.bf16 %v6264_v22 }
 0x983   : > { %3648 = vmatprep.subr.bf16.mxu0 %v3490_v26 }
 0x984   : > { %v3477_v40 = vsel %vm352_vm3, %v6266_v13, %v6251_v11  ;;  %v3476_v44 = vsel %vm352_vm3, %v6265_v50, %v6250_v7  ;;  %v3452_v18 = vsel %vm352_vm3, %v6255_v48, %v6265_v50  ;;  %v3453_v41 = vsel %vm352_vm3, %v6256_v9, %v6266_v13 }
 0x985   : > { %v3489_v22 = vpack.c.bf16 %v3477_v40, %v3476_v44  ;;  %v6274_v59 = vpop.permute.xlu1 %6273  ;;  %v6269_v8 = vpop.permute.xlu0 %6268  ;;  %v3491_v26 = vpack.c.bf16 %v3453_v41, %v3452_v18  ;;  %v3468_v11 = vsel %vm352_vm3, %v6230_v60, %v6260_v33  ;;  %v3469_v7 = vsel %vm352_vm3, %v6231_v30, %v6261_v55 }
 0x986   : > { %v6271_v62 = vunpack.i.h.bf16 %v6269_v8  ;;  %v6270_v56 = vunpack.i.l.bf16 %v6269_v8  ;;  %v3494_v48 = vpack.c.bf16 %v3455_v57, %v3454_v28  ;;  %v3492_v9 = vpack.c.bf16 %v3479_v54, %v3478_v32 }
 0x987   : > { %3649 = vmatpush1.bf16.msra.mxu0 %v3489_v22  ;;  %5255 = vmatprep.subr.bf16.mxu1 %v3491_v26  ;;  %v6275_v13 = vunpack.i.l.bf16 %v6274_v59  ;;  %v3496_v40 = vpack.c.bf16 %v3469_v7, %v3468_v11  ;;  %v6276_v41 = vunpack.i.h.bf16 %v6274_v59 }
 0x988   : > { %3650 = vmatprep.subr.bf16.mxu0 %v3493_v49  ;;  %5256 = vmatpush3.bf16.msra.mxu1 %v3491_v26  ;;  %v3456_v52 = vsel %vm352_vm3, %v6260_v33, %v6270_v56  ;;  %v3481_v3 = vsel %vm352_vm3, %v6271_v62, %v6231_v30  ;;  %v3480_v42 = vsel %vm352_vm3, %v6270_v56, %v6230_v60 }
 0x989   : > { %v6284_v4 = vpop.permute.xlu1 %6283  ;;  %v6279_v50 = vpop.permute.xlu0 %6278  ;;  %5257 = vmatprep.subr.bf16.mxu1 %v3494_v48  ;;  %v3457_v28 = vsel %vm352_vm3, %v6261_v55, %v6271_v62  ;;  %v3495_v54 = vpack.c.bf16 %v3481_v3, %v3480_v42 }
 0x98a   : > { %v6286_v32 = vunpack.i.h.bf16 %v6284_v4  ;;  %v6285_v57 = vunpack.i.l.bf16 %v6284_v4  ;;  %v6281_v44 = vunpack.i.h.bf16 %v6279_v50  ;;  %v6280_v18 = vunpack.i.l.bf16 %v6279_v50 }
 0x98b   : > { %3651 = vmatpush1.bf16.msra.mxu0 %v3492_v9  ;;  %v3497_v33 = vpack.c.bf16 %v3457_v28, %v3456_v52 }
 0x98c   : > { %v3482_v30 = vsel %vm352_vm3, %v6285_v57, %v6275_v13  ;;  %3652 = vmatprep.subr.bf16.mxu0 %v3496_v40  ;;  %5258 = vmatpush3.bf16.msra.mxu1 %v3494_v48  ;;  %v3470_v56 = vsel %vm352_vm3, %v6275_v13, %v6280_v18  ;;  %v3483_v60 = vsel %vm352_vm3, %v6286_v32, %v6276_v41 }
 0x98d   : > { %v6294_v62 = vpop.permute.xlu1 %6293  ;;  %v6289_v55 = vpop.permute.xlu0 %6288  ;;  %5259 = vmatprep.subr.bf16.mxu1 %v3497_v33  ;;  %v3471_v22 = vsel %vm352_vm3, %v6276_v41, %v6281_v44  ;;  %v3458_v59 = vsel %vm352_vm3, %v6280_v18, %v6285_v57  ;;  %v3459_v8 = vsel %vm352_vm3, %v6281_v44, %v6286_v32  ;;  %v3498_v3 = vpack.c.bf16 %v3483_v60, %v3482_v30  ;;  %v3637_v30 = vld [vmem:[%s9729_s2 + $0x190] sm:$0xff]  ;;  %v3630_v60 = vld [vmem:[%s9729_s2 + $0x198] sm:$0xff] }
 0x98e   : > { %v6296_v26 = vunpack.i.h.bf16 %v6294_v62  ;;  %v6295_v49 = vunpack.i.l.bf16 %v6294_v62  ;;  %v6291_v11 = vunpack.i.h.bf16 %v6289_v55  ;;  %v6290_v7 = vunpack.i.l.bf16 %v6289_v55  ;;  %v3631_v62 = vld [vmem:[%s9729_s2 + $0x1a0] sm:$0xff] }
 0x98f   : > { %3653 = vmatpush1.bf16.msra.mxu0 %v3495_v54  ;;  %v3499_v48 = vpack.c.bf16 %v3471_v22, %v3470_v56  ;;  %v3500_v9 = vpack.c.bf16 %v3459_v8, %v3458_v59  ;;  %v9906_v55 = vpack.c.bf16 %v8696_v58, %v8700_v61  ;;  %v3639_v8 = vpack.c.bf16 %v3637_v30, %v3637_v30 }
 0x990   : > { %5260 = vmatpush3.bf16.msra.mxu1 %v3497_v33  ;;  %v3472_v13 = vsel %vm352_vm3, %v6290_v7, %v6295_v49  ;;  %v3473_v52 = vsel %vm352_vm3, %v6291_v11, %v6296_v26  ;;  %v9908_v58 = vpack.c.bf16 %v8734_v53, %v8738_v47 }
 0x991   : > { %3654 = vmatprep.subr.bf16.mxu0 %v3499_v48  ;;  %v8961_v42 = vpop.permute.xlu1 %6303  ;;  %v6299_v4 = vpop.permute.xlu0 %6298  ;;  %5261 = vmatprep.subr.bf16.mxu1 %v3500_v9  ;;  %v3502_v50 = vpack.c.bf16 %v3473_v52, %v3472_v13 }
 0x992   : > { %v6301_v40 = vunpack.i.h.bf16 %v6299_v4  ;;  %v6300_v28 = vunpack.i.l.bf16 %v6299_v4  ;;  %v6306_v48 = vunpack.i.h.bf16 %v8961_v42 }
 0x993   : > { %3655 = vmatpush1.bf16.msra.mxu0 %v3498_v3 }
 0x994   : > { %v3484_v32 = vsel %vm352_vm3, %v6300_v28, %v6290_v7  ;;  %v3485_v57 = vsel %vm352_vm3, %v6301_v40, %v6291_v11  ;;  %3656 = vmatprep.subr.bf16.mxu0 %v3502_v50  ;;  %5262 = vmatpush3.bf16.msra.mxu1 %v3500_v9  ;;  %v3460_v44 = vsel %vm352_vm3, %v6295_v49, %v6300_v28 }
 0x995   : > { %v3501_v18 = vpack.c.bf16 %v3485_v57, %v3484_v32  ;;  %v6314_v41 = vpop.permute.xlu1 %6313  ;;  %v6309_v33 = vpop.permute.xlu0 %6308  ;;  %v3461_v54 = vsel %vm352_vm3, %v6296_v26, %v6301_v40  ;;  %v8989_v26 = vpack.c.bf16 %v3631_v62, %v3630_v60  ;;  %v9907_v49 = vpack.c.bf16 %v8718_v12, %v8714_v43 }
 0x996   : > { %v3503_v56 = vpack.c.bf16 %v3461_v54, %v3460_v44  ;;  %v9909_v43 = vpack.c.bf16 %v8756_v63, %v8752_v6  ;;  %v9910_v12 = vpack.c.bf16 %v8614_v16, %v8606_v38  ;;  %v9912_v6 = vpack.c.bf16 %v8646_v19, %v8638_v25 }
 0x997   : > { %3657 = vmatpush1.bf16.msra.mxu0 %v3501_v18  ;;  %v6316_v38 = vunpack.i.h.bf16 %v6314_v41  ;;  %v6315_v16 = vunpack.i.l.bf16 %v6314_v41  ;;  %v6310_v63 = vunpack.i.l.bf16 %v6309_v33  ;;  %v6311_v7 = vunpack.i.h.bf16 %v6309_v33 }
 0x998   : > { %3751 = vmatprep.subr.bf16.mxu0 %v9906_v55  ;;  %5263 = vmatprep.subr.bf16.mxu1 %v3503_v56  ;;  %v9914_v25 = vpack.c.bf16 %v8776_v24, %v8780_v0  ;;  %v3851_v24 = vld [vmem:[%s9729_s2 + $0x1b8] sm:$0xff]  ;;  %v9916_v44 = vpack.c.bf16 %v8824_v35, %v8820_v46 }
 0x999   : > { %v8983_v22 = vpop.permute.xlu1 %6323  ;;  %v8985_v59 = vpop.permute.xlu0 %6318  ;;  %5264 = vmatpush3.bf16.msra.mxu1 %v3503_v56  ;;  %v3577_v52 = vsel %vm416_vm5, %v6306_v48, %v6311_v7  ;;  %v3600_v3 = vsel %vm416_vm5, %v6310_v63, %v6315_v16 }
 0x99a   : > { %4871 = vmatmul.mubr.msk.bf16.vlgmr.msra.gmra.mrb[52].mxu0 %vm2885_vm8, %v8850_v17  ;;  %5269 = vmatprep.subr.bf16.mxu1 %v8726_v5  ;;  %v6325_v33 = vunpack.i.l.bf16 %v8983_v22  ;;  %v6326_v60 = vunpack.i.h.bf16 %v8983_v22  ;;  %v9917_v22 = vpack.c.bf16 %v8803_v15, %v8807_v21 }
 0x99b   : > { %3752 = vmatpush1.bf16.msra.mxu0 %v9907_v49  ;;  %3688 = vmatprep.mubr.bf16.mxu0 %v9844_v51 }
 0x99c   : > { %3753 = vmatprep.subr.bf16.mxu0 %v9908_v58  ;;  %5266 = vmatmul.mubr.msk.bf16.vlgmr.msra.gmra.mrb[76].mxu1 %vm2885_vm8, %v3639_v8 }
 0x99d   : > { %v9000_v61 = vpop.permute.xlu1 %6333  ;;  %v9002_v11 = vpop.permute.xlu0 %6328  ;;  %5270 = vmatpush3.bf16.msra.mxu1 %v8726_v5  ;;  %5281 = vmatprep.mubr.msk.bf16.mxu1 %vm2885_vm8, %v8989_v26  ;;  %v9911_v5 = vpack.c.bf16 %v8609_v2, %v8603_v20  ;;  %v6305_v20 = vunpack.i.l.bf16 %v8961_v42  ;;  %v9913_v2 = vpack.c.bf16 %v8641_v1, %v8635_v34  ;;  %v3632_v34 = vld [vmem:[%s9729_s2 + $0x1a8] sm:$0xff]  ;;  %v3850_v1 = vld [vmem:[%s9729_s2 + $0x1b0] sm:$0xff]  ;;  %v3601_v42 = vsel %vm416_vm5, %v6311_v7, %v6316_v38 }
 0x99e   : > { %5271 = vmatprep.subr.bf16.mxu1 %v8766_v29  ;;  %v6335_v0 = vunpack.i.l.bf16 %v9000_v61  ;;  %v9080_v18 = vpack.c.bf16 %v3632_v34, %v3632_v34  ;;  %v9082_v41 = vpack.c.bf16 %v3851_v24, %v3850_v1  ;;  %v6336_v54 = vunpack.i.h.bf16 %v9000_v61 }
 0x99f   : > { %3754 = vmatpush1.bf16.msra.mxu0 %v9909_v43  ;;  %v3588_v19 = vsel %vm416_vm5, %v6315_v16, %v6305_v20  ;;  %v3576_v13 = vsel %vm416_vm5, %v6305_v20, %v6310_v63  ;;  %v6330_v30 = vunpack.i.l.bf16 %v9002_v11  ;;  %v3614_v35 = vpack.c.bf16 %v3601_v42, %v3600_v3 }
 0x9a0   : > { %3755 = vmatprep.subr.bf16.mxu0 %v9910_v12  ;;  %v3613_v56 = vpack.c.bf16 %v3577_v52, %v3576_v13  ;;  %v9093_v46 = vsel %vm416_vm5, %v6335_v0, %v6325_v33  ;;  %v6331_v62 = vunpack.i.h.bf16 %v9002_v11  ;;  %v3593_v11 = vsel %vm416_vm5, %v6336_v54, %v6326_v60 }
 0x9a1   : > { %v9014_v53 = vpop.permute.xlu1 %6348  ;;  %v9016_v47 = vpop.permute.xlu0 %6338  ;;  %5272 = vmatpush3.bf16.msra.mxu1 %v8766_v29  ;;  %v3580_v12 = vsel %vm416_vm5, %v6325_v33, %v6330_v30 }
 0x9a2   : > { %4872 = vmatmul.mubr.msk.bf16.gmra.mrb[56].mxu0 %vm2885_vm8, %v3639_v8  ;;  %5273 = vmatprep.subr.bf16.mxu1 %v8650_v37  ;;  %v6351_v4 = vunpack.i.h.bf16 %v9014_v53  ;;  %v6350_v50 = vunpack.i.l.bf16 %v9014_v53  ;;  %v6341_v40 = vunpack.i.h.bf16 %v9016_v47  ;;  %v6340_v28 = vunpack.i.l.bf16 %v9016_v47 }
 0x9a3   : > { %3756 = vmatpush1.bf16.msra.mxu0 %v9911_v5  ;;  %3783 = vmatprep.mubr.bf16.mxu0 %v9844_v51 }
 0x9a4   : > { %3757 = vmatprep.subr.bf16.mxu0 %v9912_v6  ;;  %v3581_v6 = vsel %vm416_vm5, %v6326_v60, %v6331_v62 }
 0x9a5   : > { %v9028_v17 = vpop.permute.xlu1 %6353  ;;  %v9030_v29 = vpop.permute.xlu0 %6343  ;;  %5274 = vmatpush3.bf16.msra.mxu1 %v8650_v37  ;;  %v3589_v37 = vsel %vm416_vm5, %v6316_v38, %v6306_v48  ;;  %v3604_v38 = vsel %vm416_vm5, %v6330_v30, %v6335_v0 }
 0x9a6   : > { %5275 = vmatprep.subr.bf16.mxu1 %v8666_v39  ;;  %v3612_v57 = vpack.c.bf16 %v3589_v37, %v3588_v19  ;;  %v6356_v8 = vunpack.i.h.bf16 %v9028_v17  ;;  %v6355_v49 = vunpack.i.l.bf16 %v9028_v17  ;;  %v6346_v58 = vunpack.i.h.bf16 %v9030_v29 }
 0x9a7   : > { %3758 = vmatpush1.bf16.msra.mxu0 %v9913_v2  ;;  %v6345_v61 = vunpack.i.l.bf16 %v9030_v29  ;;  %v3619_v19 = vpack.c.bf16 %v3581_v6, %v3580_v12 }
 0x9a8   : > { %3759 = vmatprep.subr.bf16.mxu0 %v9914_v25  ;;  %v3583_v17 = vsel %vm416_vm5, %v6346_v58, %v6356_v8  ;;  %v3618_v25 = vpack.c.bf16 %v3593_v11, %v9093_v46 }
 0x9a9   : > { %v9046_v9 = vpop.permute.xlu0 %6358  ;;  %5276 = vmatpush3.bf16.msra.mxu1 %v8666_v39  ;;  %v9071_v32 = vpop.permute.xlu1 %6363  ;;  %v9915_v39 = vpack.c.bf16 %v8792_v14, %v8788_v31  ;;  %v6321_v31 = vunpack.i.h.bf16 %v8985_v59  ;;  %v6320_v14 = vunpack.i.l.bf16 %v8985_v59  ;;  %v3578_v59 = vsel %vm416_vm5, %v6340_v28, %v6350_v50 }
 0x9aa   : > { %5277 = vmatprep.subr.bf16.mxu1 %v8799_v27  ;;  %v6360_v16 = vunpack.i.l.bf16 %v9046_v9  ;;  %v3582_v63 = vsel %vm416_vm5, %v6345_v61, %v6355_v49  ;;  %v6366_v37 = vunpack.i.h.bf16 %v9071_v32 }
 0x9ab   : > { %3760 = vmatpush1.bf16.msra.mxu0 %v9915_v39  ;;  %v3590_v15 = vsel %vm416_vm5, %v6320_v14, %v6340_v28  ;;  %v3591_v21 = vsel %vm416_vm5, %v6321_v31, %v6341_v40  ;;  %v3602_v47 = vsel %vm416_vm5, %v6350_v50, %v6320_v14  ;;  %v3603_v5 = vsel %vm416_vm5, %v6351_v4, %v6321_v31 }
 0x9ac   : > { %3761 = vmatprep.subr.bf16.mxu0 %v9916_v44  ;;  %v3615_v29 = vpack.c.bf16 %v3591_v21, %v3590_v15  ;;  %v3617_v2 = vpack.c.bf16 %v3603_v5, %v3602_v47  ;;  %v3622_v1 = vpack.c.bf16 %v3583_v17, %v3582_v63  ;;  %v3594_v24 = vsel %vm416_vm5, %v6360_v16, %v6345_v61  ;;  %v3852_v15 = vld [vmem:[%s9729_s2 + $0x1c0] sm:$0xff] }
 0x9ad   : > { %5278 = vmatpush3.bf16.msra.mxu1 %v8799_v27  ;;  %v9096_v55 = vpop.permute.xlu0 %6368  ;;  %v3579_v27 = vsel %vm416_vm5, %v6341_v40, %v6351_v4  ;;  %v9116_v43 = vpop.permute.xlu1 %6373  ;;  %v3606_v3 = vsel %vm416_vm5, %v6355_v49, %v6360_v16  ;;  %v3854_v21 = vpack.c.bf16 %v3852_v15, %v3852_v15 }
 0x9ae   : > { %5279 = vmatprep.subr.bf16.mxu1 %v8834_v45  ;;  %v3616_v53 = vpack.c.bf16 %v3579_v27, %v3578_v59  ;;  %v6371_v7 = vunpack.i.h.bf16 %v9096_v55  ;;  %v6370_v48 = vunpack.i.l.bf16 %v9096_v55  ;;  %v6375_v52 = vunpack.i.l.bf16 %v9116_v43 }
 0x9af   : > { %3762 = vmatpush1.bf16.msra.mxu0 %v9917_v22  ;;  %v6376_v42 = vunpack.i.h.bf16 %v9116_v43 }
 0x9b0   : > { %3861 = vmatprep.subr.bf16.mxu0 %v3613_v56  ;;  %v3585_v40 = vsel %vm416_vm5, %v6366_v37, %v6371_v7  ;;  %v3608_v31 = vsel %vm416_vm5, %v6370_v48, %v6375_v52 }
 0x9b1   : > { %5280 = vmatpush3.bf16.msra.mxu1 %v8834_v45  ;;  %v3605_v45 = vsel %vm416_vm5, %v6331_v62, %v6336_v54  ;;  %v6384_v20 = vpop.permute.xlu0 %6383  ;;  %v6379_v13 = vpop.permute.xlu1 %6378  ;;  %v3597_v56 = vsel %vm416_vm5, %v6376_v42, %v6366_v37 }
 0x9b2   : > { %4875 = vmatmul.mubr.msk.bf16.vlgmr.msra.gmra.mrb[52].mxu0 %vm2885_vm8, %v8989_v26  ;;  %5285 = vmatprep.subr.bf16.mxu1 %v3614_v35  ;;  %v6361_v26 = vunpack.i.h.bf16 %v9046_v9  ;;  %v6365_v9 = vunpack.i.l.bf16 %v9071_v32  ;;  %v3620_v34 = vpack.c.bf16 %v3605_v45, %v3604_v38  ;;  %v6381_v28 = vunpack.i.h.bf16 %v6379_v13 }
 0x9b3   : > { %3862 = vmatpush1.bf16.msra.mxu0 %v3612_v57  ;;  %3793 = vmatprep.mubr.bf16.mxu0 %v9844_v51  ;;  %v6380_v32 = vunpack.i.l.bf16 %v6379_v13  ;;  %v6386_v39 = vunpack.i.h.bf16 %v6384_v20  ;;  %v6385_v57 = vunpack.i.l.bf16 %v6384_v20 }
 0x9b4   : > { %3863 = vmatprep.subr.bf16.mxu0 %v3616_v53  ;;  %5282 = vmatmul.mubr.msk.bf16.vlgmr.msra.gmra.mrb[80].mxu1 %vm2885_vm8, %v9080_v18  ;;  %v3595_v0 = vsel %vm416_vm5, %v6361_v26, %v6346_v58  ;;  %v3607_v4 = vsel %vm416_vm5, %v6356_v8, %v6361_v26  ;;  %v3584_v50 = vsel %vm416_vm5, %v6365_v9, %v6370_v48 }
 0x9b5   : > { %5286 = vmatpush3.bf16.msra.mxu1 %v3614_v35  ;;  %5297 = vmatprep.mubr.msk.bf16.mxu1 %vm2885_vm8, %v9082_v41  ;;  %v6389_v44 = vpop.permute.xlu0 %6388  ;;  %v3621_v33 = vpack.c.bf16 %v3595_v0, %v3594_v24  ;;  %v3596_v54 = vsel %vm416_vm5, %v6375_v52, %v6365_v9  ;;  %v3623_v30 = vpack.c.bf16 %v3607_v4, %v3606_v3 }
 0x9b6   : > { %5287 = vmatprep.subr.bf16.mxu1 %v3617_v2  ;;  %v3625_v60 = vpack.c.bf16 %v3585_v40, %v3584_v50  ;;  %v6391_v14 = vunpack.i.h.bf16 %v6389_v44  ;;  %v6390_v35 = vunpack.i.l.bf16 %v6389_v44  ;;  %v3586_v46 = vsel %vm416_vm5, %v6385_v57, %v6380_v32 }
 0x9b7   : > { %3864 = vmatpush1.bf16.msra.mxu0 %v3615_v29  ;;  %v3587_v62 = vsel %vm416_vm5, %v6386_v39, %v6381_v28  ;;  %v3624_v55 = vpack.c.bf16 %v3597_v56, %v3596_v54 }
 0x9b8   : > { %3865 = vmatprep.subr.bf16.mxu0 %v3619_v19  ;;  %v3628_v59 = vpack.c.bf16 %v3587_v62, %v3586_v46  ;;  %v3598_v27 = vsel %vm416_vm5, %v6390_v35, %v6385_v57  ;;  %v3599_v8 = vsel %vm416_vm5, %v6391_v14, %v6386_v39  ;;  %v3610_v49 = vsel %vm416_vm5, %v6380_v32, %v6390_v35 }
 0x9b9   : > { %5288 = vmatpush3.bf16.msra.mxu1 %v3617_v2  ;;  %v3611_v58 = vsel %vm416_vm5, %v6381_v28, %v6391_v14  ;;  %v3627_v61 = vpack.c.bf16 %v3599_v8, %v3598_v27 }
 0x9ba   : > { %4876 = vmatmul.mubr.msk.bf16.gmra.mrb[60].mxu0 %vm2885_vm8, %v9080_v18  ;;  %5289 = vmatprep.subr.bf16.mxu1 %v3620_v34  ;;  %v3609_v18 = vsel %vm416_vm5, %v6371_v7, %v6376_v42  ;;  %v3629_v11 = vpack.c.bf16 %v3611_v58, %v3610_v49 }
 0x9bb   : > { %3866 = vmatpush1.bf16.msra.mxu0 %v3618_v25  ;;  %3893 = vmatprep.mubr.bf16.mxu0 %v9844_v51  ;;  %v3626_v22 = vpack.c.bf16 %v3609_v18, %v3608_v31 }
 0x9bc   : > { %3867 = vmatprep.subr.bf16.mxu0 %v3622_v1 }
 0x9bd   : > { %5290 = vmatpush3.bf16.msra.mxu1 %v3620_v34 }
 0x9be   : > { %5291 = vmatprep.subr.bf16.mxu1 %v3623_v30 }
 0x9bf   : > { %3868 = vmatpush1.bf16.msra.mxu0 %v3621_v33 }
 0x9c0   : > { %3869 = vmatprep.subr.bf16.mxu0 %v3625_v60 }
 0x9c1   : > { %5292 = vmatpush3.bf16.msra.mxu1 %v3623_v30 }
 0x9c2   : > { %5293 = vmatprep.subr.bf16.mxu1 %v3626_v22  ;;  %v3975_v9 = vpop.permute.xlu1 %3974 }
 0x9c3   : > { %3870 = vmatpush1.bf16.msra.mxu0 %v3624_v55  ;;  %v9918_v55 = vld [vmem:[#allocation32_spill] sm:$0xff] }
 0x9c4   : > { %3871 = vmatprep.subr.bf16.mxu0 %v3628_v59 }
 0x9c5   : > { %5294 = vmatpush3.bf16.msra.mxu1 %v3626_v22 }
 0x9c6   : > { %5295 = vmatprep.subr.bf16.mxu1 %v3629_v11  ;;  %v3980_v24 = vpop.permute.xlu0 %3979  ;;  %v3985_v39 = vpop.permute.xlu1 %3984 }
 0x9c7   : > { %3872 = vmatpush1.bf16.msra.mxu0 %v3627_v61 }
 0x9c9   : > { %5296 = vmatpush3.bf16.msra.mxu1 %v3629_v11 }
 0x9ca   : > { %4879 = vmatmul.mubr.msk.bf16.vlgmr.msra.gmra.mrb[52].mxu0 %vm2885_vm8, %v9082_v41  ;;  %5301 = vmatprep.subr.bf16.mxu1 %v9839_v36 }
 0x9cb   : > { %3903 = vmatprep.mubr.bf16.mxu0 %v9844_v51 }
 0x9cc   : > { %5298 = vmatmul.mubr.msk.bf16.vlgmr.msra.gmra.mrb[84].mxu1 %vm2885_vm8, %v3854_v21 }
 0x9cd   : > { %5311 = vmatprep.mubr.msk.bf16.mxu1 %vm6594_vm2, %v9839_v36 }
 0x9d2   : > { %4880 = vmatmul.mubr.msk.bf16.gmra.mrb[64].mxu0 %vm2885_vm8, %v3854_v21 }
 0x9d3   : > { %4323 = vmatprep.mubr.bf16.mxu0 %v9844_v51 }
 0xa6f   : > { %v5267_v43 = vpop.f32.mrb[76].mxu1 }
 0xa70   : > { %v3731_v12 = vpop.f32.mrb[77].mxu1 }
 0xa71   : > { %v5268_v53 = vpop.f32.mrb[78].mxu1 }
 0xa72   : > { %v3734_v47 = vpop.f32.mrb[79].mxu1 }
 0xa75   : > { %v3690_v5 = vpop.f32.mrb[56].mxu0 }
 0xa76   : > { %v3692_v6 = vpop.f32.mrb[57].mxu0 }
 0xa77   : > { %v3694_v41 = vpop.f32.mrb[58].mxu0 }
 0xa78   : > { %v3695_v38 = vpop.f32.mrb[59].mxu0 }
 0xa87   : > { %v5283_v45 = vpop.f32.mrb[80].mxu1 }
 0xa88   : > { %v3845_v26 = vadd.f32 %v5283_v45, %v5267_v43  ;;  %v3836_v16 = vpop.f32.mrb[81].mxu1 }
 0xa89   : > { %v3837_v63 = vadd.f32 %v3836_v16, %v3731_v12  ;;  %v5284_v17 = vpop.f32.mrb[82].mxu1 }
 0xa8a   : > { %v3839_v29 = vpop.f32.mrb[83].mxu1 }
 0xa8b   : > { %v3840_v7 = vadd.f32 %v3839_v29, %v3734_v47  ;;  %v9919_v47 = vld [vmem:[#allocation30_spill] sm:$0xff]  ;;  %v6599_v29 = vmov 18  }
 0xa8d   : > { %v3795_v48 = vpop.f32.mrb[60].mxu0 }
 0xa8e   : > { %v3796_v20 = vadd.f32 %v3795_v48, %v3690_v5  ;;  %v3797_v2 = vpop.f32.mrb[61].mxu0 }
 0xa8f   : > { %v3798_v25 = vadd.f32 %v3797_v2, %v3692_v6  ;;  %v3799_v19 = vpop.f32.mrb[62].mxu0 }
 0xa90   : > { %v3800_v37 = vpop.f32.mrb[63].mxu0 }
 0xa91   : > { %v1400_v37 = vld [vmem:[%s9730_s3 + $0x28] sm:$0xff] }
 0xa9d   : > { %v3895_v13 = vpop.f32.mrb[52].mxu0 }
 0xa9e   : > { %v3987_v34 = vadd.f32 %v3975_v9, %v3895_v13  ;;  %v3897_v1 = vpop.f32.mrb[53].mxu0 }
 0xa9f   : > { %v3988_v0 = vadd.f32 %v3975_v9, %v3897_v1  ;;  %v3899_v52 = vpop.f32.mrb[54].mxu0  ;;  %v5299_v42 = vpop.f32.mrb[84].mxu1 }
 0xaa0   : > { %v3996_v3 = vmax.f32 %v3987_v34, 0.0  ;;  %v3990_v4 = vadd.f32 %v3980_v24, %v3899_v52  ;;  %v3901_v50 = vpop.f32.mrb[55].mxu0  ;;  %v3968_v40 = vadd.f32 %v5299_v42, %v3845_v26  ;;  %v3946_v28 = vpop.f32.mrb[85].mxu1 }
 0xaa1   : > { %v3991_v32 = vadd.f32 %v3980_v24, %v3901_v50  ;;  %v3962_v44 = vadd.f32 %v3946_v28, %v3837_v63  ;;  %v5300_v33 = vpop.f32.mrb[86].mxu1  ;;  %v3997_v54 = vmax.f32 %v3988_v0, 0.0 }
 0xaa2   : > { %v3999_v57 = vmax.f32 %v3990_v4, 0.0  ;;  %v3995_v30 = vadd.f32 %v3985_v39, %v3968_v40  ;;  %v3949_v60 = vpop.f32.mrb[87].mxu1  ;;  %v9199_v31 = vmul.f32 %v3996_v3, %v9867_v23 }
 0xaa3   : > { %v4000_v56 = vmax.f32 %v3991_v32, 0.0  ;;  %v3989_v14 = vadd.f32 %v3975_v9, %v3962_v44  ;;  %v3965_v35 = vadd.f32 %v3949_v60, %v3840_v7  ;;  %v9210_v11 = vmul.f32 %v3997_v54, %v9918_v55  ;;  %v1401_v9 = vld [vmem:[%s9730_s3 + $0x30] sm:$0xff] }
 0xaa4   : > { %v9202_v18 = vmul.f32 %v3999_v57, %v9867_v23  ;;  %v4004_v46 = vmax.f32 %v3995_v30, 0.0 }
 0xaa5   : > { %v3905_v62 = vpop.f32.mrb[64].mxu0  ;;  %v9205_v22 = vmul.f32 %v4000_v56, %v9918_v55  ;;  %v3992_v59 = vadd.f32 %v3980_v24, %v3965_v35  ;;  %v3998_v15 = vmax.f32 %v3989_v14, 0.0 }
 0xaa6   : > { %v3966_v27 = vadd.f32 %v3905_v62, %v3796_v20  ;;  %v3907_v8 = vpop.f32.mrb[65].mxu0  ;;  %v6397_v49 = vpack.i.bf16 %v9202_v18, %v9199_v31  ;;  %v9215_v5 = vmul.f32 %v4004_v46, %v9919_v47 }
 0xaa7   : > { %v3967_v58 = vadd.f32 %v3907_v8, %v3798_v25  ;;  %v3909_v61 = vpop.f32.mrb[66].mxu0  ;;  %v4001_v21 = vmax.f32 %v3992_v59, 0.0  ;;  %v6402_v38 = vpack.i.bf16 %v9205_v22, %v9210_v11  ;;  %v9223_v26 = vmul.f32 %v3998_v15, %v9919_v47 }
 0xaa8   : > { %v3993_v43 = vadd.f32 %v3985_v39, %v3966_v27  ;;  %6398 = vrot.lane.b32.xlu1 %v6397_v49, %s6591_s28  ;;  %v3910_v12 = vpop.f32.mrb[67].mxu0  ;;  %6393 = vrot.lane.b32.xlu0 %v6397_v49, %s6590_s27 }
 0xaa9   : > { %v3994_v53 = vadd.f32 %v3985_v39, %v3967_v58  ;;  %v9218_v6 = vmul.f32 %v4001_v21, %v9919_v47 }
 0xaaa   : > { %v4002_v41 = vmax.f32 %v3993_v43, 0.0 }
 0xaab   : > { %v4003_v45 = vmax.f32 %v3994_v53, 0.0  ;;  %v6442_v63 = vpack.i.bf16 %v9215_v5, %v9218_v6  ;;  %v6417_v7 = vpack.i.bf16 %v9218_v6, %v9223_v26 }
 0xaac   : > { %v9226_v16 = vmul.f32 %v4002_v41, %v9867_v23  ;;  %6403 = vrot.lane.b32.xlu1 %v6402_v38, %s6590_s27  ;;  %4030 = vrot.lane.b32.xlu0 %v9215_v5, %s6590_s27 }
 0xaad   : > { %v9232_v17 = vmul.f32 %v4003_v45, %v9918_v55 }
 0xaae   : > { %v6427_v48 = vpack.i.bf16 %v9226_v16, %v9202_v18 }
 0xaaf   : > { %v6422_v2 = vpack.i.bf16 %v9232_v17, %v9226_v16  ;;  %v6452_v25 = vpack.i.bf16 %v9232_v17, %v9205_v22 }
 0xab0   : > { %6418 = vrot.lane.b32.xlu1 %v6417_v7, %s6591_s28  ;;  %6408 = vrot.lane.b32.xlu0 %v6402_v38, %s6591_s28 }
 0xab4   : > { %6423 = vrot.lane.b32.xlu1 %v6422_v2, %s6590_s27  ;;  %6413 = vrot.lane.b32.xlu0 %v6417_v7, %s6590_s27 }
 0xab8   : > { %4057 = vrot.lane.b32.xlu1 %v9215_v5, %s6591_s28  ;;  %1404 = vperm.xlu0 %5570, %v1400_v37  }
 0xabc   : > { %1409 = vperm.xlu1 %5571, %v1401_v9   ;;  %6428 = vrot.lane.b32.xlu0 %v6427_v48, %s6592_s29 }
 0xac0   : > { %6443 = vrot.lane.b32.xlu1 %v6442_v63, %s6596_s30  ;;  %6433 = vrot.lane.b32.xlu0 %v6422_v2, %s6591_s28 }
 0xac4   : > { %6453 = vrot.lane.b32.xlu1 %v6452_v25, %s6592_s29  ;;  %6438 = vrot.lane.b32.xlu0 %v6442_v63, %s6592_s29 }
 0xac8   : > { %6448 = vrot.lane.b32.xlu0 %v6427_v48, %s6596_s30 }
 0xacc   : > { %6458 = vrot.lane.b32.xlu0 %v6452_v25, %s6596_s30 }
 0xb1a   : > { %v6399_v13 = vpop.permute.xlu1 %6398  ;;  %v6394_v34 = vpop.permute.xlu0 %6393 }
 0xb1b   : > { %v6396_v24 = vunpack.i.h.bf16 %v6394_v34  ;;  %v6395_v0 = vunpack.i.l.bf16 %v6394_v34  ;;  %v6401_v39 = vunpack.i.h.bf16 %v6399_v13  ;;  %v6400_v57 = vunpack.i.l.bf16 %v6399_v13 }
 0xb1e   : > { %v6404_v1 = vpop.permute.xlu1 %6403  ;;  %v9269_v52 = vpop.permute.xlu0 %4030 }
 0xb1f   : > { %v6406_v3 = vunpack.i.h.bf16 %v6404_v1  ;;  %v6405_v42 = vunpack.i.l.bf16 %v6404_v1 }
 0xb21   : > { %v9273_v4 = vsel %vm281_vm0, %v6396_v24, %v6406_v3  ;;  %v9277_v50 = vsel %vm281_vm0, %v6395_v0, %v6405_v42 }
 0xb22   : > { %v6419_v40 = vpop.permute.xlu1 %6418  ;;  %v6472_v28 = vpack.i.bf16 %v9273_v4, %v9277_v50  ;;  %v6409_v44 = vpop.permute.xlu0 %6408 }
 0xb23   : > { %v6421_v33 = vunpack.i.h.bf16 %v6419_v40  ;;  %v6420_v54 = vunpack.i.l.bf16 %v6419_v40  ;;  %v6411_v30 = vunpack.i.h.bf16 %v6409_v44  ;;  %v6410_v56 = vunpack.i.l.bf16 %v6409_v44  ;;  %v9922_v40 = vld [vmem:[#allocation37_spill] sm:$0xff] }
 0xb24   : > { %6473 = vrot.lane.b32.xlu0 %v6472_v28, %s6596_s30  ;;  %6463 = vrot.lane.b32.xlu1 %v6472_v28, %s6592_s29 }
 0xb25   : > { %v9287_v60 = vsel %vm300_vm1, %v6421_v33, %v6401_v39  ;;  %v9291_v14 = vsel %vm300_vm1, %v6420_v54, %v6400_v57  ;;  %v9295_v35 = vsel %vm300_vm1, %v6401_v39, %v6411_v30  ;;  %v9299_v46 = vsel %vm300_vm1, %v6400_v57, %v6410_v56  ;;  %v9923_v39 = vld [vmem:[#allocation34_spill] sm:$0xff] }
 0xb26   : > { %9920 = vst [vmem:[#allocation31_spill] sm:$0xff] %v9291_v14  ;;  %v9303_v62 = vsel %vm300_vm1, %v6411_v30, %v6421_v33  ;;  %v9307_v59 = vsel %vm300_vm1, %v6410_v56, %v6420_v54  ;;  %v6414_v27 = vpop.permute.xlu0 %6413  ;;  %v9311_v8 = vpack.i.bf16 %v9295_v35, %v9299_v46  ;;  %v9317_v15 = vpop.permute.xlu1 %6423  ;;  %v9323_v21 = vpack.i.bf16 %v9287_v60, %v9291_v14 }
 0xb27   : > { %v6416_v49 = vunpack.i.h.bf16 %v6414_v27  ;;  %v6415_v58 = vunpack.i.l.bf16 %v6414_v27  ;;  %v9315_v61 = vpack.i.bf16 %v9303_v62, %v9307_v59  ;;  %v6425_v45 = vunpack.i.l.bf16 %v9317_v15 }
 0xb28   : > { %6468 = vrot.lane.b32.xlu1 %v9311_v8, %s6592_s29  ;;  %v6426_v34 = vunpack.i.h.bf16 %v9317_v15  ;;  %v9925_v15 = vld [vmem:[#allocation38_spill] sm:$0xff] }
 0xb29   : > { %v9327_v43 = vsel %vm281_vm0, %v6416_v49, %v6396_v24  ;;  %v9331_v12 = vsel %vm281_vm0, %v6415_v58, %v6395_v0  ;;  %v9335_v53 = vsel %vm281_vm0, %v6405_v42, %v6415_v58  ;;  %v9339_v41 = vsel %vm281_vm0, %v6406_v3, %v6416_v49  ;;  %v9921_v3 = vld [vmem:[#allocation36_spill] sm:$0xff]  ;;  %v9924_v49 = vld [vmem:[#allocation33_spill] sm:$0xff] }
 0xb2a   : > { %v6477_v38 = vpack.i.bf16 %v9327_v43, %v9331_v12  ;;  %v6482_v63 = vpack.i.bf16 %v9339_v41, %v9335_v53  ;;  %v9362_v9 = vsel %vm281_vm0, %v9269_v52, %v6425_v45  ;;  %v4058_v1 = vpop.permute.xlu1 %4057  ;;  %v9374_v24 = vsel %vm281_vm0, %v6425_v45, %v6426_v34 }
 0xb2b   : > { %v6507_v13 = vpack.i.bf16 %v9199_v31, %v9362_v9  ;;  %v6517_v56 = vpack.i.bf16 %v9210_v11, %v9374_v24 }
 0xb2c   : > { %6478 = vrot.lane.b32.xlu0 %v6477_v38, %s6592_s29  ;;  %6493 = vrot.lane.b32.xlu1 %v9323_v21, %s6592_s29 }
 0xb30   : > { %6483 = vrot.lane.b32.xlu0 %v6482_v63, %s6592_s29  ;;  %6498 = vrot.lane.b32.xlu1 %v6482_v63, %s6596_s30  ;;  %v9926_v63 = vld [vmem:[#allocation35_spill] sm:$0xff] }
 0xb34   : > { %6488 = vrot.lane.b32.xlu0 %v9315_v61, %s6592_s29  ;;  %6508 = vrot.lane.b32.xlu1 %v6507_v13, %s6592_s29 }
 0xb37   : > { %v1405_v0 = vpop.permute.xlu0 %1404 }
 0xb38   : > { %v1412_v42 = vadd.f32 %v1405_v0, %v9921_v3  ;;  %v1413_v28 = vadd.f32 %v1405_v0, %v9922_v40  ;;  %v1414_v57 = vadd.f32 %v1405_v0, %v9923_v39  ;;  %6503 = vrot.lane.b32.xlu0 %v6477_v38, %s6596_s30 }
 0xb3a   : > { %v1418_v44 = vmax.f32 %v1412_v42, 0.0  ;;  %v1419_v33 = vmax.f32 %v1413_v28, 0.0  ;;  %v1420_v54 = vmax.f32 %v1414_v57, 0.0 }
 0xb3b   : > { %v1410_v30 = vpop.permute.xlu1 %1409  ;;  %v9382_v27 = vpop.permute.xlu0 %6428 }
 0xb3c   : > { %v1415_v58 = vadd.f32 %v1410_v30, %v9924_v49  ;;  %v1416_v45 = vadd.f32 %v1410_v30, %v9925_v15  ;;  %v1417_v3 = vadd.f32 %v1410_v30, %v9926_v63  ;;  %v1424_v40 = vmul.f32 %v1418_v44, %v9867_v23  ;;  %6518 = vrot.lane.b32.xlu0 %v6517_v56, %s6592_s29 }
 0xb3d   : > { %v1425_v0 = vmul.f32 %v1419_v33, %v9918_v55  ;;  %v1426_v39 = vmul.f32 %v1420_v54, %v9919_v47  ;;  %v6431_v20 = vunpack.i.h.bf16 %v9382_v27 }
 0xb3e   : > { %v1421_v38 = vmax.f32 %v1415_v58, 0.0  ;;  %v1422_v42 = vmax.f32 %v1416_v45, 0.0  ;;  %v1423_v28 = vmax.f32 %v1417_v3, 0.0 }
 0xb3f   : > { %v1430_v57 = vadd.f32 %v1425_v0, %v1424_v40  ;;  %v6434_v25 = vpop.permute.xlu0 %6433  ;;  %v9417_v54 = vpop.permute.xlu1 %6443 }
 0xb40   : > { %v1427_v37 = vmul.f32 %v1421_v38, %v9867_v23  ;;  %v1428_v49 = vmul.f32 %v1422_v42, %v9918_v55  ;;  %v6436_v15 = vunpack.i.h.bf16 %v6434_v25  ;;  %v6435_v2 = vunpack.i.l.bf16 %v6434_v25  ;;  %9927 = vst [vmem:[#allocation8_spill] sm:$0xff] %v9417_v54 }
 0xb41   : > { %v1431_v30 = vadd.f32 %v1430_v57, %v1426_v39  ;;  %v1429_v44 = vmul.f32 %v1423_v28, %v9919_v47  ;;  %v9791_v45 = vunpack.i.h.bf16 %v9417_v54  ;;  %v9792_v3 = vunpack.i.l.bf16 %v9417_v54 }
 0xb42   : > { %v1434_v63 = vadd.f32 %v1428_v49, %v1427_v37  ;;  %v9396_v33 = vsel %vm300_vm1, %v6436_v15, %v4058_v1  ;;  %v9400_v58 = vsel %vm300_vm1, %v6435_v2, %v6436_v15  ;;  %v9404_v23 = vsel %vm300_vm1, %v4058_v1, %v6435_v2 }
 0xb43   : > { %v9406_v55 = vpop.permute.xlu0 %6438  ;;  %4135 = vrot.lane.b32.xlu1 %v9404_v23, %s6592_s29  ;;  %v6527_v47 = vpack.i.bf16 %v9396_v33, %v9400_v58  ;;  %v9415_v37 = vsel %vm281_vm0, %v6426_v34, %v9269_v52  ;;  %v9459_v38 = vpop.permute.xlu1 %6453 }
 0xb44   : > { %v1435_v25 = vadd.f32 %v1434_v63, %v1429_v44  ;;  %v6537_v1 = vpack.i.bf16 %v9223_v26, %v9415_v37  ;;  %v6598_v44 = vmov 16  }
 0xb45   : > { %6528 = vrot.lane.b32.xlu0 %v6527_v47, %s6592_s29 }
 0xb46   : > { %6562 = vset.pattern.permute.xlu0 %v6598_v44 }
 0xb47   : > { %v9420_v2 = vpop.permute.xlu0 %6448  ;;  %6513 = vrot.lane.b32.xlu1 %v6507_v13, %s6596_s30 }
 0xb48   : > { %9928 = vst [vmem:[#allocation9_spill] sm:$0xff] %v9420_v2  ;;  %v9789_v40 = vunpack.i.h.bf16 %v9420_v2  ;;  %v9790_v52 = vunpack.i.l.bf16 %v9420_v2 }
 0xb49   : > { %6538 = vrot.lane.b32.xlu0 %v6537_v1, %s6596_s30 }
 0xb4a   : > { %v9436_v13 = vsel %vm416_vm5, %v9792_v3, %v9790_v52  ;;  %v9444_v34 = vsel %vm416_vm5, %v9791_v45, %v9789_v40  ;;  %v4623_v40 = vld [vmem:[%s9731_s4] sm:$0x1] }
 0xb4b   : > { %9929 = vst [vmem:[#allocation10_spill] sm:$0xff] %v9436_v13  ;;  %9930 = vst [vmem:[#allocation11_spill] sm:$0xff] %v9444_v34  ;;  %6523 = vrot.lane.b32.xlu1 %v6537_v1, %s6592_s29  ;;  %v9461_v28 = vpop.permute.xlu0 %6458 }
 0xb4c   : > { %9931 = vst [vmem:[#allocation12_spill] sm:$0xff] %v9461_v28 }
 0xb68   : > { %1436 = vadd.xlane.f32.xlu0 %v1435_v25 }
 0xb6f   : > { %1432 = vadd.xlane.f32.xlu1 %v1431_v30  ;;  %v6597_v30 = vmov 17  }
 0xb70   : > { %6563 = vset.pattern.permute.xlu1 %v6597_v30 }
 0xb7e   : > { %6543 = vrot.lane.b32.xlu0 %v9315_v61, %s6596_s30 }
 0xb80   : > { %6533 = vrot.lane.b32.xlu1 %v6517_v56, %s6596_s30 }
 0xb82   : > { %6558 = vrot.lane.b32.xlu0 %v6527_v47, %s6596_s30 }
 0xb84   : > { %6548 = vrot.lane.b32.xlu1 %v9323_v21, %s6596_s30 }
 0xb88   : > { %6553 = vrot.lane.b32.xlu1 %v9311_v8, %s6596_s30  ;;  %v9470_v8 = vld [vmem:[%s9731_s4] sm:$0xff] }
 0xb89   : > { %9932 = vst [vmem:[#allocation13_spill] sm:$0xff] %v9470_v8  ;;  %4626 = vperm.xlu0 %6562, %v9470_v8  }
 0xb8c   : > { %4231 = vrot.lane.b32.xlu1 %v9404_v23, %s6596_s30 }
 0xb8d   : > { %6565 = vset.pattern.permute.xlu0 %v6599_v29 }
 0xb8e   : > { %4716 = vperm.xlu0 %6565, %v4623_v40  }
 0xb90   : > { %4704 = vperm.xlu1 %6563, %v9470_v8  }
 0xb94   : > { %6564 = vset.pattern.permute.xlu1 %v9844_v51 }
 0xb96   : > { %v6464_v42 = vpop.permute.xlu1 %6463  ;;  %v9463_v39 = vpop.permute.xlu0 %6473 }
 0xb97   : > { %v6466_v57 = vunpack.i.h.bf16 %v6464_v42  ;;  %v6465_v49 = vunpack.i.l.bf16 %v6464_v42 }
 0xb9a   : > { %v9465_v61 = vpop.permute.xlu1 %6468 }
 0xb9b   : > { %v6471_v32 = vunpack.i.h.bf16 %v9465_v61 }
 0xb9e   : > { %v6479_v56 = vpop.permute.xlu0 %6478  ;;  %v9472_v63 = vpop.permute.xlu1 %6493 }
 0xb9f   : > { %v6481_v15 = vunpack.i.h.bf16 %v6479_v56  ;;  %v6480_v21 = vunpack.i.l.bf16 %v6479_v56  ;;  %v4563_v56 = vld [vmem:[%s9730_s3 + $0x98] sm:$0xff]  ;;  %v6495_v28 = vunpack.i.l.bf16 %v9472_v63 }
 0xba0   : > { %4566 = vperm.xlu1 %6564, %v4563_v56  }
 0xba1   : > { %v4146_v47 = vsel %vm352_vm3, %v6480_v21, %v6465_v49  ;;  %v4147_v25 = vsel %vm352_vm3, %v6481_v15, %v6466_v57 }
 0xba2   : > { %v6484_v1 = vpop.permute.xlu0 %6483  ;;  %v4165_v42 = vpack.c.bf16 %v4147_v25, %v4146_v47  ;;  %v9495_v3 = vpop.permute.xlu1 %6498 }
 0xba3   : > { %v6486_v30 = vunpack.i.h.bf16 %v6484_v1  ;;  %v6485_v44 = vunpack.i.l.bf16 %v6484_v1 }
 0xba4   : > { %4291 = vmatprep.subr.bf16.mxu0 %v4165_v42 }
 0xba5   : > { %v4137_v52 = vsel %vm352_vm3, %v6465_v49, %v6485_v44  ;;  %v4138_v45 = vsel %vm352_vm3, %v6466_v57, %v6486_v30  ;;  %v4155_v47 = vsel %vm352_vm3, %v6485_v44, %v6480_v21  ;;  %v4156_v25 = vsel %vm352_vm3, %v6486_v30, %v6481_v15 }
 0xba6   : > { %v4164_v1 = vpack.c.bf16 %v4156_v25, %v4155_v47  ;;  %v4166_v42 = vpack.c.bf16 %v4138_v45, %v4137_v52  ;;  %v9497_v0 = vpop.permute.xlu0 %6488  ;;  %v6509_v49 = vpop.permute.xlu1 %6508  ;;  %v6455_v47 = vunpack.i.l.bf16 %v9459_v38 }
 0xba7   : > { %v6511_v44 = vunpack.i.h.bf16 %v6509_v49  ;;  %v6510_v15 = vunpack.i.l.bf16 %v6509_v49  ;;  %v6430_v49 = vunpack.i.l.bf16 %v9382_v27  ;;  %v6490_v27 = vunpack.i.l.bf16 %v9497_v0 }
 0xba8   : > { %4292 = vmatpush1.bf16.msra.mxu0 %v4164_v1  ;;  %5302 = vmatpush3.bf16.msra.mxu1 %v4166_v42  ;;  %v6440_v1 = vunpack.i.l.bf16 %v9406_v55  ;;  %v6456_v42 = vunpack.i.h.bf16 %v9459_v38 }
 0xba9   : > { %5303 = vmatprep.subr.bf16.mxu1 %v9839_v36 }
 0xbaa   : > { %v9500_v57 = vpop.permute.xlu0 %6503  ;;  %v4151_v7 = vsel %vm352_vm3, %v6431_v20, %v6456_v42 }
 0xbae   : > { %v6519_v21 = vpop.permute.xlu0 %6518 }
 0xbaf   : > { %v6521_v56 = vunpack.i.h.bf16 %v6519_v21  ;;  %v6520_v30 = vunpack.i.l.bf16 %v6519_v21  ;;  %v6441_v21 = vunpack.i.h.bf16 %v9406_v55  ;;  %v6491_v55 = vunpack.i.h.bf16 %v9497_v0 }
 0xbb1   : > { %v4148_v45 = vsel %vm352_vm3, %v6510_v15, %v6520_v30  ;;  %v4149_v52 = vsel %vm352_vm3, %v6511_v44, %v6521_v56  ;;  %v4160_v38 = vsel %vm352_vm3, %v6441_v21, %v6431_v20  ;;  %v6470_v20 = vunpack.i.l.bf16 %v9465_v61 }
 0xbb2   : > { %v4168_v29 = vpack.c.bf16 %v4149_v52, %v4148_v45  ;;  %v4150_v45 = vsel %vm352_vm3, %v6430_v49, %v6455_v47  ;;  %v4159_v52 = vsel %vm352_vm3, %v6440_v1, %v6430_v49  ;;  %v4142_v0 = vsel %vm352_vm3, %v6456_v42, %v6441_v21 }
 0xbb3   : > { %v4152_v61 = vsel %vm352_vm3, %v6470_v20, %v6490_v27 }
 0xbb4   : > { %4293 = vmatprep.subr.bf16.mxu0 %v4168_v29 }
 0xbb5   : > { %v4136_v40 = vpop.permute.xlu1 %4135 }
 0xbb7   : > { %v6529_v8 = vpop.permute.xlu0 %6528 }
 0xbb8   : > { %v6531_v14 = vunpack.i.h.bf16 %v6529_v8 }
 0xbb9   : > { %v9507_v25 = vpop.permute.xlu1 %6513 }
 0xbba   : > { %9933 = vst [vmem:[#allocation14_spill] sm:$0xff] %v9507_v25  ;;  %v4171_v25 = vpack.c.bf16 %v4151_v7, %v4150_v45  ;;  %v4277_v45 = vld [vmem:[%s9729_s2 + $0x1c8] sm:$0xff] }
 0xbbd   : > { %v6524_v19 = vpop.permute.xlu1 %6523 }
 0xbbe   : > { %v6526_v29 = vunpack.i.h.bf16 %v6524_v19  ;;  %v6525_v48 = vunpack.i.l.bf16 %v6524_v19 }
 0xbc0   : > { %v4139_v2 = vsel %vm352_vm3, %v6520_v30, %v6525_v48  ;;  %v4140_v49 = vsel %vm352_vm3, %v6521_v56, %v6526_v29  ;;  %v4157_v19 = vsel %vm352_vm3, %v6525_v48, %v6510_v15  ;;  %v4158_v54 = vsel %vm352_vm3, %v6526_v29, %v6511_v44 }
 0xbc1   : > { %v4167_v13 = vpack.c.bf16 %v4158_v54, %v4157_v19  ;;  %v4169_v34 = vpack.c.bf16 %v4140_v49, %v4139_v2  ;;  %v4141_v30 = vsel %vm352_vm3, %v6455_v47, %v6440_v1  ;;  %v6496_v56 = vunpack.i.h.bf16 %v9472_v63 }
 0xbc2   : > { %v6530_v48 = vunpack.i.l.bf16 %v6529_v8  ;;  %v4153_v54 = vsel %vm352_vm3, %v6471_v32, %v6491_v55  ;;  %v4170_v2 = vpack.c.bf16 %v4160_v38, %v4159_v52  ;;  %v4172_v44 = vpack.c.bf16 %v4142_v0, %v4141_v30  ;;  %v9944_v0 = vld [vmem:[#allocation14_spill] sm:$0xff] }
 0xbc3   : > { %4294 = vmatpush1.bf16.msra.mxu0 %v4167_v13  ;;  %5304 = vmatpush3.bf16.msra.mxu1 %v4169_v34  ;;  %v4161_v15 = vsel %vm352_vm3, %v6495_v28, %v6470_v20  ;;  %v4162_v7 = vsel %vm352_vm3, %v6496_v56, %v6471_v32  ;;  %v4143_v13 = vsel %vm352_vm3, %v6490_v27, %v6495_v28  ;;  %v6516_v30 = vunpack.i.h.bf16 %v9944_v0 }
 0xbc4   : > { %4295 = vmatprep.subr.bf16.mxu0 %v4171_v25  ;;  %5305 = vmatprep.subr.bf16.mxu1 %v9839_v36  ;;  %v4144_v34 = vsel %vm352_vm3, %v6491_v55, %v6496_v56  ;;  %v4174_v8 = vpack.c.bf16 %v4153_v54, %v4152_v61  ;;  %v4154_v63 = vsel %vm352_vm3, %v6530_v48, %v6531_v14  ;;  %v6515_v56 = vunpack.i.l.bf16 %v9944_v0 }
 0xbc5   : > { %v4163_v47 = vsel %vm352_vm3, %v4136_v40, %v6530_v48  ;;  %v4145_v25 = vsel %vm352_vm3, %v6531_v14, %v4136_v40  ;;  %v4173_v32 = vpack.c.bf16 %v4162_v7, %v4161_v15  ;;  %v4175_v28 = vpack.c.bf16 %v4144_v34, %v4143_v13  ;;  %v9945_v15 = vld [vmem:[#allocation11_spill] sm:$0xff]  ;;  %v9946_v7 = vld [vmem:[#allocation10_spill] sm:$0xff] }
 0xbc6   : > { %v4177_v1 = vpack.c.bf16 %v4154_v63, %v4154_v63  ;;  %v4176_v42 = vpack.c.bf16 %v4163_v47, %v4163_v47  ;;  %v4178_v21 = vpack.c.bf16 %v4145_v25, %v4145_v25  ;;  %v4278_v52 = vpack.c.bf16 %v4277_v45, %v4277_v45  ;;  %v9948_v47 = vld [vmem:[#allocation12_spill] sm:$0xff] }
 0xbc7   : > { %4296 = vmatpush1.bf16.msra.mxu0 %v4170_v2  ;;  %5306 = vmatpush3.bf16.msra.mxu1 %v4172_v44  ;;  %v9934_v29 = vpack.c.bf16 %v9273_v4, %v9277_v50  ;;  %v4072_v38 = vpack.c.bf16 %v9210_v11, %v9374_v24  ;;  %v9935_v55 = vpack.c.bf16 %v9327_v43, %v9331_v12  ;;  %v6501_v43 = vunpack.i.h.bf16 %v9495_v3  ;;  %v6539_v24 = vpop.permute.xlu0 %6538 }
 0xbc8   : > { %4297 = vmatprep.subr.bf16.mxu0 %v4174_v8  ;;  %5307 = vmatprep.subr.bf16.mxu1 %v9839_v36  ;;  %v4283_v14 = vsel %vm1718_vm7, %v4176_v42, 0  ;;  %v4289_v40 = vsel %vm1718_vm7, %v4178_v21, 0  ;;  %v9936_v27 = vpack.c.bf16 %v9339_v41, %v9335_v53  ;;  %v4071_v4 = vpack.c.bf16 %v9199_v31, %v9362_v9 }
 0xbc9   : > { %v4073_v50 = vpack.c.bf16 %v9223_v26, %v9415_v37  ;;  %v9937_v11 = vpack.c.bf16 %v9232_v17, %v9205_v22  ;;  %v6500_v31 = vunpack.i.l.bf16 %v9495_v3  ;;  %v9938_v26 = vpack.c.bf16 %v9226_v16, %v9202_v18 }
 0xbca   : > { %v9939_v12 = vpack.c.bf16 %v9215_v5, %v9218_v6  ;;  %v6476_v53 = vunpack.i.h.bf16 %v9463_v39  ;;  %v6475_v41 = vunpack.i.l.bf16 %v9463_v39  ;;  %v9940_v22 = vpack.c.bf16 %v9303_v62, %v9307_v59  ;;  %v4275_v59 = vld [vmem:[%s9729_s2 + $0x1d0] sm:$0xff] }
 0xbcb   : > { %4298 = vmatpush1.bf16.msra.mxu0 %v4173_v32  ;;  %5308 = vmatpush3.bf16.msra.mxu1 %v4175_v28  ;;  %v4080_v17 = vpack.c.bf16 %v9400_v58, %v9400_v58  ;;  %v4082_v18 = vpack.c.bf16 %v9404_v23, %v9404_v23  ;;  %v6506_v16 = vunpack.i.h.bf16 %v9500_v57  ;;  %v6505_v5 = vunpack.i.l.bf16 %v9500_v57  ;;  %v9942_v23 = vld [vmem:[#allocation31_spill] sm:$0xff] }
 0xbcc   : > { %4883 = vmatprep.subr.msk.bf16.mxu0 %vm1718_vm7, %v4177_v1  ;;  %5309 = vmatprep.subr.bf16.mxu1 %v9839_v36  ;;  %v4081_v6 = vpack.c.bf16 %v9396_v33, %v9396_v33  ;;  %v4233_v9 = vsel %vm416_vm5, %v6475_v41, %v6500_v31  ;;  %v4234_v62 = vsel %vm416_vm5, %v6476_v53, %v6501_v43  ;;  %v6541_v19 = vunpack.i.h.bf16 %v6539_v24 }
 0xbcd   : > { %v9941_v58 = vpack.c.bf16 %v9295_v35, %v9299_v46  ;;  %v9943_v37 = vpack.c.bf16 %v9287_v60, %v9942_v23  ;;  %v4376_v33 = vsel %vm1718_vm7, %v4080_v17, 0  ;;  %v4382_v3 = vsel %vm1718_vm7, %v4082_v18, 0 }
 0xbce   : > { %v4242_v39 = vsel %vm416_vm5, %v6505_v5, %v6475_v41  ;;  %v4243_v57 = vsel %vm416_vm5, %v6506_v16, %v6476_v53  ;;  %v4261_v35 = vpack.c.bf16 %v4234_v62, %v4233_v9  ;;  %v4276_v46 = vpack.c.bf16 %v4275_v59, %v4275_v59 }
 0xbcf   : > { %4300 = vmatpush1.bf16.msra.mxu0 %v4283_v14  ;;  %5310 = vmatpush3.bf16.msra.mxu1 %v4289_v40  ;;  %v4251_v60 = vsel %vm416_vm5, %v6500_v31, %v6505_v5  ;;  %v4252_v49 = vsel %vm416_vm5, %v6501_v43, %v6506_v16  ;;  %v6540_v20 = vunpack.i.l.bf16 %v6539_v24  ;;  %v4260_v48 = vpack.c.bf16 %v4243_v57, %v4242_v39 }
 0xbd0   : > { %4384 = vmatprep.subr.bf16.mxu0 %v9934_v29  ;;  %5315 = vmatprep.subr.bf16.mxu1 %v9839_v36  ;;  %v4262_v61 = vpack.c.bf16 %v4252_v49, %v4251_v60  ;;  %v4254_v54 = vsel %vm416_vm5, %v6541_v19, %v6516_v30  ;;  %v9947_v13 = vpack.c.bf16 %v9945_v15, %v9946_v7  ;;  %v6461_v25 = vunpack.i.h.bf16 %v9948_v47 }
 0xbd1   : > { %v4253_v2 = vsel %vm416_vm5, %v6540_v20, %v6515_v56  ;;  %v6460_v32 = vunpack.i.l.bf16 %v9948_v47  ;;  %v6600_v15 = vmov 0.0|0.0  }
 0xbd2   : > { %4884 = vmatmul.mubr.msk.bf16.vlgmr.msra.gmra.mrb[68].mxu0 %vm1711_vm6, %v4278_v52  ;;  %5312 = vmatmul.mubr.msk.bf16.vlgmr.msra.gmra.mrb[88].mxu1 %vm1711_vm6, %v4278_v52  ;;  %v4265_v44 = vpack.c.bf16 %v4254_v54, %v4253_v2 }
 0xbd3   : > { %4385 = vmatpush1.bf16.msra.mxu0 %v9935_v55  ;;  %5316 = vmatpush3.bf16.msra.mxu1 %v9936_v27 }
 0xbd4   : > { %4386 = vmatprep.subr.bf16.mxu0 %v4072_v38  ;;  %5317 = vmatprep.subr.bf16.mxu1 %v9839_v36 }
 0xbd5   : > { %4416 = vmatprep.mubr.bf16.mxu0 %v9844_v51  ;;  %5325 = vmatprep.mubr.msk.bf16.mxu1 %vm6594_vm2, %v9839_v36 }
 0xbd7   : > { %4387 = vmatpush1.bf16.msra.mxu0 %v4071_v4  ;;  %5318 = vmatpush3.bf16.msra.mxu1 %v4073_v50  ;;  %v9952_v4 = vld [vmem:[#allocation9_spill] sm:$0xff] }
 0xbd8   : > { %4388 = vmatprep.subr.bf16.mxu0 %v9937_v11  ;;  %5319 = vmatprep.subr.bf16.mxu1 %v9839_v36  ;;  %v9953_v50 = vunpack.i.l.bf16 %v9952_v4  ;;  %v9954_v17 = vunpack.i.h.bf16 %v9952_v4 }
 0xbda   : > { %v4246_v11 = vsel %vm416_vm5, %v9953_v50, %v6460_v32  ;;  %v4247_v18 = vsel %vm416_vm5, %v9954_v17, %v6461_v25 }
 0xbdb   : > { %4389 = vmatpush1.bf16.msra.mxu0 %v9938_v26  ;;  %5320 = vmatpush3.bf16.msra.mxu1 %v9939_v12  ;;  %v4266_v24 = vpack.c.bf16 %v4247_v18, %v4246_v11 }
 0xbdc   : > { %4390 = vmatprep.subr.bf16.mxu0 %v9940_v22  ;;  %5321 = vmatprep.subr.bf16.mxu1 %v9839_v36 }
 0xbdf   : > { %4391 = vmatpush1.bf16.msra.mxu0 %v9941_v58  ;;  %5322 = vmatpush3.bf16.msra.mxu1 %v9943_v37 }
 0xbe0   : > { %4886 = vmatprep.subr.msk.bf16.mxu0 %vm1718_vm7, %v4081_v6  ;;  %5323 = vmatprep.subr.bf16.mxu1 %v9839_v36 }
 0xbe3   : > { %4393 = vmatpush1.bf16.msra.mxu0 %v4376_v33  ;;  %5324 = vmatpush3.bf16.msra.mxu1 %v4382_v3 }
 0xbe4   : > { %4479 = vmatprep.subr.bf16.mxu0 %v4261_v35  ;;  %5329 = vmatprep.subr.bf16.mxu1 %v9839_v36 }
 0xbe6   : > { %4887 = vmatmul.mubr.msk.bf16.vlgmr.msra.gmra.mrb[72].mxu0 %vm1711_vm6, %v4276_v46  ;;  %5326 = vmatmul.mubr.msk.bf16.vlgmr.msra.gmra.mrb[92].mxu1 %vm1711_vm6, %v4276_v46 }
 0xbe7   : > { %4480 = vmatpush1.bf16.msra.mxu0 %v4260_v48  ;;  %5330 = vmatpush3.bf16.msra.mxu1 %v4262_v61  ;;  %v4465_v48 = vld [vmem:[%s9729_s2 + $0x1d8] sm:$0xff] }
 0xbe8   : > { %5331 = vmatprep.subr.bf16.mxu1 %v9839_v36  ;;  %5339 = vmatprep.mubr.msk.bf16.mxu1 %vm6594_vm2, %v9839_v36  ;;  %v4466_v2 = vpack.c.bf16 %v4465_v48, %v4465_v48 }
 0xbe9   : > { %4511 = vmatprep.mubr.bf16.mxu0 %v9844_v51  ;;  %v9949_v51 = vld [vmem:[#allocation8_spill] sm:$0xff] }
 0xbea   : > { %v9950_v21 = vunpack.i.l.bf16 %v9949_v51  ;;  %v9951_v14 = vunpack.i.h.bf16 %v9949_v51 }
 0xbeb   : > { %5332 = vmatpush3.bf16.msra.mxu1 %v4265_v44 }
 0xbec   : > { %5333 = vmatprep.subr.bf16.mxu1 %v9839_v36  ;;  %v4237_v45 = vsel %vm416_vm5, %v6460_v32, %v9950_v21  ;;  %v4238_v40 = vsel %vm416_vm5, %v6461_v25, %v9951_v14 }
 0xbed   : > { %v4267_v6 = vpack.c.bf16 %v4238_v40, %v4237_v45 }
 0xbef   : > { %5334 = vmatpush3.bf16.msra.mxu1 %v9947_v13  ;;  %v9955_v13 = vld [vmem:[#allocation13_spill] sm:$0xff] }
 0xbf0   : > { %5335 = vmatprep.subr.bf16.mxu1 %v9839_v36 }
 0xbf5   : > { %v1437_v34 = vpop.xlane.xlu0 %1436 }
 0xbf6   : > { %v1439_v44 = vmul.f32 0.00390625, %v1437_v34 }
 0xbf9   : > { %v6544_v63 = vpop.permute.xlu0 %6543 }
 0xbfa   : > { %v6546_v12 = vunpack.i.h.bf16 %v6544_v63  ;;  %v6545_v53 = vunpack.i.l.bf16 %v6544_v63 }
 0xbfc   : > { %v1433_v8 = vpop.xlane.xlu1 %1432 }
 0xbfd   : > { %v6559_v52 = vpop.permute.xlu0 %6558  ;;  %v1438_v54 = vmul.f32 0.00390625, %v1433_v8 }
 0xbfe   : > { %v6561_v16 = vunpack.i.h.bf16 %v6559_v52  ;;  %v6560_v5 = vunpack.i.l.bf16 %v6559_v52 }
 0xbff   : > { %v5351_v7 = vpack.c.bf16 %v1439_v44, %v1438_v54 }
 0xc00   : > { %v6534_v28 = vpop.permute.xlu1 %6533  ;;  %v4250_v33 = vsel %vm416_vm5, %v6560_v5, %v6561_v16 }
 0xc01   : > { %v6536_v1 = vunpack.i.h.bf16 %v6534_v28  ;;  %v6535_v42 = vunpack.i.l.bf16 %v6534_v28 }
 0xc03   : > { %v4245_v29 = vsel %vm416_vm5, %v6516_v30, %v6536_v1  ;;  %v4244_v38 = vsel %vm416_vm5, %v6515_v56, %v6535_v42  ;;  %v4235_v55 = vsel %vm416_vm5, %v6535_v42, %v6540_v20  ;;  %v4236_v27 = vsel %vm416_vm5, %v6536_v1, %v6541_v19 }
 0xc04   : > { %v4263_v43 = vpack.c.bf16 %v4245_v29, %v4244_v38  ;;  %v6549_v31 = vpop.permute.xlu1 %6548  ;;  %v4264_v26 = vpack.c.bf16 %v4236_v27, %v4235_v55  ;;  %v4272_v56 = vpack.c.bf16 %v4250_v33, %v4250_v33 }
 0xc05   : > { %v6551_v41 = vunpack.i.h.bf16 %v6549_v31  ;;  %v6550_v22 = vunpack.i.l.bf16 %v6549_v31 }
 0xc06   : > { %4481 = vmatprep.subr.bf16.mxu0 %v4264_v26  ;;  %v4471_v10 = vsel %vm1718_vm7, %v4272_v56, 0  ;;  %v6601_v56 = vmov 1966171168  }
 0xc07   : > { %4482 = vmatpush1.bf16.msra.mxu0 %v4263_v43  ;;  %v4239_v9 = vsel %vm416_vm5, %v6545_v53, %v6550_v22  ;;  %v4240_v62 = vsel %vm416_vm5, %v6546_v12, %v6551_v41  ;;  %v4595_v48 = vunpack.c.l.s4 %v6601_v56 }
 0xc08   : > { %v6554_v59 = vpop.permute.xlu1 %6553  ;;  %4483 = vmatprep.subr.bf16.mxu0 %v4267_v6  ;;  %v4270_v37 = vpack.c.bf16 %v4240_v62, %v4239_v9 }
 0xc09   : > { %v6556_v58 = vunpack.i.h.bf16 %v6554_v59  ;;  %v6555_v23 = vunpack.i.l.bf16 %v6554_v59 }
 0xc0b   : > { %v4248_v3 = vsel %vm416_vm5, %v6555_v23, %v6545_v53  ;;  %v4249_v39 = vsel %vm416_vm5, %v6556_v58, %v6546_v12  ;;  %v4257_v57 = vsel %vm416_vm5, %v6550_v22, %v6555_v23  ;;  %v4258_v35 = vsel %vm416_vm5, %v6551_v41, %v6556_v58  ;;  %4484 = vmatpush1.bf16.msra.mxu0 %v4266_v24  ;;  %v4627_v24 = vpop.permute.xlu0 %4626 }
 0xc0c   : > { %v4269_v46 = vpack.c.bf16 %v4249_v39, %v4248_v3  ;;  %v4271_v60 = vpack.c.bf16 %v4258_v35, %v4257_v57  ;;  %v4232_v49 = vpop.permute.xlu1 %4231  ;;  %4485 = vmatprep.subr.bf16.mxu0 %v4270_v37 }
 0xc0d   : > { %v4241_v19 = vsel %vm416_vm5, %v6561_v16, %v4232_v49  ;;  %v4259_v20 = vsel %vm416_vm5, %v4232_v49, %v6560_v5 }
 0xc0e   : > { %v4273_v0 = vpack.c.bf16 %v4241_v19, %v4241_v19  ;;  %v4274_v30 = vpack.c.bf16 %v4259_v20, %v4259_v20  ;;  %5336 = vmatpush3.bf16.msra.mxu1 %v4271_v60 }
 0xc0f   : > { %4486 = vmatpush1.bf16.msra.mxu0 %v4269_v46  ;;  %5337 = vmatprep.subr.bf16.mxu1 %v9839_v36  ;;  %v4717_v54 = vpop.permute.xlu0 %4716 }
 0xc10   : > { %4889 = vmatprep.subr.msk.bf16.mxu0 %vm1718_vm7, %v4273_v0  ;;  %v4477_v61 = vsel %vm1718_vm7, %v4274_v30, 0  ;;  %v4705_v27 = vpop.permute.xlu1 %4704 }
 0xc12   : > { %5338 = vmatpush3.bf16.msra.mxu1 %v4477_v61 }
 0xc13   : > { %4488 = vmatpush1.bf16.msra.mxu0 %v4471_v10  ;;  %v4596_v10 = vunpack.c.0.s8 %v4595_v48 }
 0xc14   : > { %5350 = vmatprep.subr.bf16.mxu0 %v6600_v15 }
 0xc15   : > { %5340 = vmatmul.mubr.msk.bf16.vlgmr.msra.gmra.mrb[96].mxu1 %vm1711_vm6, %v4466_v2 }
 0xc16   : > { %4890 = vmatmul.mubr.msk.bf16.vlgmr.msra.gmra.mrb[76].mxu0 %vm1711_vm6, %v4466_v2 }
 0xc17   : > { %5352 = vmatpush3.bf16.msra.mxu0 %v5351_v7  ;;  %5347 = vmatprep.mubr.msk.f32.mxu0 %vm6594_vm2, %v9839_v36 }
 0xc1e   : > { %5348 = vmatmul.mubr.msk.f32.vlgmr.msra.gmra.mrb[80].mxu0 %vm4629_vm9, %v9955_v13 }
 0xc1f   : > { %v4567_v50 = vpop.permute.xlu1 %4566 }
 0xca5   : > { %v4325_v8 = vpop.f32.mrb[68].mxu0  ;;  %v4366_v63 = vpop.f32.mrb[88].mxu1 }
 0xca6   : > { %v4327_v47 = vpop.f32.mrb[69].mxu0  ;;  %v5313_v25 = vpop.f32.mrb[89].mxu1 }
 0xca7   : > { %v4329_v34 = vpop.f32.mrb[70].mxu0  ;;  %v4369_v32 = vpop.f32.mrb[90].mxu1 }
 0xca8   : > { %v4330_v28 = vpop.f32.mrb[71].mxu0  ;;  %v5314_v1 = vpop.f32.mrb[91].mxu1 }
 0xca9   : > { %v9957_v1 = vlaneseq }
 0xcab   : > { %vm4619_vm10 = vcmp.lt.s32.totalorder %v9957_v1, 384 }
 0xcb9   : > { %v4418_v42 = vpop.f32.mrb[72].mxu0  ;;  %v4459_v51 = vpop.f32.mrb[92].mxu1 }
 0xcba   : > { %v4419_v21 = vadd.f32 %v4418_v42, %v4325_v8  ;;  %v4420_v45 = vpop.f32.mrb[73].mxu0  ;;  %v4460_v14 = vadd.f32 %v4459_v51, %v4366_v63  ;;  %v5327_v40 = vpop.f32.mrb[93].mxu1  ;;  %v9956_v8 = vld [vmem:[#allocation29_spill] sm:$0xff] }
 0xcbb   : > { %v4421_v52 = vadd.f32 %v4420_v45, %v4327_v47  ;;  %v4422_v29 = vpop.f32.mrb[74].mxu0  ;;  %v4462_v36 = vpop.f32.mrb[94].mxu1  ;;  %v4599_v63 = vsub.s32 %v4596_v10, %v9956_v8 }
 0xcbc   : > { %v4423_v38 = vpop.f32.mrb[75].mxu0  ;;  %v5328_v55 = vpop.f32.mrb[95].mxu1 }
 0xce8   : > { %v4554_v4 = vpop.f32.mrb[96].mxu1 }
 0xce9   : > { %v4562_v11 = vadd.f32 %v4554_v4, %v4460_v14  ;;  %v4513_v43 = vpop.f32.mrb[76].mxu0  ;;  %v5341_v31 = vpop.f32.mrb[97].mxu1 }
 0xcea   : > { %v4560_v26 = vadd.f32 %v4513_v43, %v4419_v21  ;;  %v4515_v12 = vpop.f32.mrb[77].mxu0  ;;  %v4557_v53 = vpop.f32.mrb[98].mxu1 }
 0xceb   : > { %v4571_v41 = vadd.f32 %v4567_v50, %v4562_v11  ;;  %v4561_v22 = vadd.f32 %v4515_v12, %v4421_v52  ;;  %v4517_v17 = vpop.f32.mrb[78].mxu0  ;;  %v5342_v18 = vpop.f32.mrb[99].mxu1 }
 0xcec   : > { %v4569_v16 = vadd.f32 %v4567_v50, %v4560_v26  ;;  %v4518_v5 = vpop.f32.mrb[79].mxu0 }
 0xced   : > { %v4894_v6 = vmul.f32 -1.442695, %v4571_v41  ;;  %v4570_v9 = vadd.f32 %v4567_v50, %v4561_v22 }
 0xcee   : > { %v4892_v62 = vmul.f32 -1.442695, %v4569_v16 }
 0xcef   : > { %6566 = vpow2.f32 %v4894_v6  ;;  %v4893_v59 = vmul.f32 -1.442695, %v4570_v9 }
 0xcf0   : > { %6568 = vpow2.f32 %v4892_v62 }
 0xcf1   : > { %6570 = vpow2.f32 %v4893_v59  ;;  %v4698_v58 = vpop.f32.mrb[80].mxu0 }
 0xcf2   : > { %v4699_v23 = vadd.f32 %v4698_v58, %v4627_v24  ;;  %v5349_v37 = vpop.f32.mrb[81].mxu0 }
 0xcf4   : > { %v4702_v33 = vmax.f32 %v4699_v23, 0.0 }
 0xcf6   : > { %v4707_v3 = vmul.f32 %v4705_v27, %v4702_v33 }
 0xcf8   : > { %v4708_v39 = vrot.slane %v4707_v3, 4 }
 0xcf9   : > { %v6567_v57 = vpop.eup %6566 }
 0xcfa   : > { %v6569_v35 = vpop.eup %6568  ;;  %v4583_v46 = vadd.f32 1.0, %v6567_v57  ;;  %v4709_v60 = vadd.f32 %v4708_v39, %v4707_v3 }
 0xcfb   : > { %v6571_v49 = vpop.eup %6570  ;;  %v4581_v19 = vadd.f32 1.0, %v6569_v35 }
 0xcfc   : > { %6572 = vrcp.f32 %v4583_v46  ;;  %v4582_v20 = vadd.f32 1.0, %v6571_v49  ;;  %v4710_v0 = vrot.slane %v4709_v60, 2 }
 0xcfd   : > { %6574 = vrcp.f32 %v4581_v19 }
 0xcfe   : > { %6576 = vrcp.f32 %v4582_v20  ;;  %v4711_v30 = vadd.f32 %v4710_v0, %v4709_v60 }
 0xd00   : > { %v4712_v61 = vrot.slane %v4711_v30, 1 }
 0xd02   : > { %v4713_v2 = vadd.f32 %v4712_v61, %v4711_v30 }
 0xd04   : > { %v4719_v44 = vadd.f32 %v4717_v54, %v4713_v2 }
 0xd06   : > { %v6573_v15 = vpop.eup %6572  ;;  %v4896_v7 = vmul.f32 -1.442695, %v4719_v44 }
 0xd07   : > { %v6575_v13 = vpop.eup %6574  ;;  %v4607_v34 = vrot.slane %v6573_v15, %v4599_v63 }
 0xd08   : > { %v6577_v47 = vpop.eup %6576  ;;  %6578 = vpow2.f32 %v4896_v7 }
 0xd09   : > { %v4593_v25 = vcombine.low %v6575_v13, %v6577_v47 }
 0xd0b   : > { %v4600_v32 = vrot.slane %v4593_v25, %v4599_v63 }
 0xd0d   : > { %v4608_v28 = vcombine.low %v4600_v32, %v4607_v34 }
 0xd0f   : > { %v4615_v42 = vrot.slane %v4608_v28, %v4599_v63 }
 0xd11   : > { %4621 = vst.msk [vmem:[%s255_s10] sm:$0x7] %vm4619_vm10, %v4615_v42 }
 0xd12   : > { %v6579_v51 = vpop.eup %6578 }
 0xd13   : > { %v4723_v21 = vadd.f32 1.0, %v6579_v51 }
 0xd15   : > { %6580 = vrcp.f32 %v4723_v21 }
 0xd1f   : > { %v6581_v45 = vpop.eup %6580 }
 0xd20   : > { %4726 = vst [vmem:[%s258_s13] sm:$0x1] %v6581_v45 }
 0xd21 PF: > { %s17_s21 = sadd.s32 1, %s6588_s21  }
 0xd22   : > { %p14_p4 = scmp.ge.s32.totalorder %s17_s21, 4  }
 0xd24   :  { %16 = sbr.rel (!%p14_p4) target bundleno = 1 (0x1), region = 82 }

</bundles_post_ra>
